<compile_context>
chip_gen: v7x
topology: tpu7x:2x2x1
jax: 0.10.0
libtpu: 0.0.40
codegen_flags: <defaults>
</compile_context>

<pallas_src>
import functools

import jax
import jax.numpy as jnp
from jax.experimental import pallas as pl
from jax.experimental.pallas import tpu as pltpu


def _silu(t):
    # t * sigmoid(t) with an explicit exp-based sigmoid (EUP exp + VPU ops).
    return t * (1.0 / (1.0 + jnp.exp(-t)))


def _ghostconv_kernel(x_ref, w1_ref, b1_ref, w2_ref, b2_ref, o_ref, pad_ref,
                      *, c_half, h, w):
    """One batch element per grid step.

    x_ref  : (1, H*W, C1)   input, channels-last (lanes = C1)
    w1_ref : (C1, C_)       1x1 conv weight, BN scale folded, pre-transposed
    b1_ref : (1, C_)        folded BN bias for cv1 (f32)
    w2_ref : (25, C_)       depthwise 5x5 weight, BN scale folded (f32)
    b2_ref : (1, C_)        folded BN bias for cv2 (f32)
    o_ref  : (1, H*W, C2)   output, channels-last; C2 = 2*C_
    pad_ref: (H+4, W+4, C_) f32 VMEM scratch (zero-padded y for the 5x5 conv)
    """
    hw = h * w

    # ---- cv1: 1x1 conv (+ folded BN) + SiLU == one MXU matmul ---------------
    x2 = x_ref[0]                                                     # (HW, C1)
    y = jnp.dot(x2, w1_ref[...], preferred_element_type=jnp.float32)  # (HW, C_)
    y = _silu(y + b1_ref[...])                                        # bias bcast
    o_ref[0, :, :c_half] = y.astype(o_ref.dtype)                      # concat lo

    # ---- cv2: depthwise 5x5, stride 1, pad 2 (+ folded BN) + SiLU -----------
    pad_ref[...] = jnp.zeros_like(pad_ref)
    pad_ref[2:2 + h, 2:2 + w, :] = y.reshape(h, w, c_half)            # f32 copy
    w2 = w2_ref[...]                                                  # (25, C_)
    acc = jnp.zeros((h, w, c_half), jnp.float32)
    for dh in range(5):
        for dw in range(5):
            tap = w2[dh * 5 + dw][None, None, :]                      # (1,1,C_)
            acc = acc + tap * pad_ref[dh:dh + h, dw:dw + w, :]
    z = _silu(acc + b2_ref[...][None])                                # (1,1,C_)
    o_ref[0, :, c_half:] = z.reshape(hw, c_half).astype(o_ref.dtype)  # concat hi


def ghostconv_forward(x, cv1_w, cv1_bn, cv2_w, cv2_bn, *, eps=1e-5):
    """GhostConv inference forward.

    x      : (N, C1, H, W) NCHW (PyTorch layout)
    cv1_w  : (C_, C1, 1, 1)   ;  cv2_w : (C_, 1, 5, 5), groups = C_
    cvX_bn : (gamma, beta, running_mean, running_var), each (C_,)
    returns: (N, 2*C_, H, W)
    """
    N, C1, H, W = x.shape
    c_ = cv1_w.shape[0]
    C2 = 2 * c_
    HW = H * W

    # Fold BatchNorm (eval mode) into the conv weights/biases on the host.
    g1, be1, m1, v1 = cv1_bn
    s1 = g1 / jnp.sqrt(v1 + eps)
    w1t = (cv1_w.reshape(c_, C1) * s1[:, None]).T.astype(x.dtype)      # (C1, C_)
    b1 = (be1 - m1 * s1).reshape(1, c_).astype(jnp.float32)

    g2, be2, m2, v2 = cv2_bn
    s2 = g2 / jnp.sqrt(v2 + eps)
    w2t = (cv2_w.reshape(c_, 25) * s2[:, None]).T.astype(jnp.float32)  # (25, C_)
    b2 = (be2 - m2 * s2).reshape(1, c_).astype(jnp.float32)

    # Channels-last, spatial-flat layout for lane-dense DMAs.
    x_nhwc = x.transpose(0, 2, 3, 1).reshape(N, HW, C1)

    kernel = functools.partial(_ghostconv_kernel, c_half=c_, h=H, w=W)
    itemsize = x.dtype.itemsize
    flops = N * (2 * HW * C1 * c_ + 2 * HW * c_ * 25 + 8 * HW * c_)
    bytes_accessed = (N * HW * C1 * itemsize + N * HW * C2 * itemsize
                      + C1 * c_ * itemsize + (25 * c_ + 2 * c_) * 4)

    out = pl.pallas_call(
        kernel,
        out_shape=jax.ShapeDtypeStruct((N, HW, C2), x.dtype),
        grid=(N,),
        in_specs=[
            pl.BlockSpec((1, HW, C1), lambda n: (n, 0, 0)),
            pl.BlockSpec((C1, c_), lambda n: (0, 0)),
            pl.BlockSpec((1, c_), lambda n: (0, 0)),
            pl.BlockSpec((25, c_), lambda n: (0, 0)),
            pl.BlockSpec((1, c_), lambda n: (0, 0)),
        ],
        out_specs=pl.BlockSpec((1, HW, C2), lambda n: (n, 0, 0)),
        scratch_shapes=[pltpu.VMEM((H + 4, W + 4, c_), jnp.float32)],
        compiler_params=pltpu.CompilerParams(
            dimension_semantics=("parallel",)),
        cost_estimate=pl.CostEstimate(
            flops=flops, transcendentals=2 * N * HW * c_,
            bytes_accessed=bytes_accessed),
    )(x_nhwc, w1t, b1, w2t, b2)

    return out.reshape(N, H, W, C2).transpose(0, 3, 1, 2)


if __name__ == "__main__":
    key = jax.random.PRNGKey(0)
    ks = jax.random.split(key, 12)

    N, C1, C2, H, W = 2, 4, 8, 16, 16
    c_ = C2 // 2
    eps = 1e-5

    x = jax.random.normal(ks[0], (N, C1, H, W), dtype=jnp.float32)
    cv1_w = jax.random.normal(ks[1], (c_, C1, 1, 1), jnp.float32) / jnp.sqrt(C1)
    cv1_bn = (jax.random.uniform(ks[2], (c_,), jnp.float32, 0.5, 1.5),
              jax.random.normal(ks[3], (c_,), jnp.float32) * 0.1,
              jax.random.normal(ks[4], (c_,), jnp.float32) * 0.1,
              jax.random.uniform(ks[5], (c_,), jnp.float32, 0.5, 1.5))
    cv2_w = jax.random.normal(ks[6], (c_, 1, 5, 5), jnp.float32) / 5.0
    cv2_bn = (jax.random.uniform(ks[7], (c_,), jnp.float32, 0.5, 1.5),
              jax.random.normal(ks[8], (c_,), jnp.float32) * 0.1,
              jax.random.normal(ks[9], (c_,), jnp.float32) * 0.1,
              jax.random.uniform(ks[10], (c_,), jnp.float32, 0.5, 1.5))

    out = jax.block_until_ready(
        ghostconv_forward(x, cv1_w, cv1_bn, cv2_w, cv2_bn, eps=eps))

    # ---- pure-JAX reference (literal module math: conv -> BN(eval) -> SiLU) ----
    def bn(t, params):
        g, b, m, v = params
        return ((t - m[None, :, None, None])
                / jnp.sqrt(v[None, :, None, None] + eps)
                * g[None, :, None, None] + b[None, :, None, None])

    y_ref = jnp.einsum('nihw,oi->nohw', x, cv1_w[:, :, 0, 0])
    y_ref = jax.nn.silu(bn(y_ref, cv1_bn))

    yp = jnp.pad(y_ref, ((0, 0), (0, 0), (2, 2), (2, 2)))
    z_ref = jnp.zeros_like(y_ref)
    for dh in range(5):
        for dw in range(5):
            z_ref = z_ref + (cv2_w[:, 0, dh, dw][None, :, None, None]
                             * yp[:, :, dh:dh + H, dw:dw + W])
    z_ref = jax.nn.silu(bn(z_ref, cv2_bn))
    ref = jnp.concatenate([y_ref, z_ref], axis=1)

    assert out.shape == (N, C2, H, W), out.shape
    max_err = float(jnp.max(jnp.abs(out - ref)))
    assert jnp.allclose(out, ref, atol=1e-4, rtol=1e-4), max_err
    print("KERNEL_OK")
</pallas_src>

<mosaic_0001>
module attributes {stable_mosaic.version = 11 : i64} {
  func.func @_ghostconv_kernel(%arg0: i32, %arg1: memref<1x256x4xf32, #tpu.memory_space<vmem>>, %arg2: memref<4x4xf32, #tpu.memory_space<vmem>>, %arg3: memref<1x4xf32, #tpu.memory_space<vmem>>, %arg4: memref<25x4xf32, #tpu.memory_space<vmem>>, %arg5: memref<1x4xf32, #tpu.memory_space<vmem>>, %arg6: memref<1x256x8xf32, #tpu.memory_space<vmem>>, %arg7: memref<20x20x4xf32, #tpu.memory_space<vmem>>) attributes {dimension_semantics = [#tpu.dimension_semantics<parallel>], iteration_bounds = array<i64: 2>, scalar_prefetch = 0 : i64, scratch_operands = 1 : i64, tpu.core_type = #tpu.core_type<tc>, window_params = [{transform_indices = @transform_0, window_bounds = array<i64: 1, 256, 4>}, {pipeline_mode = #tpu.pipeline_mode<synchronous>, transform_indices = @transform_1, window_bounds = array<i64: 4, 4>}, {pipeline_mode = #tpu.pipeline_mode<synchronous>, transform_indices = @transform_2, window_bounds = array<i64: 1, 4>}, {pipeline_mode = #tpu.pipeline_mode<synchronous>, transform_indices = @transform_3, window_bounds = array<i64: 25, 4>}, {pipeline_mode = #tpu.pipeline_mode<synchronous>, transform_indices = @transform_4, window_bounds = array<i64: 1, 4>}, {transform_indices = @transform_5, window_bounds = array<i64: 1, 256, 8>}]} {
    %c0 = arith.constant 0 : index
    %c0_0 = arith.constant 0 : index
    %c0_1 = arith.constant 0 : index
    %0 = vector.load %arg1[%c0, %c0_0, %c0_1] : memref<1x256x4xf32, #tpu.memory_space<vmem>>, vector<1x256x4xf32>
    %1 = vector.shape_cast %0 : vector<1x256x4xf32> to vector<256x4xf32>
    %c0_2 = arith.constant 0 : index
    %c0_3 = arith.constant 0 : index
    %2 = vector.load %arg2[%c0_2, %c0_3] : memref<4x4xf32, #tpu.memory_space<vmem>>, vector<4x4xf32>
    %cst = arith.constant dense<0.000000e+00> : vector<256x4xf32>
    %3 = tpu.matmul %1, %2, %cst {dimension_numbers = #tpu.dot_dimension_numbers<[1], [0], [0], [1], [0, 0, 1, 1], [], []>} : vector<256x4xf32>, vector<4x4xf32>, vector<256x4xf32> -> vector<256x4xf32>
    %c0_4 = arith.constant 0 : index
    %c0_5 = arith.constant 0 : index
    %4 = vector.load %arg3[%c0_4, %c0_5] : memref<1x4xf32, #tpu.memory_space<vmem>>, vector<1x4xf32>
    %5 = vector.broadcast %4 : vector<1x4xf32> to vector<256x4xf32>
    %6 = arith.addf %3, %5 : vector<256x4xf32>
    %cst_6 = arith.constant 0.000000e+00 : f32
    %7 = vector.broadcast %cst_6 : f32 to vector<256x4xf32>
    %8 = arith.subf %7, %6 : vector<256x4xf32>
    %9 = math.exp %8 : vector<256x4xf32>
    %cst_7 = arith.constant 1.000000e+00 : f32
    %10 = vector.broadcast %cst_7 : f32 to vector<256x4xf32>
    %11 = arith.addf %10, %9 : vector<256x4xf32>
    %cst_8 = arith.constant 1.000000e+00 : f32
    %12 = vector.broadcast %cst_8 : f32 to vector<256x4xf32>
    %13 = arith.divf %12, %11 : vector<256x4xf32>
    %14 = arith.mulf %6, %13 : vector<256x4xf32>
    %c0_9 = arith.constant 0 : index
    %c0_10 = arith.constant 0 : index
    %c0_11 = arith.constant 0 : index
    %15 = vector.load %arg6[%c0_9, %c0_10, %c0_11] : memref<1x256x8xf32, #tpu.memory_space<vmem>>, vector<1x256x4xf32>
    %16 = vector.shape_cast %15 : vector<1x256x4xf32> to vector<256x4xf32>
    %17 = vector.shape_cast %14 : vector<256x4xf32> to vector<1x256x4xf32>
    tpu.vector_store %arg6[%c0_9, %c0_10, %c0_11], %17 {strides = array<i32>} : memref<1x256x8xf32, #tpu.memory_space<vmem>>, vector<1x256x4xf32>,
    %cst_12 = arith.constant 0.000000e+00 : f32
    %18 = vector.broadcast %cst_12 : f32 to vector<20x20x4xf32>
    %c0_13 = arith.constant 0 : index
    %c0_14 = arith.constant 0 : index
    %c0_15 = arith.constant 0 : index
    %19 = vector.load %arg7[%c0_13, %c0_14, %c0_15] : memref<20x20x4xf32, #tpu.memory_space<vmem>>, vector<20x20x4xf32>
    tpu.vector_store %arg7[%c0_13, %c0_14, %c0_15], %18 {strides = array<i32>} : memref<20x20x4xf32, #tpu.memory_space<vmem>>, vector<20x20x4xf32>,
    %20 = vector.shape_cast %14 : vector<256x4xf32> to vector<16x16x4xf32>
    %c2 = arith.constant 2 : index
    %c2_16 = arith.constant 2 : index
    %c0_17 = arith.constant 0 : index
    %21 = vector.load %arg7[%c2, %c2_16, %c0_17] : memref<20x20x4xf32, #tpu.memory_space<vmem>>, vector<16x16x4xf32>
    tpu.vector_store %arg7[%c2, %c2_16, %c0_17], %20 {strides = array<i32>} : memref<20x20x4xf32, #tpu.memory_space<vmem>>, vector<16x16x4xf32>,
    %c0_18 = arith.constant 0 : index
    %c0_19 = arith.constant 0 : index
    %22 = vector.load %arg4[%c0_18, %c0_19] : memref<25x4xf32, #tpu.memory_space<vmem>>, vector<25x4xf32>
    %cst_20 = arith.constant 0.000000e+00 : f32
    %23 = vector.broadcast %cst_20 : f32 to vector<16x16x4xf32>
    %24 = vector.extract_strided_slice %22 {offsets = [0, 0], sizes = [1, 4], strides = [1, 1]} : vector<25x4xf32> to vector<1x4xf32>
    %25 = vector.shape_cast %24 : vector<1x4xf32> to vector<4xf32>
    %26 = vector.shape_cast %25 : vector<4xf32> to vector<1x1x4xf32>
    %c0_21 = arith.constant 0 : index
    %c0_22 = arith.constant 0 : index
    %c0_23 = arith.constant 0 : index
    %27 = vector.load %arg7[%c0_21, %c0_22, %c0_23] : memref<20x20x4xf32, #tpu.memory_space<vmem>>, vector<16x16x4xf32>
    %28 = vector.broadcast %26 : vector<1x1x4xf32> to vector<16x16x4xf32>
    %29 = arith.mulf %28, %27 : vector<16x16x4xf32>
    %30 = arith.addf %23, %29 : vector<16x16x4xf32>
    %31 = vector.extract_strided_slice %22 {offsets = [1, 0], sizes = [1, 4], strides = [1, 1]} : vector<25x4xf32> to vector<1x4xf32>
    %32 = vector.shape_cast %31 : vector<1x4xf32> to vector<4xf32>
    %33 = vector.shape_cast %32 : vector<4xf32> to vector<1x1x4xf32>
    %c0_24 = arith.constant 0 : index
    %c1 = arith.constant 1 : index
    %c0_25 = arith.constant 0 : index
    %34 = vector.load %arg7[%c0_24, %c1, %c0_25] : memref<20x20x4xf32, #tpu.memory_space<vmem>>, vector<16x16x4xf32>
    %35 = vector.broadcast %33 : vector<1x1x4xf32> to vector<16x16x4xf32>
    %36 = arith.mulf %35, %34 : vector<16x16x4xf32>
    %37 = arith.addf %30, %36 : vector<16x16x4xf32>
    %38 = vector.extract_strided_slice %22 {offsets = [2, 0], sizes = [1, 4], strides = [1, 1]} : vector<25x4xf32> to vector<1x4xf32>
    %39 = vector.shape_cast %38 : vector<1x4xf32> to vector<4xf32>
    %40 = vector.shape_cast %39 : vector<4xf32> to vector<1x1x4xf32>
    %c0_26 = arith.constant 0 : index
    %c2_27 = arith.constant 2 : index
    %c0_28 = arith.constant 0 : index
    %41 = vector.load %arg7[%c0_26, %c2_27, %c0_28] : memref<20x20x4xf32, #tpu.memory_space<vmem>>, vector<16x16x4xf32>
    %42 = vector.broadcast %40 : vector<1x1x4xf32> to vector<16x16x4xf32>
    %43 = arith.mulf %42, %41 : vector<16x16x4xf32>
    %44 = arith.addf %37, %43 : vector<16x16x4xf32>
    %45 = vector.extract_strided_slice %22 {offsets = [3, 0], sizes = [1, 4], strides = [1, 1]} : vector<25x4xf32> to vector<1x4xf32>
    %46 = vector.shape_cast %45 : vector<1x4xf32> to vector<4xf32>
    %47 = vector.shape_cast %46 : vector<4xf32> to vector<1x1x4xf32>
    %c0_29 = arith.constant 0 : index
    %c3 = arith.constant 3 : index
    %c0_30 = arith.constant 0 : index
    %48 = vector.load %arg7[%c0_29, %c3, %c0_30] : memref<20x20x4xf32, #tpu.memory_space<vmem>>, vector<16x16x4xf32>
    %49 = vector.broadcast %47 : vector<1x1x4xf32> to vector<16x16x4xf32>
    %50 = arith.mulf %49, %48 : vector<16x16x4xf32>
    %51 = arith.addf %44, %50 : vector<16x16x4xf32>
    %52 = vector.extract_strided_slice %22 {offsets = [4, 0], sizes = [1, 4], strides = [1, 1]} : vector<25x4xf32> to vector<1x4xf32>
    %53 = vector.shape_cast %52 : vector<1x4xf32> to vector<4xf32>
    %54 = vector.shape_cast %53 : vector<4xf32> to vector<1x1x4xf32>
    %c0_31 = arith.constant 0 : index
    %c4 = arith.constant 4 : index
    %c0_32 = arith.constant 0 : index
    %55 = vector.load %arg7[%c0_31, %c4, %c0_32] : memref<20x20x4xf32, #tpu.memory_space<vmem>>, vector<16x16x4xf32>
    %56 = vector.broadcast %54 : vector<1x1x4xf32> to vector<16x16x4xf32>
    %57 = arith.mulf %56, %55 : vector<16x16x4xf32>
    %58 = arith.addf %51, %57 : vector<16x16x4xf32>
    %59 = vector.extract_strided_slice %22 {offsets = [5, 0], sizes = [1, 4], strides = [1, 1]} : vector<25x4xf32> to vector<1x4xf32>
    %60 = vector.shape_cast %59 : vector<1x4xf32> to vector<4xf32>
    %61 = vector.shape_cast %60 : vector<4xf32> to vector<1x1x4xf32>
    %c1_33 = arith.constant 1 : index
    %c0_34 = arith.constant 0 : index
    %c0_35 = arith.constant 0 : index
    %62 = vector.load %arg7[%c1_33, %c0_34, %c0_35] : memref<20x20x4xf32, #tpu.memory_space<vmem>>, vector<16x16x4xf32>
    %63 = vector.broadcast %61 : vector<1x1x4xf32> to vector<16x16x4xf32>
    %64 = arith.mulf %63, %62 : vector<16x16x4xf32>
    %65 = arith.addf %58, %64 : vector<16x16x4xf32>
    %66 = vector.extract_strided_slice %22 {offsets = [6, 0], sizes = [1, 4], strides = [1, 1]} : vector<25x4xf32> to vector<1x4xf32>
    %67 = vector.shape_cast %66 : vector<1x4xf32> to vector<4xf32>
    %68 = vector.shape_cast %67 : vector<4xf32> to vector<1x1x4xf32>
    %c1_36 = arith.constant 1 : index
    %c1_37 = arith.constant 1 : index
    %c0_38 = arith.constant 0 : index
    %69 = vector.load %arg7[%c1_36, %c1_37, %c0_38] : memref<20x20x4xf32, #tpu.memory_space<vmem>>, vector<16x16x4xf32>
    %70 = vector.broadcast %68 : vector<1x1x4xf32> to vector<16x16x4xf32>
    %71 = arith.mulf %70, %69 : vector<16x16x4xf32>
    %72 = arith.addf %65, %71 : vector<16x16x4xf32>
    %73 = vector.extract_strided_slice %22 {offsets = [7, 0], sizes = [1, 4], strides = [1, 1]} : vector<25x4xf32> to vector<1x4xf32>
    %74 = vector.shape_cast %73 : vector<1x4xf32> to vector<4xf32>
    %75 = vector.shape_cast %74 : vector<4xf32> to vector<1x1x4xf32>
    %c1_39 = arith.constant 1 : index
    %c2_40 = arith.constant 2 : index
    %c0_41 = arith.constant 0 : index
    %76 = vector.load %arg7[%c1_39, %c2_40, %c0_41] : memref<20x20x4xf32, #tpu.memory_space<vmem>>, vector<16x16x4xf32>
    %77 = vector.broadcast %75 : vector<1x1x4xf32> to vector<16x16x4xf32>
    %78 = arith.mulf %77, %76 : vector<16x16x4xf32>
    %79 = arith.addf %72, %78 : vector<16x16x4xf32>
    %80 = vector.extract_strided_slice %22 {offsets = [8, 0], sizes = [1, 4], strides = [1, 1]} : vector<25x4xf32> to vector<1x4xf32>
    %81 = vector.shape_cast %80 : vector<1x4xf32> to vector<4xf32>
    %82 = vector.shape_cast %81 : vector<4xf32> to vector<1x1x4xf32>
    %c1_42 = arith.constant 1 : index
    %c3_43 = arith.constant 3 : index
    %c0_44 = arith.constant 0 : index
    %83 = vector.load %arg7[%c1_42, %c3_43, %c0_44] : memref<20x20x4xf32, #tpu.memory_space<vmem>>, vector<16x16x4xf32>
    %84 = vector.broadcast %82 : vector<1x1x4xf32> to vector<16x16x4xf32>
    %85 = arith.mulf %84, %83 : vector<16x16x4xf32>
    %86 = arith.addf %79, %85 : vector<16x16x4xf32>
    %87 = vector.extract_strided_slice %22 {offsets = [9, 0], sizes = [1, 4], strides = [1, 1]} : vector<25x4xf32> to vector<1x4xf32>
    %88 = vector.shape_cast %87 : vector<1x4xf32> to vector<4xf32>
    %89 = vector.shape_cast %88 : vector<4xf32> to vector<1x1x4xf32>
    %c1_45 = arith.constant 1 : index
    %c4_46 = arith.constant 4 : index
    %c0_47 = arith.constant 0 : index
    %90 = vector.load %arg7[%c1_45, %c4_46, %c0_47] : memref<20x20x4xf32, #tpu.memory_space<vmem>>, vector<16x16x4xf32>
    %91 = vector.broadcast %89 : vector<1x1x4xf32> to vector<16x16x4xf32>
    %92 = arith.mulf %91, %90 : vector<16x16x4xf32>
    %93 = arith.addf %86, %92 : vector<16x16x4xf32>
    %94 = vector.extract_strided_slice %22 {offsets = [10, 0], sizes = [1, 4], strides = [1, 1]} : vector<25x4xf32> to vector<1x4xf32>
    %95 = vector.shape_cast %94 : vector<1x4xf32> to vector<4xf32>
    %96 = vector.shape_cast %95 : vector<4xf32> to vector<1x1x4xf32>
    %c2_48 = arith.constant 2 : index
    %c0_49 = arith.constant 0 : index
    %c0_50 = arith.constant 0 : index
    %97 = vector.load %arg7[%c2_48, %c0_49, %c0_50] : memref<20x20x4xf32, #tpu.memory_space<vmem>>, vector<16x16x4xf32>
    %98 = vector.broadcast %96 : vector<1x1x4xf32> to vector<16x16x4xf32>
    %99 = arith.mulf %98, %97 : vector<16x16x4xf32>
    %100 = arith.addf %93, %99 : vector<16x16x4xf32>
    %101 = vector.extract_strided_slice %22 {offsets = [11, 0], sizes = [1, 4], strides = [1, 1]} : vector<25x4xf32> to vector<1x4xf32>
    %102 = vector.shape_cast %101 : vector<1x4xf32> to vector<4xf32>
    %103 = vector.shape_cast %102 : vector<4xf32> to vector<1x1x4xf32>
    %c2_51 = arith.constant 2 : index
    %c1_52 = arith.constant 1 : index
    %c0_53 = arith.constant 0 : index
    %104 = vector.load %arg7[%c2_51, %c1_52, %c0_53] : memref<20x20x4xf32, #tpu.memory_space<vmem>>, vector<16x16x4xf32>
    %105 = vector.broadcast %103 : vector<1x1x4xf32> to vector<16x16x4xf32>
    %106 = arith.mulf %105, %104 : vector<16x16x4xf32>
    %107 = arith.addf %100, %106 : vector<16x16x4xf32>
    %108 = vector.extract_strided_slice %22 {offsets = [12, 0], sizes = [1, 4], strides = [1, 1]} : vector<25x4xf32> to vector<1x4xf32>
    %109 = vector.shape_cast %108 : vector<1x4xf32> to vector<4xf32>
    %110 = vector.shape_cast %109 : vector<4xf32> to vector<1x1x4xf32>
    %c2_54 = arith.constant 2 : index
    %c2_55 = arith.constant 2 : index
    %c0_56 = arith.constant 0 : index
    %111 = vector.load %arg7[%c2_54, %c2_55, %c0_56] : memref<20x20x4xf32, #tpu.memory_space<vmem>>, vector<16x16x4xf32>
    %112 = vector.broadcast %110 : vector<1x1x4xf32> to vector<16x16x4xf32>
    %113 = arith.mulf %112, %111 : vector<16x16x4xf32>
    %114 = arith.addf %107, %113 : vector<16x16x4xf32>
    %115 = vector.extract_strided_slice %22 {offsets = [13, 0], sizes = [1, 4], strides = [1, 1]} : vector<25x4xf32> to vector<1x4xf32>
    %116 = vector.shape_cast %115 : vector<1x4xf32> to vector<4xf32>
    %117 = vector.shape_cast %116 : vector<4xf32> to vector<1x1x4xf32>
    %c2_57 = arith.constant 2 : index
    %c3_58 = arith.constant 3 : index
    %c0_59 = arith.constant 0 : index
    %118 = vector.load %arg7[%c2_57, %c3_58, %c0_59] : memref<20x20x4xf32, #tpu.memory_space<vmem>>, vector<16x16x4xf32>
    %119 = vector.broadcast %117 : vector<1x1x4xf32> to vector<16x16x4xf32>
    %120 = arith.mulf %119, %118 : vector<16x16x4xf32>
    %121 = arith.addf %114, %120 : vector<16x16x4xf32>
    %122 = vector.extract_strided_slice %22 {offsets = [14, 0], sizes = [1, 4], strides = [1, 1]} : vector<25x4xf32> to vector<1x4xf32>
    %123 = vector.shape_cast %122 : vector<1x4xf32> to vector<4xf32>
    %124 = vector.shape_cast %123 : vector<4xf32> to vector<1x1x4xf32>
    %c2_60 = arith.constant 2 : index
    %c4_61 = arith.constant 4 : index
    %c0_62 = arith.constant 0 : index
    %125 = vector.load %arg7[%c2_60, %c4_61, %c0_62] : memref<20x20x4xf32, #tpu.memory_space<vmem>>, vector<16x16x4xf32>
    %126 = vector.broadcast %124 : vector<1x1x4xf32> to vector<16x16x4xf32>
    %127 = arith.mulf %126, %125 : vector<16x16x4xf32>
    %128 = arith.addf %121, %127 : vector<16x16x4xf32>
    %129 = vector.extract_strided_slice %22 {offsets = [15, 0], sizes = [1, 4], strides = [1, 1]} : vector<25x4xf32> to vector<1x4xf32>
    %130 = vector.shape_cast %129 : vector<1x4xf32> to vector<4xf32>
    %131 = vector.shape_cast %130 : vector<4xf32> to vector<1x1x4xf32>
    %c3_63 = arith.constant 3 : index
    %c0_64 = arith.constant 0 : index
    %c0_65 = arith.constant 0 : index
    %132 = vector.load %arg7[%c3_63, %c0_64, %c0_65] : memref<20x20x4xf32, #tpu.memory_space<vmem>>, vector<16x16x4xf32>
    %133 = vector.broadcast %131 : vector<1x1x4xf32> to vector<16x16x4xf32>
    %134 = arith.mulf %133, %132 : vector<16x16x4xf32>
    %135 = arith.addf %128, %134 : vector<16x16x4xf32>
    %136 = vector.extract_strided_slice %22 {offsets = [16, 0], sizes = [1, 4], strides = [1, 1]} : vector<25x4xf32> to vector<1x4xf32>
    %137 = vector.shape_cast %136 : vector<1x4xf32> to vector<4xf32>
    %138 = vector.shape_cast %137 : vector<4xf32> to vector<1x1x4xf32>
    %c3_66 = arith.constant 3 : index
    %c1_67 = arith.constant 1 : index
    %c0_68 = arith.constant 0 : index
    %139 = vector.load %arg7[%c3_66, %c1_67, %c0_68] : memref<20x20x4xf32, #tpu.memory_space<vmem>>, vector<16x16x4xf32>
    %140 = vector.broadcast %138 : vector<1x1x4xf32> to vector<16x16x4xf32>
    %141 = arith.mulf %140, %139 : vector<16x16x4xf32>
    %142 = arith.addf %135, %141 : vector<16x16x4xf32>
    %143 = vector.extract_strided_slice %22 {offsets = [17, 0], sizes = [1, 4], strides = [1, 1]} : vector<25x4xf32> to vector<1x4xf32>
    %144 = vector.shape_cast %143 : vector<1x4xf32> to vector<4xf32>
    %145 = vector.shape_cast %144 : vector<4xf32> to vector<1x1x4xf32>
    %c3_69 = arith.constant 3 : index
    %c2_70 = arith.constant 2 : index
    %c0_71 = arith.constant 0 : index
    %146 = vector.load %arg7[%c3_69, %c2_70, %c0_71] : memref<20x20x4xf32, #tpu.memory_space<vmem>>, vector<16x16x4xf32>
    %147 = vector.broadcast %145 : vector<1x1x4xf32> to vector<16x16x4xf32>
    %148 = arith.mulf %147, %146 : vector<16x16x4xf32>
    %149 = arith.addf %142, %148 : vector<16x16x4xf32>
    %150 = vector.extract_strided_slice %22 {offsets = [18, 0], sizes = [1, 4], strides = [1, 1]} : vector<25x4xf32> to vector<1x4xf32>
    %151 = vector.shape_cast %150 : vector<1x4xf32> to vector<4xf32>
    %152 = vector.shape_cast %151 : vector<4xf32> to vector<1x1x4xf32>
    %c3_72 = arith.constant 3 : index
    %c3_73 = arith.constant 3 : index
    %c0_74 = arith.constant 0 : index
    %153 = vector.load %arg7[%c3_72, %c3_73, %c0_74] : memref<20x20x4xf32, #tpu.memory_space<vmem>>, vector<16x16x4xf32>
    %154 = vector.broadcast %152 : vector<1x1x4xf32> to vector<16x16x4xf32>
    %155 = arith.mulf %154, %153 : vector<16x16x4xf32>
    %156 = arith.addf %149, %155 : vector<16x16x4xf32>
    %157 = vector.extract_strided_slice %22 {offsets = [19, 0], sizes = [1, 4], strides = [1, 1]} : vector<25x4xf32> to vector<1x4xf32>
    %158 = vector.shape_cast %157 : vector<1x4xf32> to vector<4xf32>
    %159 = vector.shape_cast %158 : vector<4xf32> to vector<1x1x4xf32>
    %c3_75 = arith.constant 3 : index
    %c4_76 = arith.constant 4 : index
    %c0_77 = arith.constant 0 : index
    %160 = vector.load %arg7[%c3_75, %c4_76, %c0_77] : memref<20x20x4xf32, #tpu.memory_space<vmem>>, vector<16x16x4xf32>
    %161 = vector.broadcast %159 : vector<1x1x4xf32> to vector<16x16x4xf32>
    %162 = arith.mulf %161, %160 : vector<16x16x4xf32>
    %163 = arith.addf %156, %162 : vector<16x16x4xf32>
    %164 = vector.extract_strided_slice %22 {offsets = [20, 0], sizes = [1, 4], strides = [1, 1]} : vector<25x4xf32> to vector<1x4xf32>
    %165 = vector.shape_cast %164 : vector<1x4xf32> to vector<4xf32>
    %166 = vector.shape_cast %165 : vector<4xf32> to vector<1x1x4xf32>
    %c4_78 = arith.constant 4 : index
    %c0_79 = arith.constant 0 : index
    %c0_80 = arith.constant 0 : index
    %167 = vector.load %arg7[%c4_78, %c0_79, %c0_80] : memref<20x20x4xf32, #tpu.memory_space<vmem>>, vector<16x16x4xf32>
    %168 = vector.broadcast %166 : vector<1x1x4xf32> to vector<16x16x4xf32>
    %169 = arith.mulf %168, %167 : vector<16x16x4xf32>
    %170 = arith.addf %163, %169 : vector<16x16x4xf32>
    %171 = vector.extract_strided_slice %22 {offsets = [21, 0], sizes = [1, 4], strides = [1, 1]} : vector<25x4xf32> to vector<1x4xf32>
    %172 = vector.shape_cast %171 : vector<1x4xf32> to vector<4xf32>
    %173 = vector.shape_cast %172 : vector<4xf32> to vector<1x1x4xf32>
    %c4_81 = arith.constant 4 : index
    %c1_82 = arith.constant 1 : index
    %c0_83 = arith.constant 0 : index
    %174 = vector.load %arg7[%c4_81, %c1_82, %c0_83] : memref<20x20x4xf32, #tpu.memory_space<vmem>>, vector<16x16x4xf32>
    %175 = vector.broadcast %173 : vector<1x1x4xf32> to vector<16x16x4xf32>
    %176 = arith.mulf %175, %174 : vector<16x16x4xf32>
    %177 = arith.addf %170, %176 : vector<16x16x4xf32>
    %178 = vector.extract_strided_slice %22 {offsets = [22, 0], sizes = [1, 4], strides = [1, 1]} : vector<25x4xf32> to vector<1x4xf32>
    %179 = vector.shape_cast %178 : vector<1x4xf32> to vector<4xf32>
    %180 = vector.shape_cast %179 : vector<4xf32> to vector<1x1x4xf32>
    %c4_84 = arith.constant 4 : index
    %c2_85 = arith.constant 2 : index
    %c0_86 = arith.constant 0 : index
    %181 = vector.load %arg7[%c4_84, %c2_85, %c0_86] : memref<20x20x4xf32, #tpu.memory_space<vmem>>, vector<16x16x4xf32>
    %182 = vector.broadcast %180 : vector<1x1x4xf32> to vector<16x16x4xf32>
    %183 = arith.mulf %182, %181 : vector<16x16x4xf32>
    %184 = arith.addf %177, %183 : vector<16x16x4xf32>
    %185 = vector.extract_strided_slice %22 {offsets = [23, 0], sizes = [1, 4], strides = [1, 1]} : vector<25x4xf32> to vector<1x4xf32>
    %186 = vector.shape_cast %185 : vector<1x4xf32> to vector<4xf32>
    %187 = vector.shape_cast %186 : vector<4xf32> to vector<1x1x4xf32>
    %c4_87 = arith.constant 4 : index
    %c3_88 = arith.constant 3 : index
    %c0_89 = arith.constant 0 : index
    %188 = vector.load %arg7[%c4_87, %c3_88, %c0_89] : memref<20x20x4xf32, #tpu.memory_space<vmem>>, vector<16x16x4xf32>
    %189 = vector.broadcast %187 : vector<1x1x4xf32> to vector<16x16x4xf32>
    %190 = arith.mulf %189, %188 : vector<16x16x4xf32>
    %191 = arith.addf %184, %190 : vector<16x16x4xf32>
    %192 = vector.extract_strided_slice %22 {offsets = [24, 0], sizes = [1, 4], strides = [1, 1]} : vector<25x4xf32> to vector<1x4xf32>
    %193 = vector.shape_cast %192 : vector<1x4xf32> to vector<4xf32>
    %194 = vector.shape_cast %193 : vector<4xf32> to vector<1x1x4xf32>
    %c4_90 = arith.constant 4 : index
    %c4_91 = arith.constant 4 : index
    %c0_92 = arith.constant 0 : index
    %195 = vector.load %arg7[%c4_90, %c4_91, %c0_92] : memref<20x20x4xf32, #tpu.memory_space<vmem>>, vector<16x16x4xf32>
    %196 = vector.broadcast %194 : vector<1x1x4xf32> to vector<16x16x4xf32>
    %197 = arith.mulf %196, %195 : vector<16x16x4xf32>
    %198 = arith.addf %191, %197 : vector<16x16x4xf32>
    %c0_93 = arith.constant 0 : index
    %c0_94 = arith.constant 0 : index
    %199 = vector.load %arg5[%c0_93, %c0_94] : memref<1x4xf32, #tpu.memory_space<vmem>>, vector<1x4xf32>
    %200 = vector.shape_cast %199 : vector<1x4xf32> to vector<1x1x4xf32>
    %201 = vector.broadcast %200 : vector<1x1x4xf32> to vector<16x16x4xf32>
    %202 = arith.addf %198, %201 : vector<16x16x4xf32>
    %cst_95 = arith.constant 0.000000e+00 : f32
    %203 = vector.broadcast %cst_95 : f32 to vector<16x16x4xf32>
    %204 = arith.subf %203, %202 : vector<16x16x4xf32>
    %205 = math.exp %204 : vector<16x16x4xf32>
    %cst_96 = arith.constant 1.000000e+00 : f32
    %206 = vector.broadcast %cst_96 : f32 to vector<16x16x4xf32>
    %207 = arith.addf %206, %205 : vector<16x16x4xf32>
    %cst_97 = arith.constant 1.000000e+00 : f32
    %208 = vector.broadcast %cst_97 : f32 to vector<16x16x4xf32>
    %209 = arith.divf %208, %207 : vector<16x16x4xf32>
    %210 = arith.mulf %202, %209 : vector<16x16x4xf32>
    %211 = vector.shape_cast %210 : vector<16x16x4xf32> to vector<256x4xf32>
    %c0_98 = arith.constant 0 : index
    %c0_99 = arith.constant 0 : index
    %c4_100 = arith.constant 4 : index
    %212 = vector.load %arg6[%c0_98, %c0_99, %c4_100] : memref<1x256x8xf32, #tpu.memory_space<vmem>>, vector<1x256x4xf32>
    %213 = vector.shape_cast %212 : vector<1x256x4xf32> to vector<256x4xf32>
    %214 = vector.shape_cast %211 : vector<256x4xf32> to vector<1x256x4xf32>
    tpu.vector_store %arg6[%c0_98, %c0_99, %c4_100], %214 {strides = array<i32>} : memref<1x256x8xf32, #tpu.memory_space<vmem>>, vector<1x256x4xf32>,
    return
  }
  func.func @transform_0(%arg0: i32) -> (i32, i32, i32) {
    %c0_i32 = arith.constant 0 : i32
    %c0_i32_0 = arith.constant 0 : i32
    %c0_i32_1 = arith.constant 0 : i32
    return %arg0, %c0_i32, %c0_i32_0 : i32, i32, i32
  }
  func.func @transform_1(%arg0: i32) -> (i32, i32) {
    %c0_i32 = arith.constant 0 : i32
    %c0_i32_0 = arith.constant 0 : i32
    %c0_i32_1 = arith.constant 0 : i32
    return %c0_i32, %c0_i32_0 : i32, i32
  }
  func.func @transform_2(%arg0: i32) -> (i32, i32) {
    %c0_i32 = arith.constant 0 : i32
    %c0_i32_0 = arith.constant 0 : i32
    %c0_i32_1 = arith.constant 0 : i32
    return %c0_i32, %c0_i32_0 : i32, i32
  }
  func.func @transform_3(%arg0: i32) -> (i32, i32) {
    %c0_i32 = arith.constant 0 : i32
    %c0_i32_0 = arith.constant 0 : i32
    %c0_i32_1 = arith.constant 0 : i32
    return %c0_i32, %c0_i32_0 : i32, i32
  }
  func.func @transform_4(%arg0: i32) -> (i32, i32) {
    %c0_i32 = arith.constant 0 : i32
    %c0_i32_0 = arith.constant 0 : i32
    %c0_i32_1 = arith.constant 0 : i32
    return %c0_i32, %c0_i32_0 : i32, i32
  }
  func.func @transform_5(%arg0: i32) -> (i32, i32, i32) {
    %c0_i32 = arith.constant 0 : i32
    %c0_i32_0 = arith.constant 0 : i32
    %c0_i32_1 = arith.constant 0 : i32
    return %arg0, %c0_i32, %c0_i32_0 : i32, i32, i32
  }
}

</mosaic_0001>

<bundles_post_ra>
// kernel: tpu_custom_call.1
= control target key start
LH: loop header
LB: loop body
LE: loop exit
PB: predicated region body
PF: predicated region fallthrough
CT: control target
= control target key end

     0   :  { %s4375_s18 = smov 0   ;;  %s7398_s0 = inlined_call_operand.vmem [shape: f32[2,256,4], index: 0, kind: input, shape index: {}]   ;;  %s7399_s1 = inlined_call_operand.vmem [shape: f32[4,4], index: 1, kind: input, shape index: {}]   ;;  %s7400_s2 = inlined_call_operand.vmem [shape: f32[1,4], index: 2, kind: input, shape index: {}]   ;;  %s7401_s3 = inlined_call_operand.vmem [shape: f32[25,4], index: 3, kind: input, shape index: {}]   ;;  %s7402_s4 = inlined_call_operand.vmem [shape: f32[1,4], index: 4, kind: input, shape index: {}]   ;;  %s7403_s5 = inlined_call_operand.vmem [shape: f32[2,256,8], index: 5, kind: output, shape index: {}]  }
   0x1 LB: > { %s3927_s19 = sadd.s32 4294967295, %s4341_s18   ;;  %p3931_p0 = scmp.ge.s32.totalorder %s4341_s18, 1  ;;  %s4341_s18 = sphi %s4375_s18, %s15_s18  }
   0x2   : > { %p187_p1 = scmp.lt.s32.totalorder %s4341_s18, 3 }
   0x4   : > { %p188_p2 = pnand %p3931_p0, %p187_p1 }
   0x6   : > { %191 = sbr.rel (%p188_p2) target bundleno = 897 (0x381), region = 40 }
   0xd   : > { %v257_v0 = vld [vmem:[%s7399_s1] sm:$0xf]  ;;  %vm362_vm0 = vcmask 1043456   ;;  %p215_p3 = scmp.lt.s32.totalorder %s3927_s19, 1  ;;  %vm265_vm1 = vcmask 31744   ;;  %vm849_vm2 = vcmask 27648   ;;  %v977_v34 = vlaneseq }
   0xe   : > { %4009 = vmatprep.subr.msk.mxu0 %vm362_vm0, %v257_v0  ;;  %4059 = vmatprep.subr.msk.mxu1 %vm362_vm0, %v257_v0  ;;  %v4343_v33 = vmov 0.0   ;;  %v941_v38 = vld [vmem:[%s7401_s3] sm:$0xff]  ;;  %s4344_s16 = smov 4   ;;  %vm3839_vm3 = vcmask 64544  }
   0xf   : > { %4010 = vmatpush3.msk.msra.mxu0 %vm362_vm0, %v257_v0  ;;  %4060 = vmatpush3.msk.msra.mxu1 %vm362_vm0, %v257_v0  ;;  %s8205_s19 = smov (!%p215_p3, %s3927_s19), 1  ;;  %855 = vst.msk [vmem:[#allocation2 + $0x38] sm:$0xff] %vm265_vm1, %v4343_v33  ;;  %847 = vst.msk [vmem:[#allocation2] sm:$0xff] %vm265_vm1, %v4343_v33  ;;  %v978_v35 = vshrl.u32 %v977_v34, 7 }
  0x10   : > { %s3974_s22 = sshll.u32 %s8205_s19, 8  ;;  %856 = vst.msk [vmem:[#allocation2 + $0x40] sm:$0xf] %vm849_vm2, %v4343_v33  ;;  %850 = vst.msk [vmem:[#allocation2 + $0x10] sm:$0xf] %vm849_vm2, %v4343_v33 }
  0x11   : > { %s4394_s25 = scalar_lea.vmem %s7398_s0, %s3974_s22  ;;  %848 = vst.msk [vmem:[#allocation2 + $0x8] sm:$0xff] %vm265_vm1, %v4343_v33  ;;  %851 = vst.msk [vmem:[#allocation2 + $0x18] sm:$0xff] %vm265_vm1, %v4343_v33  ;;  %v4520_v36 = vsub.s32 0, %v978_v35  ;;  %v4522_v37 = vsub.s32 1, %v978_v35  ;;  %v4527_v39 = vsub.s32 2, %v978_v35  ;;  %v4538_v45 = vsub.s32 3, %v978_v35  ;;  %s4801_s11 = scalar_lea.vmem %s7403_s5, %s3974_s22 }
  0x12   : > { %v225_v1 = vld [vmem:[%s4394_s25] sm:$0xff]  ;;  %v226_v3 = vld [vmem:[%s4394_s25 + $0x8] sm:$0xff]  ;;  %v227_v5 = vld [vmem:[%s4394_s25 + $0x10] sm:$0xff]  ;;  %852 = vst.msk [vmem:[#allocation2 + $0x20] sm:$0xff] %vm265_vm1, %v4343_v33  ;;  %v4547_v54 = vsub.s32 4, %v978_v35  ;;  %v4554_v0 = vsub.s32 5, %v978_v35 }
  0x13   : > { %v241_v2 = vld [vmem:[%s4394_s25 + $0x80] sm:$0xff]  ;;  %4011 = vmatprep.mubr.msk.f32.mxu0 %vm265_vm1, %v225_v1  ;;  %v242_v4 = vld [vmem:[%s4394_s25 + $0x88] sm:$0xff]  ;;  %v243_v6 = vld [vmem:[%s4394_s25 + $0x90] sm:$0xff]  ;;  %853 = vst.msk [vmem:[#allocation2 + $0x28] sm:$0xf] %vm849_vm2, %v4343_v33  ;;  %v4530_v40 = vrot.slane %v941_v38, %v4520_v36  ;;  %v4533_v41 = vrot.slane %v941_v38, %v4522_v37  ;;  %v4536_v44 = vrot.slane %v941_v38, %v4527_v39 }
  0x14   : > { %4035 = vmatprep.mubr.msk.f32.mxu1 %vm265_vm1, %v241_v2  ;;  %4012 = vmatmul.mubr.msk.f32.vlgmr.msra.gmra.mrb[0].mxu0 %vm265_vm1, %v226_v3  ;;  %v228_v7 = vld [vmem:[%s4394_s25 + $0x18] sm:$0xff]  ;;  %v229_v9 = vld [vmem:[%s4394_s25 + $0x20] sm:$0xff]  ;;  %v230_v11 = vld [vmem:[%s4394_s25 + $0x28] sm:$0xff]  ;;  %854 = vst.msk [vmem:[#allocation2 + $0x30] sm:$0xff] %vm265_vm1, %v4343_v33  ;;  %v4545_v53 = vrot.slane %v941_v38, %v4538_v45  ;;  %v4552_v63 = vrot.slane %v941_v38, %v4547_v54 }
  0x15   : > { %4036 = vmatmul.mubr.msk.f32.vlgmr.msra.gmra.mrb[0].mxu1 %vm265_vm1, %v242_v4  ;;  %4014 = vmatprep.mubr.msk.f32.mxu0 %vm265_vm1, %v227_v5  ;;  %v244_v8 = vld [vmem:[%s4394_s25 + $0x98] sm:$0xff]  ;;  %v245_v10 = vld [vmem:[%s4394_s25 + $0xa0] sm:$0xff]  ;;  %v246_v12 = vld [vmem:[%s4394_s25 + $0xa8] sm:$0xff]  ;;  %857 = vst.msk [vmem:[#allocation2 + $0x48] sm:$0xff] %vm265_vm1, %v4343_v33 }
  0x16   : > { %4038 = vmatprep.mubr.msk.f32.mxu1 %vm265_vm1, %v243_v6  ;;  %v231_v13 = vld [vmem:[%s4394_s25 + $0x30] sm:$0xff]  ;;  %v232_v15 = vld [vmem:[%s4394_s25 + $0x38] sm:$0xff]  ;;  %v233_v17 = vld [vmem:[%s4394_s25 + $0x40] sm:$0xff]  ;;  %858 = vst.msk [vmem:[#allocation2 + $0x50] sm:$0xff] %vm265_vm1, %v4343_v33 }
  0x17   : > { %v247_v14 = vld [vmem:[%s4394_s25 + $0xb0] sm:$0xff]  ;;  %v248_v16 = vld [vmem:[%s4394_s25 + $0xb8] sm:$0xff]  ;;  %v249_v18 = vld [vmem:[%s4394_s25 + $0xc0] sm:$0xff]  ;;  %859 = vst.msk [vmem:[#allocation2 + $0x58] sm:$0xf] %vm849_vm2, %v4343_v33 }
  0x18   : > { %4015 = vmatmul.mubr.msk.f32.gmra.mrb[2].mxu0 %vm265_vm1, %v228_v7  ;;  %v234_v19 = vld [vmem:[%s4394_s25 + $0x48] sm:$0xff]  ;;  %v235_v21 = vld [vmem:[%s4394_s25 + $0x50] sm:$0xff]  ;;  %v236_v23 = vld [vmem:[%s4394_s25 + $0x58] sm:$0xff]  ;;  %860 = vst.msk [vmem:[#allocation2 + $0x60] sm:$0xff] %vm265_vm1, %v4343_v33 }
  0x19   : > { %4039 = vmatmul.mubr.msk.f32.gmra.mrb[2].mxu1 %vm265_vm1, %v244_v8  ;;  %4017 = vmatprep.mubr.msk.f32.mxu0 %vm265_vm1, %v229_v9  ;;  %v250_v20 = vld [vmem:[%s4394_s25 + $0xc8] sm:$0xff]  ;;  %v251_v22 = vld [vmem:[%s4394_s25 + $0xd0] sm:$0xff]  ;;  %v252_v24 = vld [vmem:[%s4394_s25 + $0xd8] sm:$0xff]  ;;  %861 = vst.msk [vmem:[#allocation2 + $0x68] sm:$0xff] %vm265_vm1, %v4343_v33 }
  0x1a   : > { %4041 = vmatprep.mubr.msk.f32.mxu1 %vm265_vm1, %v245_v10  ;;  %v237_v25 = vld [vmem:[%s4394_s25 + $0x60] sm:$0xff]  ;;  %v238_v27 = vld [vmem:[%s4394_s25 + $0x68] sm:$0xff]  ;;  %v239_v29 = vld [vmem:[%s4394_s25 + $0x70] sm:$0xff]  ;;  %862 = vst.msk [vmem:[#allocation2 + $0x70] sm:$0xf] %vm849_vm2, %v4343_v33  ;;  %v4561_v10 = vrot.slane %v941_v38, %v4554_v0 }
  0x1b   : > { %v253_v26 = vld [vmem:[%s4394_s25 + $0xe0] sm:$0xff]  ;;  %v254_v28 = vld [vmem:[%s4394_s25 + $0xe8] sm:$0xff]  ;;  %v255_v30 = vld [vmem:[%s4394_s25 + $0xf0] sm:$0xff]  ;;  %863 = vst.msk [vmem:[#allocation2 + $0x78] sm:$0xff] %vm265_vm1, %v4343_v33 }
  0x1c   : > { %4018 = vmatmul.mubr.msk.f32.gmra.mrb[4].mxu0 %vm265_vm1, %v230_v11  ;;  %v240_v31 = vld [vmem:[%s4394_s25 + $0x78] sm:$0xff]  ;;  %864 = vst.msk [vmem:[#allocation2 + $0x80] sm:$0xff] %vm265_vm1, %v4343_v33  ;;  %866 = vst.msk [vmem:[#allocation2 + $0x90] sm:$0xff] %vm265_vm1, %v4343_v33  ;;  %v945_v42 = vld [vmem:[#allocation2] sm:$0xff]  ;;  %v4563_v11 = vsub.s32 6, %v978_v35 }
  0x1d   : > { %4042 = vmatmul.mubr.msk.f32.gmra.mrb[4].mxu1 %vm265_vm1, %v246_v12  ;;  %4020 = vmatprep.mubr.msk.f32.mxu0 %vm265_vm1, %v231_v13  ;;  %v256_v32 = vld [vmem:[%s4394_s25 + $0xf8] sm:$0xff]  ;;  %865 = vst.msk [vmem:[#allocation2 + $0x88] sm:$0xf] %vm849_vm2, %v4343_v33  ;;  %868 = vst.msk [vmem:[#allocation2 + $0xa0] sm:$0xf] %vm849_vm2, %v4343_v33  ;;  %v1045_v43 = vld [vmem:[#allocation2 + $0x1] sm:$0xff]  ;;  %v981_v46 = vmul.f32 %v4530_v40, %v945_v42 }
  0x1e   : > { %4044 = vmatprep.mubr.msk.f32.mxu1 %vm265_vm1, %v247_v14  ;;  %867 = vst.msk [vmem:[#allocation2 + $0x98] sm:$0xff] %vm265_vm1, %v4343_v33  ;;  %869 = vst.msk [vmem:[#allocation2 + $0xa8] sm:$0xff] %vm265_vm1, %v4343_v33  ;;  %v1081_v47 = vmul.f32 %v4533_v41, %v1045_v43  ;;  %v946_v48 = vld [vmem:[#allocation2 + $0x8] sm:$0xff]  ;;  %v948_v59 = vld [vmem:[#allocation2 + $0x20] sm:$0xff] }
  0x1f   : > { %870 = vst.msk [vmem:[#allocation2 + $0xb0] sm:$0xff] %vm265_vm1, %v4343_v33  ;;  %872 = vst.msk [vmem:[#allocation2 + $0xc0] sm:$0xff] %vm265_vm1, %v4343_v33  ;;  %v1046_v49 = vld [vmem:[#allocation2 + $0x9] sm:$0xff]  ;;  %v982_v51 = vmul.f32 %v4530_v40, %v946_v48  ;;  %v1048_v60 = vld [vmem:[#allocation2 + $0x21] sm:$0xff]  ;;  %v984_v4 = vmul.f32 %v4530_v40, %v948_v59 }
  0x20   : > { %4021 = vmatmul.mubr.msk.f32.gmra.mrb[6].mxu0 %vm265_vm1, %v232_v15  ;;  %871 = vst.msk [vmem:[#allocation2 + $0xb8] sm:$0xf] %vm849_vm2, %v4343_v33  ;;  %874 = vst.msk [vmem:[#allocation2 + $0xd0] sm:$0xf] %vm849_vm2, %v4343_v33  ;;  %v1145_v50 = vld [vmem:[#allocation2 + $0x2] sm:$0xff]  ;;  %v1082_v52 = vmul.f32 %v4533_v41, %v1046_v49  ;;  %v1113_v55 = vadd.f32 %v1081_v47, %v981_v46  ;;  %v1146_v57 = vld [vmem:[#allocation2 + $0xa] sm:$0xff]  ;;  %v1084_v5 = vmul.f32 %v4533_v41, %v1048_v60 }
  0x21   : > { %4045 = vmatmul.mubr.msk.f32.gmra.mrb[6].mxu1 %vm265_vm1, %v248_v16  ;;  %4023 = vmatprep.mubr.msk.f32.mxu0 %vm265_vm1, %v233_v17  ;;  %873 = vst.msk [vmem:[#allocation2 + $0xc8] sm:$0xff] %vm265_vm1, %v4343_v33  ;;  %875 = vst.msk [vmem:[#allocation2 + $0xd8] sm:$0xff] %vm265_vm1, %v4343_v33  ;;  %v1181_v56 = vmul.f32 %v4536_v44, %v1145_v50  ;;  %v1245_v58 = vld [vmem:[#allocation2 + $0x3] sm:$0xff]  ;;  %v1182_v62 = vmul.f32 %v4536_v44, %v1146_v57  ;;  %v1246_v3 = vld [vmem:[#allocation2 + $0xb] sm:$0xff] }
  0x22   : > { %4047 = vmatprep.mubr.msk.f32.mxu1 %vm265_vm1, %v249_v18  ;;  %876 = vst.msk [vmem:[#allocation2 + $0xe0] sm:$0xff] %vm265_vm1, %v4343_v33  ;;  %878 = vst.msk [vmem:[#allocation2 + $0xf0] sm:$0xff] %vm265_vm1, %v4343_v33  ;;  %v1114_v61 = vadd.f32 %v1082_v52, %v982_v51  ;;  %v1281_v2 = vmul.f32 %v4545_v53, %v1245_v58  ;;  %v1345_v6 = vld [vmem:[#allocation2 + $0x4] sm:$0xff]  ;;  %v1282_v9 = vmul.f32 %v4545_v53, %v1246_v3  ;;  %v1346_v14 = vld [vmem:[#allocation2 + $0xc] sm:$0xff] }
  0x23   : > { %877 = vst.msk [vmem:[#allocation2 + $0xe8] sm:$0xf] %vm849_vm2, %v4343_v33  ;;  %880 = vst.msk [vmem:[#allocation2 + $0x100] sm:$0xf] %vm849_vm2, %v4343_v33  ;;  %v1213_v1 = vadd.f32 %v1181_v56, %v1113_v55  ;;  %v1148_v7 = vld [vmem:[#allocation2 + $0x22] sm:$0xff]  ;;  %v1381_v13 = vmul.f32 %v4552_v63, %v1345_v6  ;;  %v1116_v15 = vadd.f32 %v1084_v5, %v984_v4  ;;  %v1446_v17 = vld [vmem:[#allocation2 + $0x18] sm:$0xff] }
  0x24   : > { %4024 = vmatmul.mubr.msk.f32.gmra.mrb[8].mxu0 %vm265_vm1, %v234_v19  ;;  %879 = vst.msk [vmem:[#allocation2 + $0xf8] sm:$0xff] %vm265_vm1, %v4343_v33  ;;  %881 = vst.msk [vmem:[#allocation2 + $0x108] sm:$0xff] %vm265_vm1, %v4343_v33  ;;  %v1214_v8 = vadd.f32 %v1182_v62, %v1114_v61  ;;  %v1184_v16 = vmul.f32 %v4536_v44, %v1148_v7  ;;  %v1248_v18 = vld [vmem:[#allocation2 + $0x23] sm:$0xff]  ;;  %v1646_v46 = vld [vmem:[#allocation2 + $0x1a] sm:$0xff]  ;;  %v983_v51 = vmul.f32 %v1446_v17, %v4530_v40 }
  0x25   : > { %4048 = vmatmul.mubr.msk.f32.gmra.mrb[8].mxu1 %vm265_vm1, %v250_v20  ;;  %4026 = vmatprep.mubr.msk.f32.mxu0 %vm265_vm1, %v235_v21  ;;  %882 = vst.msk [vmem:[#allocation2 + $0x110] sm:$0xff] %vm265_vm1, %v4343_v33  ;;  %884 = vst.msk [vmem:[#allocation2 + $0x120] sm:$0xff] %vm265_vm1, %v4343_v33  ;;  %v1313_v12 = vadd.f32 %v1281_v2, %v1213_v1  ;;  %v1382_v20 = vmul.f32 %v4552_v63, %v1346_v14  ;;  %v4568_v21 = vsub.s32 7, %v978_v35  ;;  %v1547_v35 = vld [vmem:[#allocation2 + $0x21] sm:$0xff]  ;;  %v4587_v47 = vld [vmem:[%s7400_s2] ss:$0 sm:$0xff] }
  0x26   : > { %4050 = vmatprep.mubr.msk.f32.mxu1 %vm265_vm1, %v251_v22  ;;  %883 = vst.msk [vmem:[#allocation2 + $0x118] sm:$0xf] %vm849_vm2, %v4343_v33  ;;  %886 = vst.msk [vmem:[#allocation2 + $0x130] sm:$0xf] %vm849_vm2, %v4343_v33  ;;  %v1314_v19 = vadd.f32 %v1282_v9, %v1214_v8  ;;  %v4571_v22 = vrot.slane %v941_v38, %v4563_v11  ;;  %v4592_v48 = vld [vmem:[%s7401_s3 + $0x8] sm:$0xff] }
  0x27   : > { %885 = vst.msk [vmem:[#allocation2 + $0x128] sm:$0xff] %vm265_vm1, %v4343_v33  ;;  %887 = vst.msk [vmem:[#allocation2 + $0x138] sm:$0xff] %vm265_vm1, %v4343_v33  ;;  %v1647_v50 = vld [vmem:[#allocation2 + $0x22] sm:$0xff]  ;;  %v4614_v4 = vrot.slane %v4592_v48, %v4520_v36 }
  0x28   : > { %4027 = vmatmul.mubr.msk.f32.gmra.mrb[10].mxu0 %vm265_vm1, %v236_v23  ;;  %888 = vst.msk [vmem:[#allocation2 + $0x140] sm:$0xff] %vm265_vm1, %v4343_v33  ;;  %890 = vst.msk [vmem:[#allocation2 + $0x150] sm:$0xff] %vm265_vm1, %v4343_v33  ;;  %v1413_v23 = vadd.f32 %v1381_v13, %v1313_v12  ;;  %v1583_v49 = vmul.f32 %v4571_v22, %v1547_v35 }
  0x29   : > { %4051 = vmatmul.mubr.msk.f32.gmra.mrb[10].mxu1 %vm265_vm1, %v252_v24  ;;  %4029 = vmatprep.mubr.msk.f32.mxu0 %vm265_vm1, %v237_v25  ;;  %889 = vst.msk [vmem:[#allocation2 + $0x148] sm:$0xf] %vm849_vm2, %v4343_v33  ;;  %892 = vst.msk [vmem:[#allocation2 + $0x160] sm:$0xf] %vm849_vm2, %v4343_v33  ;;  %v1482_v24 = vmul.f32 %v4561_v10, %v1446_v17  ;;  %v1447_v25 = vld [vmem:[#allocation2 + $0x20] sm:$0xff] }
  0x2a   : > { %4053 = vmatprep.mubr.msk.f32.mxu1 %vm265_vm1, %v253_v26  ;;  %891 = vst.msk [vmem:[#allocation2 + $0x158] sm:$0xff] %vm265_vm1, %v4343_v33  ;;  %893 = vst.msk [vmem:[#allocation2 + $0x168] sm:$0xff] %vm265_vm1, %v4343_v33  ;;  %v1216_v26 = vadd.f32 %v1184_v16, %v1116_v15  ;;  %v4629_v17 = vld [vmem:[#allocation2 + $0x1b] sm:$0xff] }
  0x2b   : > { %894 = vst.msk [vmem:[#allocation2 + $0x170] sm:$0xff] %vm265_vm1, %v4343_v33  ;;  %896 = vst.msk [vmem:[#allocation2 + $0x180] sm:$0xff] %vm265_vm1, %v4343_v33  ;;  %v1782_v35 = vmul.f32 %v4614_v4, %v4629_v17 }
  0x2c   : > { %4030 = vmatmul.mubr.msk.f32.gmra.mrb[12].mxu0 %vm265_vm1, %v238_v27  ;;  %895 = vst.msk [vmem:[#allocation2 + $0x178] sm:$0xf] %vm849_vm2, %v4343_v33  ;;  %898 = vst.msk [vmem:[#allocation2 + $0x190] sm:$0xf] %vm849_vm2, %v4343_v33  ;;  %v1284_v27 = vmul.f32 %v4545_v53, %v1248_v18  ;;  %v4632_v18 = vmul.f32 %v1646_v46, %v4536_v44 }
  0x2d   : > { %4054 = vmatmul.mubr.msk.f32.gmra.mrb[12].mxu1 %vm265_vm1, %v254_v28  ;;  %4032 = vmatprep.mubr.msk.f32.mxu0 %vm265_vm1, %v239_v29  ;;  %897 = vst.msk [vmem:[#allocation2 + $0x188] sm:$0xff] %vm265_vm1, %v4343_v33  ;;  %899 = vst.msk [vmem:[#allocation2 + $0x198] sm:$0xff] %vm265_vm1, %v4343_v33  ;;  %v1546_v28 = vld [vmem:[#allocation2 + $0x19] sm:$0xff]  ;;  %v4575_v29 = vld [vmem:[#allocation2 + $0x24] sm:$0xff] }
  0x2e   : > { %4056 = vmatprep.mubr.msk.f32.mxu1 %vm265_vm1, %v255_v30  ;;  %900 = vst.msk [vmem:[#allocation2 + $0x1a0] sm:$0xff] %vm265_vm1, %v4343_v33  ;;  %902 = vst.msk [vmem:[#allocation2 + $0x1b0] sm:$0xff] %vm265_vm1, %v4343_v33  ;;  %v1414_v30 = vadd.f32 %v1382_v20, %v1314_v19  ;;  %v1582_v34 = vmul.f32 %v4571_v22, %v1546_v28  ;;  %v1316_v42 = vadd.f32 %v1284_v27, %v1216_v26 }
  0x2f   : > { %901 = vst.msk [vmem:[#allocation2 + $0x1a8] sm:$0xf] %vm849_vm2, %v4343_v33  ;;  %904 = vst.msk [vmem:[#allocation2 + $0x1c0] sm:$0xf] %vm849_vm2, %v4343_v33  ;;  %v1384_v43 = vmul.f32 %v4552_v63, %v4575_v29  ;;  %v1083_v52 = vmul.f32 %v1546_v28, %v4533_v41 }
  0x30   : > { %4033 = vmatmul.mubr.msk.f32.gmra.mrb[14].mxu0 %vm265_vm1, %v240_v31  ;;  %903 = vst.msk [vmem:[#allocation2 + $0x1b8] sm:$0xff] %vm265_vm1, %v4343_v33  ;;  %905 = vst.msk [vmem:[#allocation2 + $0x1c8] sm:$0xff] %vm265_vm1, %v4343_v33  ;;  %v1483_v31 = vmul.f32 %v4561_v10, %v1447_v25 }
  0x31   : > { %4057 = vmatmul.mubr.msk.f32.gmra.mrb[14].mxu1 %vm265_vm1, %v256_v32  ;;  %906 = vst.msk [vmem:[#allocation2 + $0x1d0] sm:$0xff] %vm265_vm1, %v4343_v33  ;;  %7679 = vst [vmem:[#allocation3_spill] sm:$0xff] %v4530_v40  ;;  %v4579_v32 = vrot.slane %v941_v38, %v4568_v21  ;;  %v4604_v62 = vadd.f32 %v1384_v43, %v1316_v42  ;;  %v4623_v9 = vadd.f32 %v1083_v52, %v983_v51 }
  0x32   : > { %907 = vst.msk [vmem:[#allocation2 + $0x1d8] sm:$0xf] %vm849_vm2, %v4343_v33  ;;  %7680 = vst [vmem:[#allocation4_spill] sm:$0xff] %v4533_v41  ;;  %v1514_v33 = vadd.f32 %v1482_v24, %v1413_v23  ;;  %v1515_v38 = vadd.f32 %v1483_v31, %v1414_v30 }
  0x33   : > { %7681 = vst [vmem:[#allocation5_spill] sm:$0xff] %v4536_v44  ;;  %7682 = vst [vmem:[#allocation6_spill] sm:$0xff] %v4545_v53  ;;  %v1682_v58 = vmul.f32 %v4579_v32, %v1646_v46  ;;  %v4617_v5 = vmul.f32 %v4579_v32, %v1647_v50  ;;  %v1747_v50 = vld [vmem:[#allocation2 + $0x23] sm:$0xff] }
  0x34   : > { %7683 = vst [vmem:[#allocation7_spill] sm:$0xff] %v4552_v63  ;;  %7684 = vst [vmem:[#allocation8_spill] sm:$0xff] %v4561_v10  ;;  %v1614_v57 = vadd.f32 %v1582_v34, %v1514_v33  ;;  %v4621_v8 = vadd.f32 %v1583_v49, %v1515_v38  ;;  %v4654_v49 = vrot.slane %v4592_v48, %v4522_v37 }
  0x35   : > { %7685 = vst [vmem:[#allocation9_spill] sm:$0xff] %v4571_v22  ;;  %7686 = vst [vmem:[#allocation10_spill] sm:$0xff] %v4579_v32 }
  0x36   : > { %7687 = vst [vmem:[#allocation11_spill] sm:$0xff] %v4604_v62  ;;  %7688 = vst [vmem:[#allocation12_spill] sm:$0xff] %v4614_v4  ;;  %v4627_v16 = vadd.f32 %v1682_v58, %v1614_v57  ;;  %v1715_v62 = vadd.f32 %v4617_v5, %v4621_v8 }
  0x37   : > { %7689 = vst [vmem:[#allocation13_spill] sm:$0xff] %v4654_v49 }
  0xe7   : > { %v4013_v55 = vpop.f32.mrb[0].mxu0 }
  0xe8   : > { %v4037_v56 = vpop.f32.mrb[0].mxu1  ;;  %v4599_v59 = vadd.f32 %v4013_v55, %v4587_v47  ;;  %v432_v61 = vpop.f32.mrb[1].mxu0 }
  0xe9   : > { %v4602_v60 = vadd.f32 %v4037_v56, %v4587_v47  ;;  %v512_v1 = vpop.f32.mrb[1].mxu1  ;;  %v4607_v2 = vadd.f32 %v4587_v47, %v432_v61 }
  0xea   : > { %v4610_v3 = vadd.f32 %v4587_v47, %v512_v1  ;;  %v592_v6 = vsub.f32 0.0, %v4599_v59 }
  0xeb   : > { %v608_v7 = vsub.f32 0.0, %v4602_v60  ;;  %v591_v12 = vsub.f32 0.0, %v4607_v2  ;;  %v4016_v14 = vpop.f32.mrb[2].mxu0 }
  0xec   : > { %v607_v13 = vsub.f32 0.0, %v4610_v3  ;;  %v4040_v15 = vpop.f32.mrb[2].mxu1  ;;  %v625_v19 = vmul.f32 1.442695, %v592_v6  ;;  %v4635_v23 = vadd.f32 %v4016_v14, %v4587_v47  ;;  %v442_v25 = vpop.f32.mrb[3].mxu0 }
  0xed   : > { %v657_v20 = vmul.f32 1.442695, %v608_v7  ;;  %v4638_v24 = vadd.f32 %v4040_v15, %v4587_v47  ;;  %v522_v26 = vpop.f32.mrb[3].mxu1  ;;  %v623_v27 = vmul.f32 1.442695, %v591_v12  ;;  %v4641_v30 = vadd.f32 %v4587_v47, %v442_v25 }
  0xee   : > { %v655_v28 = vmul.f32 1.442695, %v607_v13  ;;  %v4644_v31 = vadd.f32 %v4587_v47, %v522_v26  ;;  %4071 = vpow2.f32 %v625_v19  ;;  %v594_v33 = vsub.f32 0.0, %v4635_v23  ;;  %v4675_v19 = vld [vmem:[%s7401_s3 + $0x10] sm:$0xff] }
  0xef   : > { %v610_v34 = vsub.f32 0.0, %v4638_v24  ;;  %4073 = vpow2.f32 %v657_v20  ;;  %v593_v42 = vsub.f32 0.0, %v4641_v30  ;;  %v4019_v46 = vpop.f32.mrb[4].mxu0  ;;  %v1846_v20 = vld [vmem:[#allocation2 + $0x1c] sm:$0xff]  ;;  %v4679_v25 = vrot.slane %v4592_v48, %v4547_v54 }
  0xf0   : > { %v609_v43 = vsub.f32 0.0, %v4644_v31  ;;  %v4043_v38 = vpop.f32.mrb[4].mxu1  ;;  %4075 = vpow2.f32 %v623_v27  ;;  %v629_v51 = vmul.f32 1.442695, %v594_v33  ;;  %v4657_v55 = vadd.f32 %v4019_v46, %v4587_v47  ;;  %v452_v56 = vpop.f32.mrb[5].mxu0 }
  0xf1   : > { %v661_v52 = vmul.f32 1.442695, %v610_v34  ;;  %v532_v57 = vpop.f32.mrb[5].mxu1  ;;  %4077 = vpow2.f32 %v655_v28  ;;  %v627_v58 = vmul.f32 1.442695, %v593_v42  ;;  %v4660_v1 = vadd.f32 %v4043_v38, %v4587_v47 }
  0xf2   : > { %v659_v61 = vmul.f32 1.442695, %v609_v43  ;;  %4079 = vpow2.f32 %v629_v51  ;;  %v596_v6 = vsub.f32 0.0, %v4657_v55  ;;  %v4664_v7 = vadd.f32 %v4587_v47, %v452_v56 }
  0xf3   : > { %v4667_v12 = vadd.f32 %v4587_v47, %v532_v57  ;;  %4081 = vpow2.f32 %v661_v52  ;;  %v612_v13 = vsub.f32 0.0, %v4660_v1  ;;  %v4022_v14 = vpop.f32.mrb[6].mxu0  ;;  %v1783_v26 = vmul.f32 %v4614_v4, %v1747_v50 }
  0xf4   : > { %v4670_v15 = vpop.f32.mrb[6].mxu1  ;;  %4083 = vpow2.f32 %v627_v58  ;;  %v633_v27 = vmul.f32 1.442695, %v596_v6  ;;  %v595_v28 = vsub.f32 0.0, %v4664_v7  ;;  %v462_v34 = vpop.f32.mrb[7].mxu0  ;;  %v4686_v46 = vrot.slane %v4592_v48, %v4554_v0 }
  0xf5   : > { %v611_v33 = vsub.f32 0.0, %v4667_v12  ;;  %v542_v42 = vpop.f32.mrb[7].mxu1  ;;  %4085 = vpow2.f32 %v659_v61  ;;  %v665_v43 = vmul.f32 1.442695, %v612_v13  ;;  %v4690_v38 = vrot.slane %v4592_v48, %v4563_v11 }
  0xf6   : > { %7690 = vst [vmem:[#allocation14_spill] sm:$0xff] %v4686_v46  ;;  %4087 = vpow2.f32 %v633_v27  ;;  %v631_v50 = vmul.f32 1.442695, %v595_v28  ;;  %v4694_v52 = vrot.slane %v4675_v19, %v4522_v37  ;;  %v1814_v58 = vadd.f32 %v1782_v35, %v4627_v16 }
  0xf7   : > { %7691 = vst [vmem:[#allocation15_spill] sm:$0xff] %v4690_v38  ;;  %v663_v51 = vmul.f32 1.442695, %v611_v33  ;;  %4089 = vpow2.f32 %v665_v43  ;;  %v4025_v56 = vpop.f32.mrb[8].mxu0  ;;  %v1882_v61 = vmul.f32 %v4654_v49, %v1846_v20  ;;  %v4700_v6 = vrot.slane %v4592_v48, %v4527_v39 }
  0xf8   : > { %7692 = vst [vmem:[#allocation16_spill] sm:$0xff] %v4694_v52  ;;  %v4049_v57 = vpop.f32.mrb[8].mxu1  ;;  %v4072_v13 = vpop.eup %4071  ;;  %4091 = vpow2.f32 %v631_v50  ;;  %v4704_v33 = vrot.slane %v4592_v48, %v4538_v45  ;;  %v4708_v37 = vrot.slane %v4592_v48, %v4568_v21  ;;  %v4712_v16 = vrot.slane %v4675_v19, %v4520_v36 }
  0xf9   : > { %v472_v27 = vpop.f32.mrb[9].mxu0  ;;  %v552_v28 = vpop.f32.mrb[9].mxu1  ;;  %v688_v43 = vadd.f32 1.0, %v4072_v13  ;;  %4093 = vpow2.f32 %v663_v51  ;;  %v4716_v50 = vrot.slane %v4675_v19, %v4527_v39  ;;  %v4722_v48 = vrot.slane %v4675_v19, %v4538_v45 }
  0xfa   : > { %7693 = vst [vmem:[#allocation17_spill] sm:$0xff] %v4708_v37  ;;  %7694 = vst [vmem:[#allocation18_spill] sm:$0xff] %v4712_v16  ;;  %v4074_v35 = vpop.eup %4073  ;;  %v1215_v36 = vadd.f32 %v4632_v18, %v4623_v9  ;;  %v1283_v13 = vmul.f32 %v4629_v17, %v4545_v53  ;;  %v4732_v5 = vadd.f32 %v1882_v61, %v1814_v58 }
  0xfb   : > { %7695 = vst [vmem:[#allocation19_spill] sm:$0xff] %v4716_v50  ;;  %v4076_v4 = vpop.eup %4075  ;;  %v704_v22 = vadd.f32 1.0, %v4074_v35  ;;  %7696 = vst [vmem:[#allocation20_spill] sm:$0xff] %v4722_v48  ;;  %4095 = vrcp.f32 %v688_v43  ;;  %v4728_v39 = vpop.f32.mrb[10].mxu0  ;;  %v4736_v8 = vrot.slane %v4675_v19, %v4547_v54  ;;  %v4742_v17 = vmul.f32 %v4654_v49, %v4575_v29 }
  0xfc   : > { %v4078_v51 = vpop.eup %4077  ;;  %v687_v52 = vadd.f32 1.0, %v4076_v4  ;;  %v4730_v50 = vpop.f32.mrb[10].mxu1  ;;  %v4745_v4 = vmul.f32 %v1846_v20, %v4552_v63  ;;  %v4748_v61 = vadd.f32 %v4022_v14, %v4587_v47  ;;  %v4752_v43 = vadd.f32 %v1783_v26, %v1715_v62 }
  0xfd   : > { %7697 = vst [vmem:[#allocation21_spill] sm:$0xff] %v4736_v8  ;;  %v4080_v45 = vpop.eup %4079  ;;  %4097 = vrcp.f32 %v704_v22  ;;  %v703_v35 = vadd.f32 1.0, %v4078_v51  ;;  %v4738_v9 = vpop.f32.mrb[11].mxu0  ;;  %v4756_v29 = vadd.f32 %v4670_v15, %v4587_v47  ;;  %v4758_v49 = vadd.f32 %v1283_v13, %v1215_v36 }
  0xfe   : > { %v4082_v18 = vpop.eup %4081  ;;  %4099 = vrcp.f32 %v687_v52  ;;  %v690_v58 = vadd.f32 1.0, %v4080_v45  ;;  %7698 = vst [vmem:[#allocation22_spill] sm:$0xff] %v4748_v61  ;;  %v4750_v54 = vpop.f32.mrb[11].mxu1  ;;  %v4761_v45 = vadd.f32 %v4587_v47, %v462_v34  ;;  %v4764_v14 = vadd.f32 %v4587_v47, %v542_v42 }
  0xff   : > { %v4084_v22 = vpop.eup %4083  ;;  %4101 = vrcp.f32 %v703_v35  ;;  %v706_v51 = vadd.f32 1.0, %v4082_v18  ;;  %7699 = vst [vmem:[#allocation23_spill] sm:$0xff] %v4756_v29  ;;  %v4766_v62 = vpop.f32.mrb[12].mxu0  ;;  %v4771_v15 = vadd.f32 %v4025_v56, %v4587_v47  ;;  %v4774_v36 = vadd.f32 %v4049_v57, %v4587_v47 }
 0x100   : > { %v4086_v20 = vpop.eup %4085  ;;  %4103 = vrcp.f32 %v690_v58  ;;  %v689_v52 = vadd.f32 1.0, %v4084_v22  ;;  %7700 = vst [vmem:[#allocation24_spill] sm:$0xff] %v4761_v45  ;;  %7701 = vst [vmem:[#allocation25_spill] sm:$0xff] %v4764_v14  ;;  %v4768_v26 = vpop.f32.mrb[12].mxu1  ;;  %v598_v22 = vsub.f32 0.0, %v4748_v61  ;;  %v4782_v8 = vadd.f32 %v4587_v47, %v472_v27 }
 0x101   : > { %v4088_v35 = vpop.eup %4087  ;;  %4105 = vrcp.f32 %v706_v51  ;;  %v705_v18 = vadd.f32 1.0, %v4086_v20  ;;  %7702 = vst [vmem:[#allocation26_spill] sm:$0xff] %v4771_v15  ;;  %7703 = vst [vmem:[#allocation27_spill] sm:$0xff] %v4774_v36  ;;  %v4776_v13 = vpop.f32.mrb[13].mxu0  ;;  %v614_v56 = vsub.f32 0.0, %v4756_v29  ;;  %v4786_v57 = vadd.f32 %v4587_v47, %v552_v28 }
 0x102   : > { %v4778_v34 = vpop.f32.mrb[13].mxu1  ;;  %v4090_v58 = vpop.eup %4089  ;;  %4107 = vrcp.f32 %v689_v52  ;;  %v692_v42 = vadd.f32 1.0, %v4088_v35  ;;  %7704 = vst [vmem:[#allocation28_spill] sm:$0xff] %v4782_v8  ;;  %v597_v52 = vsub.f32 0.0, %v4761_v45  ;;  %v613_v35 = vsub.f32 0.0, %v4764_v14 }
 0x103   : > { %v4092_v51 = vpop.eup %4091  ;;  %4109 = vrcp.f32 %v705_v18  ;;  %v708_v20 = vadd.f32 1.0, %v4090_v58  ;;  %7705 = vst [vmem:[#allocation29_spill] sm:$0xff] %v4786_v57  ;;  %v4790_v61 = vpop.f32.mrb[14].mxu0  ;;  %v600_v18 = vsub.f32 0.0, %v4771_v15  ;;  %v616_v58 = vsub.f32 0.0, %v4774_v36 }
 0x104   : > { %v4094_v48 = vpop.eup %4093  ;;  %4111 = vrcp.f32 %v692_v42  ;;  %v691_v16 = vadd.f32 1.0, %v4092_v51  ;;  %v4058_v27 = vpop.f32.mrb[14].mxu1  ;;  %v637_v42 = vmul.f32 1.442695, %v598_v22  ;;  %v599_v51 = vsub.f32 0.0, %v4782_v8 }
 0x105   : > { %4113 = vrcp.f32 %v708_v20  ;;  %v707_v37 = vadd.f32 1.0, %v4094_v48  ;;  %v502_v29 = vpop.f32.mrb[15].mxu0  ;;  %v4794_v38 = vpop.f32.mrb[15].mxu1  ;;  %v4806_v48 = vadd.f32 %v4728_v39, %v4587_v47  ;;  %v615_v15 = vsub.f32 0.0, %v4786_v57 }
 0x106   : > { %v4096_v28 = vpop.eup %4095  ;;  %4115 = vrcp.f32 %v691_v16  ;;  %v4812_v14 = vadd.f32 %v4730_v50, %v4587_v47  ;;  %v669_v22 = vmul.f32 1.442695, %v614_v56  ;;  %v635_v8 = vmul.f32 1.442695, %v597_v52 }
 0x107   : > { %v4098_v20 = vpop.eup %4097  ;;  %v784_v36 = vmul.f32 %v4096_v28, %v4599_v59  ;;  %4117 = vrcp.f32 %v707_v37  ;;  %v667_v46 = vmul.f32 1.442695, %v613_v35  ;;  %v641_v37 = vmul.f32 1.442695, %v600_v18 }
 0x108   : > { %v4100_v45 = vpop.eup %4099  ;;  %v800_v16 = vmul.f32 %v4098_v20, %v4602_v60  ;;  %v673_v28 = vmul.f32 1.442695, %v616_v58  ;;  %v4821_v50 = vadd.f32 %v4587_v47, %v4738_v9  ;;  %v639_v56 = vmul.f32 1.442695, %v599_v51 }
 0x109   : > { %v4102_v39 = vpop.eup %4101  ;;  %816 = vst.msk [vmem:[%s4801_s11 + $0x8] sm:$0xff] %vm265_vm1, %v784_v36  ;;  %910 = vst.msk [vmem:[#allocation2 + $0x3a] sm:$0xff] %vm265_vm1, %v784_v36  ;;  %v783_v59 = vmul.f32 %v4100_v45, %v4607_v2  ;;  %v602_v52 = vsub.f32 0.0, %v4806_v48  ;;  %v4830_v2 = vadd.f32 %v4587_v47, %v4750_v54  ;;  %v671_v36 = vmul.f32 1.442695, %v615_v15 }
 0x10a   : > { %7706 = vst [vmem:[#allocation30_spill] sm:$0xff] %v4821_v50  ;;  %v4104_v57 = vpop.eup %4103  ;;  %832 = vst.msk [vmem:[%s4801_s11 + $0x88] sm:$0xff] %vm265_vm1, %v800_v16  ;;  %v799_v60 = vmul.f32 %v4102_v39, %v4610_v3  ;;  %v618_v35 = vsub.f32 0.0, %v4812_v14  ;;  %v4839_v3 = vadd.f32 %v4766_v62, %v4587_v47  ;;  %v4847_v58 = vadd.f32 %v4587_v47, %v4776_v13 }
 0x10b   : > { %926 = vst.msk [vmem:[#allocation2 + $0xfa] sm:$0xff] %vm265_vm1, %v800_v16  ;;  %7707 = vst [vmem:[#allocation31_spill] sm:$0xff] %v4830_v2  ;;  %v4106_v45 = vpop.eup %4105  ;;  %v786_v9 = vmul.f32 %v4104_v57, %v4635_v23  ;;  %v4850_v23 = vadd.f32 %v4587_v47, %v502_v29  ;;  %v4853_v15 = vadd.f32 %v4058_v27, %v4587_v47  ;;  %4119 = vpow2.f32 %v637_v42 }
 0x10c   : > { %815 = vst.msk [vmem:[%s4801_s11] sm:$0xff] %vm265_vm1, %v783_v59  ;;  %909 = vst.msk [vmem:[#allocation2 + $0x32] sm:$0xff] %vm265_vm1, %v783_v59  ;;  %v4108_v18 = vpop.eup %4107  ;;  %v802_v54 = vmul.f32 %v4106_v45, %v4638_v24  ;;  %v601_v24 = vsub.f32 0.0, %v4821_v50  ;;  %v4862_v13 = vadd.f32 %v4768_v26, %v4587_v47  ;;  %4121 = vpow2.f32 %v669_v22 }
 0x10d   : > { %7708 = vst [vmem:[#allocation32_spill] sm:$0xff] %v4839_v3  ;;  %831 = vst.msk [vmem:[%s4801_s11 + $0x80] sm:$0xff] %vm265_vm1, %v799_v60  ;;  %v4110_v62 = vpop.eup %4109  ;;  %v785_v57 = vmul.f32 %v4108_v18, %v4641_v30  ;;  %v617_v51 = vsub.f32 0.0, %v4830_v2  ;;  %v4871_v30 = vadd.f32 %v4587_v47, %v4778_v34  ;;  %4123 = vpow2.f32 %v635_v8 }
 0x10e   : > { %925 = vst.msk [vmem:[#allocation2 + $0xf2] sm:$0xff] %vm265_vm1, %v799_v60  ;;  %7709 = vst [vmem:[#allocation33_spill] sm:$0xff] %v4847_v58  ;;  %v4112_v29 = vpop.eup %4111  ;;  %v801_v27 = vmul.f32 %v4110_v62, %v4644_v31  ;;  %v604_v20 = vsub.f32 0.0, %v4839_v3  ;;  %v4880_v31 = vadd.f32 %v4790_v61, %v4587_v47  ;;  %4125 = vpow2.f32 %v667_v46 }
 0x10f   : > { %7710 = vst [vmem:[#allocation34_spill] sm:$0xff] %v4850_v23  ;;  %7711 = vst [vmem:[#allocation35_spill] sm:$0xff] %v4853_v15  ;;  %v4114_v42 = vpop.eup %4113  ;;  %v788_v26 = vmul.f32 %v4112_v29, %v4657_v55  ;;  %v603_v22 = vsub.f32 0.0, %v4847_v58  ;;  %v4889_v55 = vadd.f32 %v4587_v47, %v4794_v38  ;;  %4127 = vpow2.f32 %v641_v37 }
 0x110   : > { %818 = vst.msk [vmem:[%s4801_s11 + $0x18] sm:$0xff] %vm265_vm1, %v786_v9  ;;  %912 = vst.msk [vmem:[#allocation2 + $0x52] sm:$0xff] %vm265_vm1, %v786_v9  ;;  %v4116_v16 = vpop.eup %4115  ;;  %v804_v34 = vmul.f32 %v4114_v42, %v4660_v1  ;;  %v645_v61 = vmul.f32 1.442695, %v602_v52  ;;  %v677_v39 = vmul.f32 1.442695, %v618_v35  ;;  %4129 = vpow2.f32 %v673_v28 }
 0x111   : > { %7712 = vst [vmem:[#allocation36_spill] sm:$0xff] %v4862_v13  ;;  %834 = vst.msk [vmem:[%s4801_s11 + $0x98] sm:$0xff] %vm265_vm1, %v802_v54  ;;  %v4118_v8 = vpop.eup %4117  ;;  %v620_v59 = vsub.f32 0.0, %v4862_v13  ;;  %v787_v1 = vmul.f32 %v4116_v16, %v4664_v7  ;;  %v619_v46 = vsub.f32 0.0, %v4871_v30  ;;  %4131 = vpow2.f32 %v639_v56  ;;  %v1150_v56 = vld [vmem:[#allocation2 + $0x3a] sm:$0xff] }
 0x112   : > { %928 = vst.msk [vmem:[#allocation2 + $0x112] sm:$0xff] %vm265_vm1, %v802_v54  ;;  %7713 = vst [vmem:[#allocation37_spill] sm:$0xff] %v4871_v30  ;;  %v803_v47 = vmul.f32 %v4118_v8, %v4667_v12  ;;  %v4901_v38 = vmul.f32 1.442695, %v601_v24  ;;  %v4903_v37 = vmul.f32 1.442695, %v617_v51  ;;  %4133 = vpow2.f32 %v671_v36 }
 0x113   : > { %817 = vst.msk [vmem:[%s4801_s11 + $0x10] sm:$0xff] %vm265_vm1, %v785_v57  ;;  %911 = vst.msk [vmem:[#allocation2 + $0x4a] sm:$0xff] %vm265_vm1, %v785_v57  ;;  %v606_v60 = vsub.f32 0.0, %v4880_v31  ;;  %v4912_v7 = vmul.f32 1.442695, %v604_v20  ;;  %v605_v28 = vsub.f32 0.0, %v4850_v23  ;;  %4135 = vpow2.f32 %v645_v61 }
 0x114   : > { %7714 = vst [vmem:[#allocation38_spill] sm:$0xff] %v4880_v31  ;;  %833 = vst.msk [vmem:[%s4801_s11 + $0x90] sm:$0xff] %vm265_vm1, %v801_v27  ;;  %v4914_v12 = vmul.f32 1.442695, %v603_v22  ;;  %v4917_v52 = vld [vmem:[#allocation2 + $0x3b] sm:$0xff]  ;;  %v4923_v35 = vrot.slane %v4675_v19, %v4554_v0  ;;  %v4927_v36 = vrot.slane %v4675_v19, %v4563_v11  ;;  %4137 = vpow2.f32 %v677_v39 }
 0x115   : > { %927 = vst.msk [vmem:[#allocation2 + $0x10a] sm:$0xff] %vm265_vm1, %v801_v27  ;;  %7715 = vst [vmem:[#allocation39_spill] sm:$0xff] %v4889_v55  ;;  %v1350_v45 = vld [vmem:[#allocation2 + $0x3c] sm:$0xff]  ;;  %v4919_v9 = vmul.f32 1.442695, %v620_v59  ;;  %v4939_v24 = vrot.slane %v4675_v19, %v4568_v21  ;;  %v4943_v0 = vadd.f32 %v4742_v17, %v4752_v43  ;;  %v4120_v29 = vpop.eup %4119  ;;  %v622_v21 = vsub.f32 0.0, %v4853_v15 }
 0x116   : > { %820 = vst.msk [vmem:[%s4801_s11 + $0x28] sm:$0xff] %vm265_vm1, %v788_v26  ;;  %914 = vst.msk [vmem:[#allocation2 + $0x6a] sm:$0xff] %vm265_vm1, %v788_v26  ;;  %v4935_v57 = vmul.f32 1.442695, %v619_v46  ;;  %v4955_v20 = vmul.f32 1.442695, %v606_v60  ;;  %v4122_v19 = vpop.eup %4121  ;;  %v4968_v61 = vadd.f32 %v4745_v4, %v4758_v49  ;;  %v4971_v59 = vmul.f32 %v4536_v44, %v1150_v56 }
 0x117   : > { %836 = vst.msk [vmem:[%s4801_s11 + $0xa8] sm:$0xff] %vm265_vm1, %v804_v34  ;;  %930 = vst.msk [vmem:[#allocation2 + $0x12a] sm:$0xff] %vm265_vm1, %v804_v34  ;;  %v4945_v11 = vld [vmem:[#allocation2 + $0x52] sm:$0xff]  ;;  %v4964_v8 = vmul.f32 1.442695, %v605_v28  ;;  %v4124_v39 = vpop.eup %4123  ;;  %v4981_v46 = vmul.f32 %v4579_v32, %v1150_v56  ;;  %v710_v3 = vadd.f32 1.0, %v4122_v19 }
 0x118   : > { %819 = vst.msk [vmem:[%s4801_s11 + $0x20] sm:$0xff] %vm265_vm1, %v787_v1  ;;  %913 = vst.msk [vmem:[#allocation2 + $0x62] sm:$0xff] %vm265_vm1, %v787_v1  ;;  %v949_v17 = vld [vmem:[#allocation2 + $0x30] sm:$0xff]  ;;  %v950_v43 = vld [vmem:[#allocation2 + $0x38] sm:$0xff]  ;;  %v4975_v1 = vmul.f32 %v4545_v53, %v4917_v52  ;;  %v4126_v28 = vpop.eup %4125  ;;  %v1188_v49 = vmul.f32 %v4536_v44, %v4945_v11  ;;  %v4997_v30 = vmul.f32 1.442695, %v622_v21 }
 0x119   : > { %835 = vst.msk [vmem:[%s4801_s11 + $0xa0] sm:$0xff] %vm265_vm1, %v803_v47  ;;  %929 = vst.msk [vmem:[#allocation2 + $0x122] sm:$0xff] %vm265_vm1, %v803_v47  ;;  %v4958_v16 = vld [vmem:[#allocation2 + $0x53] sm:$0xff]  ;;  %v4978_v47 = vmul.f32 %v4552_v63, %v1350_v45  ;;  %v4128_v31 = vpop.eup %4127  ;;  %v985_v45 = vmul.f32 %v4530_v40, %v949_v17  ;;  %v693_v2 = vadd.f32 1.0, %v4124_v39 }
 0x11a   : > { %7716 = vst [vmem:[#allocation40_spill] sm:$0xff] %v4917_v52  ;;  %v4929_v18 = vld [vmem:[#allocation2 + $0x48] sm:$0xff]  ;;  %v4931_v54 = vld [vmem:[#allocation2 + $0x50] sm:$0xff]  ;;  %7719 = vst [vmem:[#allocation43_spill] sm:$0xff] %v4939_v24  ;;  %v1288_v56 = vmul.f32 %v4545_v53, %v4958_v16 }
 0x11b   : > { %7717 = vst [vmem:[#allocation41_spill] sm:$0xff] %v4929_v18  ;;  %v4933_v62 = vld [vmem:[#allocation2 + $0x49] sm:$0xff]  ;;  %v987_v27 = vmul.f32 %v4530_v40, %v4929_v18  ;;  %v988_v51 = vmul.f32 %v4530_v40, %v4931_v54  ;;  %v4951_v42 = vld [vmem:[#allocation2 + $0x51] sm:$0xff]  ;;  %7722 = vst [vmem:[#allocation46_spill] sm:$0xff] %v4958_v16 }
 0x11c   : > { %7718 = vst [vmem:[#allocation42_spill] sm:$0xff] %v4933_v62  ;;  %7720 = vst [vmem:[#allocation44_spill] sm:$0xff] %v4951_v42  ;;  %v4953_v26 = vld [vmem:[#allocation2 + $0x4a] sm:$0xff]  ;;  %v1087_v34 = vmul.f32 %v4533_v41, %v4933_v62  ;;  %v1088_v22 = vmul.f32 %v4533_v41, %v4951_v42 }
 0x11d   : > { %7721 = vst [vmem:[#allocation45_spill] sm:$0xff] %v4953_v26  ;;  %7723 = vst [vmem:[#allocation47_spill] sm:$0xff] %v4968_v61  ;;  %v4983_v60 = vld [vmem:[#allocation2 + $0x4b] sm:$0xff]  ;;  %v1187_v52 = vmul.f32 %v4536_v44, %v4953_v26 }
 0x11e   : > { %7724 = vst [vmem:[#allocation48_spill] sm:$0xff] %v4971_v59  ;;  %7725 = vst [vmem:[#allocation49_spill] sm:$0xff] %v4975_v1  ;;  %v4985_v15 = vld [vmem:[#allocation2 + $0x31] sm:$0xff]  ;;  %v1119_v4 = vadd.f32 %v1087_v34, %v987_v27  ;;  %v1120_v23 = vadd.f32 %v1088_v22, %v988_v51  ;;  %v4130_v1 = vpop.eup %4129  ;;  %v1287_v27 = vmul.f32 %v4545_v53, %v4983_v60  ;;  %v694_v51 = vadd.f32 1.0, %v4120_v29  ;;  %v5001_v22 = vld [vmem:[#allocation2 + $0x39] sm:$0xff] }
 0x11f   : > { %7726 = vst [vmem:[#allocation50_spill] sm:$0xff] %v4978_v47  ;;  %7727 = vst [vmem:[#allocation51_spill] sm:$0xff] %v4981_v46  ;;  %v986_v47 = vmul.f32 %v4530_v40, %v950_v43  ;;  %v4995_v46 = vld [vmem:[#allocation2 + $0x4c] sm:$0xff]  ;;  %v4132_v34 = vpop.eup %4131  ;;  %v1085_v40 = vmul.f32 %v4533_v41, %v4985_v15  ;;  %v709_v59 = vadd.f32 1.0, %v4126_v28  ;;  %v5010_v29 = vmul.f32 %v4561_v10, %v949_v17 }
 0x120   : > { %7728 = vst [vmem:[#allocation52_spill] sm:$0xff] %v4983_v60  ;;  %v1219_v13 = vadd.f32 %v1187_v52, %v1119_v4  ;;  %v1220_v58 = vadd.f32 %v1188_v49, %v1120_v23  ;;  %v4134_v50 = vpop.eup %4133  ;;  %v1387_v23 = vmul.f32 %v4552_v63, %v4995_v46  ;;  %4139 = vrcp.f32 %v694_v51  ;;  %v1149_v49 = vld [vmem:[#allocation2 + $0x32] sm:$0xff]  ;;  %v7741_v63 = vld [vmem:[#allocation23_spill] sm:$0xff] }
 0x121   : > { %v4136_v52 = vpop.eup %4135  ;;  %4141 = vrcp.f32 %v710_v3  ;;  %v696_v4 = vadd.f32 1.0, %v4128_v31  ;;  %v712_v53 = vadd.f32 1.0, %v4130_v1  ;;  %v1086_v19 = vmul.f32 %v4533_v41, %v5001_v22  ;;  %v5021_v3 = vld [vmem:[#allocation2 + $0x33] sm:$0xff] }
 0x122   : > { %v1319_v32 = vadd.f32 %v1287_v27, %v1219_v13  ;;  %v5005_v21 = vadd.f32 %v1288_v56, %v1220_v58  ;;  %v4138_v61 = vpop.eup %4137  ;;  %4143 = vrcp.f32 %v693_v2  ;;  %v695_v58 = vadd.f32 1.0, %v4132_v34  ;;  %v7739_v41 = vld [vmem:[#allocation21_spill] sm:$0xff] }
 0x123   : > { %4145 = vrcp.f32 %v709_v59  ;;  %v711_v13 = vadd.f32 1.0, %v4134_v50  ;;  %v621_v28 = vsub.f32 0.0, %v4889_v55  ;;  %v1982_v56 = vmul.f32 %v4700_v6, %v949_v17  ;;  %v5078_v55 = vld [vmem:[#allocation2 + $0x63] sm:$0xff] }
 0x124   : > { %7729 = vst [vmem:[#allocation53_spill] sm:$0xff] %v5005_v21  ;;  %v5014_v39 = vadd.f32 %v1387_v23, %v1319_v32  ;;  %v5019_v27 = vmul.f32 %v4536_v44, %v1149_v49  ;;  %v5024_v31 = vmul.f32 %v4561_v10, %v950_v43  ;;  %4147 = vrcp.f32 %v696_v4  ;;  %v5026_v32 = vld [vmem:[#allocation2 + $0x34] sm:$0xff]  ;;  %v7733_v4 = vld [vmem:[#allocation15_spill] sm:$0xff]  ;;  %v7738_v21 = vld [vmem:[#allocation20_spill] sm:$0xff] }
 0x125   : > { %v698_v1 = vadd.f32 1.0, %v4136_v52  ;;  %7731 = vst [vmem:[#allocation55_spill] sm:$0xff] %v5026_v32  ;;  %4149 = vrcp.f32 %v712_v53  ;;  %v714_v2 = vadd.f32 1.0, %v4138_v61  ;;  %v2014_v50 = vadd.f32 %v1982_v56, %v4732_v5  ;;  %v7732_v52 = vld [vmem:[#allocation14_spill] sm:$0xff]  ;;  %v5040_v61 = vld [vmem:[#allocation2 + $0x60] sm:$0xff] }
 0x126   : > { %7730 = vst [vmem:[#allocation54_spill] sm:$0xff] %v5014_v39  ;;  %v2082_v59 = vmul.f32 %v4704_v33, %v4985_v15  ;;  %v5031_v17 = vadd.f32 %v1085_v40, %v985_v45  ;;  %v5033_v51 = vadd.f32 %v1086_v19, %v986_v47  ;;  %4151 = vrcp.f32 %v695_v58  ;;  %v1947_v5 = vld [vmem:[#allocation2 + $0x38] sm:$0xff]  ;;  %v7734_v47 = vld [vmem:[#allocation17_spill] sm:$0xff]  ;;  %v5048_v58 = vld [vmem:[#allocation2 + $0x61] sm:$0xff] }
 0x127   : > { %v2182_v34 = vmul.f32 %v4679_v25, %v1149_v49  ;;  %4153 = vrcp.f32 %v711_v13  ;;  %v5036_v43 = vmul.f32 1.442695, %v621_v28  ;;  %v2282_v53 = vmul.f32 %v7732_v52, %v5021_v3  ;;  %v7735_v19 = vld [vmem:[#allocation18_spill] sm:$0xff]  ;;  %v7736_v28 = vld [vmem:[#allocation16_spill] sm:$0xff]  ;;  %7742 = vst [vmem:[#allocation14_spill] sm:$0xff] %v5078_v55 }
 0x128   : > { %v2114_v23 = vadd.f32 %v2082_v59, %v2014_v50  ;;  %4155 = vrcp.f32 %v698_v1  ;;  %v2382_v40 = vmul.f32 %v7733_v4, %v5026_v32  ;;  %v2483_v45 = vmul.f32 %v7734_v47, %v4929_v18  ;;  %v7737_v50 = vld [vmem:[#allocation19_spill] sm:$0xff] }
 0x129   : > { %v2583_v49 = vmul.f32 %v7735_v19, %v4933_v62  ;;  %4157 = vrcp.f32 %v714_v2  ;;  %v5052_v56 = vmul.f32 %v7736_v28, %v4953_v26  ;;  %v5056_v1 = vmul.f32 %v7737_v50, %v4983_v60  ;;  %v2047_v59 = vld [vmem:[#allocation2 + $0x39] sm:$0xff] }
 0x12a   : > { %v2214_v13 = vadd.f32 %v2182_v34, %v2114_v23  ;;  %v4140_v39 = vpop.eup %4139  ;;  %4159 = vpow2.f32 %v4901_v38  ;;  %v5061_v44 = vmul.f32 %v7738_v21, %v4995_v46  ;;  %v5065_v2 = vmul.f32 %v7739_v41, %v5040_v61  ;;  %v5067_v34 = vld [vmem:[#allocation2 + $0x62] sm:$0xff]  ;;  %v7740_v60 = vld [vmem:[#allocation22_spill] sm:$0xff] }
 0x12b   : > { %v1983_v23 = vmul.f32 %v4700_v6, %v1947_v5  ;;  %v4142_v26 = vpop.eup %4141  ;;  %v790_v62 = vmul.f32 %v4140_v39, %v7740_v60  ;;  %4161 = vpow2.f32 %v4903_v37  ;;  %v5074_v38 = vmul.f32 %v4923_v35, %v5048_v58  ;;  %v2147_v46 = vld [vmem:[#allocation2 + $0x3a] sm:$0xff]  ;;  %v7743_v37 = vld [vmem:[#allocation24_spill] sm:$0xff] }
 0x12c   : > { %v2314_v18 = vadd.f32 %v2282_v53, %v2214_v13  ;;  %v4144_v10 = vpop.eup %4143  ;;  %v806_v32 = vmul.f32 %v4142_v26, %v7741_v63  ;;  %4163 = vpow2.f32 %v4912_v7  ;;  %v2083_v60 = vmul.f32 %v4704_v33, %v2047_v59  ;;  %v2247_v7 = vld [vmem:[#allocation2 + $0x3b] sm:$0xff] }
 0x12d   : > { %v2015_v5 = vadd.f32 %v1983_v23, %v4943_v0  ;;  %v4146_v39 = vpop.eup %4145  ;;  %822 = vst.msk [vmem:[%s4801_s11 + $0x38] sm:$0xff] %vm265_vm1, %v790_v62  ;;  %916 = vst.msk [vmem:[#allocation2 + $0x82] sm:$0xff] %vm265_vm1, %v790_v62  ;;  %v789_v53 = vmul.f32 %v4144_v10, %v7743_v37  ;;  %4165 = vpow2.f32 %v4914_v12  ;;  %v5089_v63 = vmul.f32 %v4927_v36, %v5067_v34  ;;  %v7744_v0 = vld [vmem:[#allocation25_spill] sm:$0xff]  ;;  %v5097_v12 = vld [vmem:[#allocation2 + $0x3c] sm:$0xff] }
 0x12e   : > { %v2414_v13 = vadd.f32 %v2382_v40, %v2314_v18  ;;  %v4148_v26 = vpop.eup %4147  ;;  %838 = vst.msk [vmem:[%s4801_s11 + $0xb8] sm:$0xff] %vm265_vm1, %v806_v32  ;;  %932 = vst.msk [vmem:[#allocation2 + $0x142] sm:$0xff] %vm265_vm1, %v806_v32  ;;  %v805_v59 = vmul.f32 %v4146_v39, %v7744_v0  ;;  %4167 = vpow2.f32 %v4919_v9  ;;  %v2183_v10 = vmul.f32 %v4679_v25, %v2147_v46  ;;  %v7745_v40 = vld [vmem:[#allocation26_spill] sm:$0xff]  ;;  %v7746_v46 = vld [vmem:[#allocation27_spill] sm:$0xff] }
 0x12f   : > { %v2115_v62 = vadd.f32 %v2083_v60, %v2015_v5  ;;  %v4150_v18 = vpop.eup %4149  ;;  %821 = vst.msk [vmem:[%s4801_s11 + $0x30] sm:$0xff] %vm265_vm1, %v789_v53  ;;  %915 = vst.msk [vmem:[#allocation2 + $0x7a] sm:$0xff] %vm265_vm1, %v789_v53  ;;  %v792_v23 = vmul.f32 %v4148_v26, %v7745_v40  ;;  %4169 = vpow2.f32 %v4935_v57  ;;  %v5106_v39 = vmul.f32 %v4939_v24, %v5078_v55  ;;  %v7747_v57 = vld [vmem:[#allocation28_spill] sm:$0xff] }
 0x130   : > { %v2515_v32 = vadd.f32 %v2483_v45, %v2414_v13  ;;  %v4152_v9 = vpop.eup %4151  ;;  %837 = vst.msk [vmem:[%s4801_s11 + $0xb0] sm:$0xff] %vm265_vm1, %v805_v59  ;;  %931 = vst.msk [vmem:[#allocation2 + $0x13a] sm:$0xff] %vm265_vm1, %v805_v59  ;;  %v808_v5 = vmul.f32 %v4150_v18, %v7746_v46  ;;  %4171 = vpow2.f32 %v4955_v20  ;;  %v2283_v37 = vmul.f32 %v7732_v52, %v2247_v7  ;;  %v5121_v59 = vld [vmem:[#allocation2 + $0x54] sm:$0xff] }
 0x131   : > { %v2215_v60 = vadd.f32 %v2183_v10, %v2115_v62  ;;  %v4154_v53 = vpop.eup %4153  ;;  %824 = vst.msk [vmem:[%s4801_s11 + $0x48] sm:$0xff] %vm265_vm1, %v792_v23  ;;  %918 = vst.msk [vmem:[#allocation2 + $0x9a] sm:$0xff] %vm265_vm1, %v792_v23  ;;  %v791_v45 = vmul.f32 %v4152_v9, %v7747_v57  ;;  %4173 = vpow2.f32 %v4964_v8  ;;  %v2383_v26 = vmul.f32 %v7733_v4, %v5097_v12  ;;  %v7748_v20 = vld [vmem:[#allocation29_spill] sm:$0xff] }
 0x132   : > { %v2615_v13 = vadd.f32 %v2583_v49, %v2515_v32  ;;  %v4156_v0 = vpop.eup %4155  ;;  %840 = vst.msk [vmem:[%s4801_s11 + $0xc8] sm:$0xff] %vm265_vm1, %v808_v5  ;;  %934 = vst.msk [vmem:[#allocation2 + $0x15a] sm:$0xff] %vm265_vm1, %v808_v5  ;;  %v807_v7 = vmul.f32 %v4154_v53, %v7748_v20  ;;  %4175 = vpow2.f32 %v4997_v30  ;;  %v2484_v8 = vmul.f32 %v7734_v47, %v4931_v54  ;;  %v5138_v30 = vld [vmem:[#allocation2 + $0x68] sm:$0xff] }
 0x133   : > { %v2315_v62 = vadd.f32 %v2283_v37, %v2215_v60  ;;  %v4158_v49 = vpop.eup %4157  ;;  %823 = vst.msk [vmem:[%s4801_s11 + $0x40] sm:$0xff] %vm265_vm1, %v791_v45  ;;  %917 = vst.msk [vmem:[#allocation2 + $0x92] sm:$0xff] %vm265_vm1, %v791_v45  ;;  %v794_v10 = vmul.f32 %v4156_v0, %v4806_v48  ;;  %4177 = vpow2.f32 %v5036_v43  ;;  %v2584_v40 = vmul.f32 %v7735_v19, %v4951_v42  ;;  %v7751_v0 = vld [vmem:[#allocation9_spill] sm:$0xff] }
 0x134   : > { %v2715_v18 = vadd.f32 %v5052_v56, %v2615_v13  ;;  %7749 = vst [vmem:[#allocation15_spill] sm:$0xff] %v5138_v30  ;;  %v4160_v23 = vpop.eup %4159  ;;  %839 = vst.msk [vmem:[%s4801_s11 + $0xc0] sm:$0xff] %vm265_vm1, %v807_v7  ;;  %v810_v32 = vmul.f32 %v4158_v49, %v4812_v14  ;;  %v2684_v48 = vmul.f32 %v7736_v28, %v4945_v11  ;;  %v1648_v56 = vld [vmem:[#allocation2 + $0x32] sm:$0xff]  ;;  %v7750_v14 = vld [vmem:[#allocation47_spill] sm:$0xff] }
 0x135   : > { %933 = vst.msk [vmem:[#allocation2 + $0x152] sm:$0xff] %vm265_vm1, %v807_v7  ;;  %v2415_v9 = vadd.f32 %v2383_v26, %v2315_v62  ;;  %v2784_v43 = vmul.f32 %v7737_v50, %v4958_v16  ;;  %v4162_v46 = vpop.eup %4161  ;;  %826 = vst.msk [vmem:[%s4801_s11 + $0x58] sm:$0xff] %vm265_vm1, %v794_v10  ;;  %v697_v5 = vadd.f32 1.0, %v4160_v23  ;;  %v2884_v37 = vmul.f32 %v7738_v21, %v5121_v59 }
 0x136   : > { %920 = vst.msk [vmem:[#allocation2 + $0xb2] sm:$0xff] %vm265_vm1, %v794_v10  ;;  %v2815_v60 = vadd.f32 %v5056_v1, %v2715_v18  ;;  %v1516_v53 = vadd.f32 %v5010_v29, %v7750_v14  ;;  %v4164_v57 = vpop.eup %4163  ;;  %842 = vst.msk [vmem:[%s4801_s11 + $0xd8] sm:$0xff] %vm265_vm1, %v810_v32  ;;  %v713_v45 = vadd.f32 1.0, %v4162_v46  ;;  %v2985_v26 = vmul.f32 %v7739_v41, %v5138_v30  ;;  %v1748_v1 = vld [vmem:[#allocation2 + $0x33] sm:$0xff] }
 0x137   : > { %936 = vst.msk [vmem:[#allocation2 + $0x172] sm:$0xff] %vm265_vm1, %v810_v32  ;;  %v2516_v13 = vadd.f32 %v2484_v8, %v2415_v9  ;;  %v1584_v20 = vmul.f32 %v7751_v0, %v4985_v15  ;;  %v4166_v7 = vpop.eup %4165  ;;  %4179 = vrcp.f32 %v697_v5  ;;  %v700_v62 = vadd.f32 1.0, %v4164_v57  ;;  %v7752_v29 = vld [vmem:[#allocation10_spill] sm:$0xff]  ;;  %v7753_v15 = vld [vmem:[#allocation12_spill] sm:$0xff] }
 0x138   : > { %v2915_v49 = vadd.f32 %v5061_v44, %v2815_v60  ;;  %v1684_v10 = vmul.f32 %v7752_v29, %v1648_v56  ;;  %v4168_v18 = vpop.eup %4167  ;;  %4181 = vrcp.f32 %v713_v45  ;;  %v699_v23 = vadd.f32 1.0, %v4166_v7  ;;  %v1848_v8 = vld [vmem:[#allocation2 + $0x34] sm:$0xff]  ;;  %v1948_v60 = vld [vmem:[#allocation2 + $0x48] sm:$0xff] }
 0x139   : > { %v2616_v32 = vadd.f32 %v2584_v40, %v2516_v13  ;;  %v1616_v46 = vadd.f32 %v1584_v20, %v1516_v53  ;;  %v4170_v9 = vpop.eup %4169  ;;  %4183 = vrcp.f32 %v700_v62  ;;  %v716_v14 = vadd.f32 1.0, %v4168_v18  ;;  %v7754_v53 = vld [vmem:[#allocation13_spill] sm:$0xff]  ;;  %v5169_v62 = vld [vmem:[#allocation2 + $0x64] sm:$0xff] }
 0x13a   : > { %v3016_v30 = vadd.f32 %v5065_v2, %v2915_v49  ;;  %v1784_v16 = vmul.f32 %v7753_v15, %v1748_v1  ;;  %v4172_v42 = vpop.eup %4171  ;;  %4185 = vrcp.f32 %v699_v23  ;;  %v715_v5 = vadd.f32 1.0, %v4170_v9  ;;  %7755 = vst [vmem:[#allocation17_spill] sm:$0xff] %v5169_v62  ;;  %v5171_v1 = vld [vmem:[#allocation2 + $0x69] sm:$0xff] }
 0x13b   : > { %v2716_v57 = vadd.f32 %v2684_v48, %v2616_v32  ;;  %v1716_v44 = vadd.f32 %v1684_v10, %v1616_v46  ;;  %v4174_v56 = vpop.eup %4173  ;;  %4187 = vrcp.f32 %v716_v14  ;;  %v702_v45 = vadd.f32 1.0, %v4172_v42  ;;  %v2048_v23 = vld [vmem:[#allocation2 + $0x49] sm:$0xff]  ;;  %v5190_v14 = vld [vmem:[%s7402_s4] ss:$0 sm:$0xff] }
 0x13c   : > { %v3116_v40 = vadd.f32 %v5074_v38, %v3016_v30  ;;  %v1884_v13 = vmul.f32 %v7754_v53, %v1848_v8  ;;  %v4176_v20 = vpop.eup %4175  ;;  %4189 = vrcp.f32 %v715_v5  ;;  %v701_v7 = vadd.f32 1.0, %v4174_v56  ;;  %v5178_v30 = vld [vmem:[%s7401_s3 + $0x18] ss:$0 sm:$0xff]  ;;  %v2148_v9 = vld [vmem:[#allocation2 + $0x4a] sm:$0xff] }
 0x13d   : > { %v2816_v2 = vadd.f32 %v2784_v43, %v2716_v57  ;;  %v1816_v49 = vadd.f32 %v1784_v16, %v1716_v44  ;;  %v4178_v18 = vpop.eup %4177  ;;  %4191 = vrcp.f32 %v702_v45  ;;  %v718_v48 = vadd.f32 1.0, %v4176_v20  ;;  %v5180_v43 = vld [vmem:[#allocation2 + $0x6a] sm:$0xff] }
 0x13e   : > { %v3216_v10 = vadd.f32 %v5089_v63, %v3116_v40  ;;  %v1984_v42 = vmul.f32 %v4700_v6, %v1948_v60  ;;  %4193 = vrcp.f32 %v701_v7  ;;  %v717_v38 = vadd.f32 1.0, %v4178_v18  ;;  %v5192_v5 = vld [vmem:[#allocation2 + $0x6b] sm:$0xff]  ;;  %v7756_v60 = vld [vmem:[#allocation11_spill] sm:$0xff] }
 0x13f   : > { %v2916_v32 = vadd.f32 %v2884_v37, %v2816_v2  ;;  %v1916_v46 = vadd.f32 %v1884_v13, %v1816_v49  ;;  %4195 = vrcp.f32 %v718_v48  ;;  %v3384_v63 = vmul.f32 %v5178_v30, %v5169_v62  ;;  %v2248_v20 = vld [vmem:[#allocation2 + $0x4b] sm:$0xff] }
 0x140   : > { %v3316_v16 = vadd.f32 %v5106_v39, %v3216_v10  ;;  %v3085_v8 = vmul.f32 %v4923_v35, %v5171_v1  ;;  %4197 = vrcp.f32 %v717_v38  ;;  %v2084_v44 = vmul.f32 %v4704_v33, %v2048_v23  ;;  %v5202_v18 = vld [vmem:[#allocation2 + $0x6c] sm:$0xff]  ;;  %v7759_v23 = vld [vmem:[#allocation31_spill] sm:$0xff] }
 0x141   : > { %v3017_v37 = vadd.f32 %v2985_v26, %v2916_v32  ;;  %v2016_v57 = vadd.f32 %v1984_v42, %v1916_v46  ;;  %v4180_v39 = vpop.eup %4179  ;;  %v1517_v56 = vadd.f32 %v5024_v31, %v7756_v60  ;;  %v1585_v45 = vmul.f32 %v7751_v0, %v5001_v22  ;;  %v7757_v26 = vld [vmem:[#allocation30_spill] sm:$0xff]  ;;  %v7758_v42 = vld [vmem:[#allocation48_spill] sm:$0xff]  ;;  %v7761_v60 = vld [vmem:[#allocation33_spill] sm:$0xff] }
 0x142   : > { %v3416_v40 = vadd.f32 %v3384_v63, %v3316_v16  ;;  %v3185_v13 = vmul.f32 %v4927_v36, %v5180_v43  ;;  %v4182_v7 = vpop.eup %4181  ;;  %v793_v2 = vmul.f32 %v4180_v39, %v7757_v26  ;;  %v2184_v10 = vmul.f32 %v4679_v25, %v2148_v9  ;;  %v5213_v16 = vld [vmem:[#allocation2 + $0x4c] sm:$0xff] }
 0x143   : > { %v3117_v49 = vadd.f32 %v3085_v8, %v3017_v37  ;;  %v2116_v48 = vadd.f32 %v2084_v44, %v2016_v57  ;;  %v4184_v31 = vpop.eup %4183  ;;  %v1218_v22 = vadd.f32 %v7758_v42, %v5033_v51  ;;  %v809_v38 = vmul.f32 %v4182_v7, %v7759_v23  ;;  %v7760_v8 = vld [vmem:[#allocation32_spill] sm:$0xff]  ;;  %v7764_v42 = vld [vmem:[#allocation37_spill] sm:$0xff] }
 0x144   : > { %v5209_v32 = vadd.f32 %v5190_v14, %v3416_v40  ;;  %v3285_v46 = vmul.f32 %v4939_v24, %v5192_v5  ;;  %v4186_v63 = vpop.eup %4185  ;;  %825 = vst.msk [vmem:[%s4801_s11 + $0x50] sm:$0xff] %vm265_vm1, %v793_v2  ;;  %919 = vst.msk [vmem:[#allocation2 + $0xaa] sm:$0xff] %vm265_vm1, %v793_v2  ;;  %v796_v9 = vmul.f32 %v4184_v31, %v7760_v8 }
 0x145   : > { %v3217_v37 = vadd.f32 %v3185_v13, %v3117_v49  ;;  %v2216_v51 = vadd.f32 %v2184_v10, %v2116_v48  ;;  %v2284_v57 = vmul.f32 %v7732_v52, %v2248_v20  ;;  %v4188_v44 = vpop.eup %4187  ;;  %v1217_v39 = vadd.f32 %v5019_v27, %v5031_v17  ;;  %841 = vst.msk [vmem:[%s4801_s11 + $0xd0] sm:$0xff] %vm265_vm1, %v809_v38  ;;  %v7762_v20 = vld [vmem:[#allocation36_spill] sm:$0xff]  ;;  %v7763_v10 = vld [vmem:[#allocation49_spill] sm:$0xff] }
 0x146   : > { %935 = vst.msk [vmem:[#allocation2 + $0x16a] sm:$0xff] %vm265_vm1, %v809_v38  ;;  %v795_v40 = vmul.f32 %v4186_v63, %v7761_v60  ;;  %v3487_v7 = vsub.f32 0.0, %v5209_v32  ;;  %v3385_v26 = vmul.f32 %v5178_v30, %v5202_v18  ;;  %v4190_v13 = vpop.eup %4189  ;;  %828 = vst.msk [vmem:[%s4801_s11 + $0x68] sm:$0xff] %vm265_vm1, %v796_v9  ;;  %v812_v2 = vmul.f32 %v4188_v44, %v7762_v20  ;;  %v7767_v44 = vld [vmem:[#allocation51_spill] sm:$0xff] }
 0x147   : > { %922 = vst.msk [vmem:[#allocation2 + $0xca] sm:$0xff] %vm265_vm1, %v796_v9  ;;  %v3317_v27 = vadd.f32 %v3285_v46, %v3217_v37  ;;  %v2316_v17 = vadd.f32 %v2284_v57, %v2216_v51  ;;  %v2384_v49 = vmul.f32 %v7733_v4, %v5213_v16  ;;  %v4192_v48 = vpop.eup %4191  ;;  %v1318_v31 = vadd.f32 %v7763_v10, %v1218_v22  ;;  %v7765_v46 = vld [vmem:[#allocation38_spill] sm:$0xff] }
 0x148   : > { %827 = vst.msk [vmem:[%s4801_s11 + $0x60] sm:$0xff] %vm265_vm1, %v795_v40  ;;  %921 = vst.msk [vmem:[#allocation2 + $0xc2] sm:$0xff] %vm265_vm1, %v795_v40  ;;  %v811_v23 = vmul.f32 %v4190_v13, %v7764_v42  ;;  %v3519_v38 = vmul.f32 1.442695, %v3487_v7  ;;  %v1617_v63 = vadd.f32 %v1585_v45, %v1517_v56  ;;  %v4194_v8 = vpop.eup %4193  ;;  %v798_v9 = vmul.f32 %v4192_v48, %v7765_v46  ;;  %v7766_v56 = vld [vmem:[#allocation34_spill] sm:$0xff]  ;;  %v7768_v40 = vld [vmem:[#allocation40_spill] sm:$0xff] }
 0x149   : > { %844 = vst.msk [vmem:[%s4801_s11 + $0xe8] sm:$0xff] %vm265_vm1, %v812_v2  ;;  %938 = vst.msk [vmem:[#allocation2 + $0x18a] sm:$0xff] %vm265_vm1, %v812_v2  ;;  %v3417_v37 = vadd.f32 %v3385_v26, %v3317_v27  ;;  %v2416_v51 = vadd.f32 %v2384_v49, %v2316_v17  ;;  %v2485_v22 = vmul.f32 %v5040_v61, %v7734_v47  ;;  %v4196_v57 = vpop.eup %4195  ;;  %v7769_v13 = vld [vmem:[#allocation35_spill] sm:$0xff]  ;;  %v1949_v49 = vld [vmem:[#allocation2 + $0x50] sm:$0xff] }
 0x14a   : > { %843 = vst.msk [vmem:[%s4801_s11 + $0xe0] sm:$0xff] %vm265_vm1, %v811_v23  ;;  %937 = vst.msk [vmem:[#allocation2 + $0x182] sm:$0xff] %vm265_vm1, %v811_v23  ;;  %v797_v45 = vmul.f32 %v4194_v8, %v7766_v56  ;;  %4199 = vpow2.f32 %v3519_v38  ;;  %v1717_v60 = vadd.f32 %v7767_v44, %v1617_v63  ;;  %v1785_v7 = vmul.f32 %v7753_v15, %v7768_v40  ;;  %v4198_v26 = vpop.eup %4197  ;;  %v7770_v48 = vld [vmem:[#allocation6_spill] sm:$0xff]  ;;  %v7771_v42 = vld [vmem:[#allocation39_spill] sm:$0xff] }
 0x14b   : > { %830 = vst.msk [vmem:[%s4801_s11 + $0x78] sm:$0xff] %vm265_vm1, %v798_v9  ;;  %924 = vst.msk [vmem:[#allocation2 + $0xe2] sm:$0xff] %vm265_vm1, %v798_v9  ;;  %v814_v20 = vmul.f32 %v4196_v57, %v7769_v13  ;;  %v5258_v2 = vadd.f32 %v5190_v14, %v3417_v37  ;;  %v2517_v27 = vadd.f32 %v2485_v22, %v2416_v51  ;;  %v7772_v37 = vld [vmem:[#allocation50_spill] sm:$0xff]  ;;  %v7774_v40 = vld [vmem:[#allocation7_spill] sm:$0xff] }
 0x14c   : > { %v2585_v17 = vmul.f32 %v5048_v58, %v7735_v19  ;;  %v1285_v10 = vmul.f32 %v7770_v48, %v5021_v3  ;;  %829 = vst.msk [vmem:[%s4801_s11 + $0x70] sm:$0xff] %vm265_vm1, %v797_v45  ;;  %923 = vst.msk [vmem:[#allocation2 + $0xda] sm:$0xff] %vm265_vm1, %v797_v45  ;;  %v813_v23 = vmul.f32 %v4198_v26, %v7771_v42  ;;  %v2049_v57 = vld [vmem:[#allocation2 + $0x51] sm:$0xff] }
 0x14d   : > { %v1817_v38 = vadd.f32 %v1785_v7, %v1717_v60  ;;  %v1885_v63 = vmul.f32 %v5097_v12, %v7754_v53  ;;  %846 = vst.msk [vmem:[%s4801_s11 + $0xf8] sm:$0xff] %vm265_vm1, %v814_v20  ;;  %940 = vst.msk [vmem:[#allocation2 + $0x1a2] sm:$0xff] %vm265_vm1, %v814_v20  ;;  %v3488_v8 = vsub.f32 0.0, %v5258_v2  ;;  %v2685_v3 = vmul.f32 %v5067_v34, %v7736_v28  ;;  %v7773_v60 = vld [vmem:[#allocation55_spill] sm:$0xff]  ;;  %v2149_v20 = vld [vmem:[#allocation2 + $0x52] sm:$0xff] }
 0x14e   : > { %v2617_v46 = vadd.f32 %v2585_v17, %v2517_v27  ;;  %v1317_v9 = vadd.f32 %v1285_v10, %v1217_v39  ;;  %v1418_v51 = vadd.f32 %v7772_v37, %v1318_v31  ;;  %845 = vst.msk [vmem:[%s4801_s11 + $0xf0] sm:$0xff] %vm265_vm1, %v813_v23  ;;  %939 = vst.msk [vmem:[#allocation2 + $0x19a] sm:$0xff] %vm265_vm1, %v813_v23  ;;  %v7775_v39 = vld [vmem:[#allocation8_spill] sm:$0xff]  ;;  %v5287_v31 = vld [vmem:[#allocation2 + $0x78] sm:$0xff] }
 0x14f   : > { %v1917_v22 = vadd.f32 %v1885_v63, %v1817_v38  ;;  %v1985_v12 = vmul.f32 %v4700_v6, %v1949_v49  ;;  %v3521_v56 = vmul.f32 1.442695, %v3488_v8  ;;  %v2785_v44 = vmul.f32 %v5078_v55, %v7737_v50  ;;  %7776 = vst [vmem:[#allocation18_spill] sm:$0xff] %v5287_v31  ;;  %v5291_v49 = vld [vmem:[#allocation2 + $0x79] sm:$0xff] }
 0x150   : > { %v2717_v45 = vadd.f32 %v2685_v3, %v2617_v46  ;;  %v1385_v7 = vmul.f32 %v7774_v40, %v7773_v60  ;;  %v1487_v26 = vmul.f32 %v7775_v39, %v4931_v54  ;;  %v2885_v17 = vmul.f32 %v5169_v62, %v7738_v21  ;;  %7777 = vst [vmem:[#allocation16_spill] sm:$0xff] %v5291_v49  ;;  %v2249_v63 = vld [vmem:[#allocation2 + $0x53] sm:$0xff]  ;;  %v975_v60 = vld [vmem:[#allocation2 + $0x168] sm:$0xff] }
 0x151   : > { %v2017_v13 = vadd.f32 %v1985_v12, %v1917_v22  ;;  %4201 = vpow2.f32 %v3521_v56  ;;  %v2085_v10 = vmul.f32 %v4704_v33, %v2049_v57  ;;  %v5296_v23 = vmul.f32 %v7774_v40, %v5121_v59  ;;  %v5302_v3 = vld [vmem:[#allocation2 + $0x7a] sm:$0xff]  ;;  %v1677_v62 = vld [vmem:[#allocation2 + $0x18a] sm:$0xff] }
 0x152   : > { %v2817_v27 = vadd.f32 %v2785_v44, %v2717_v45  ;;  %v1417_v42 = vadd.f32 %v1385_v7, %v1317_v9  ;;  %v1687_v54 = vmul.f32 %v7752_v29, %v4945_v11  ;;  %v1519_v38 = vadd.f32 %v1487_v26, %v1418_v51  ;;  %7779 = vst [vmem:[#allocation20_spill] sm:$0xff] %v5302_v3  ;;  %v7780_v9 = vld [vmem:[#allocation41_spill] sm:$0xff]  ;;  %v7781_v59 = vld [vmem:[#allocation42_spill] sm:$0xff]  ;;  %v7782_v45 = vld [vmem:[#allocation44_spill] sm:$0xff] }
 0x153   : > { %7778 = vst [vmem:[#allocation19_spill] sm:$0xff] %v5296_v23  ;;  %v2986_v46 = vmul.f32 %v7739_v41, %v5287_v31  ;;  %v2117_v37 = vadd.f32 %v2085_v10, %v2017_v13  ;;  %v2185_v22 = vmul.f32 %v4679_v25, %v2149_v20  ;;  %v1486_v57 = vmul.f32 %v7775_v39, %v7780_v9  ;;  %v2349_v44 = vld [vmem:[#allocation2 + $0x54] sm:$0xff]  ;;  %v1075_v7 = vld [vmem:[#allocation2 + $0x169] sm:$0xff]  ;;  %v5320_v39 = vld [vmem:[#allocation2 + $0x7c] sm:$0xff] }
 0x154   : > { %v2917_v8 = vadd.f32 %v2885_v17, %v2817_v27  ;;  %v4200_v12 = vpop.eup %4199  ;;  %v1586_v56 = vmul.f32 %v7751_v0, %v7781_v59  ;;  %v1587_v11 = vmul.f32 %v7751_v0, %v7782_v45  ;;  %v3086_v51 = vmul.f32 %v4923_v35, %v5291_v49  ;;  %v7783_v10 = vld [vmem:[#allocation45_spill] sm:$0xff]  ;;  %v5318_v23 = vld [vmem:[#allocation2 + $0x7b] sm:$0xff]  ;;  %7785 = vst [vmem:[#allocation22_spill] sm:$0xff] %v5320_v39 }
 0x155   : > { %v3583_v26 = vadd.f32 1.0, %v4200_v12  ;;  %v2217_v27 = vadd.f32 %v2185_v22, %v2117_v37  ;;  %v2285_v20 = vmul.f32 %v7732_v52, %v2249_v63  ;;  %v1518_v17 = vadd.f32 %v1486_v57, %v1417_v42  ;;  %7784 = vst [vmem:[#allocation21_spill] sm:$0xff] %v5318_v23  ;;  %v1175_v0 = vld [vmem:[#allocation2 + $0x16a] sm:$0xff] }
 0x156   : > { %v3018_v13 = vadd.f32 %v2986_v46, %v2917_v8  ;;  %v1686_v9 = vmul.f32 %v7752_v29, %v7783_v10  ;;  %v3186_v59 = vmul.f32 %v4927_v36, %v5302_v3  ;;  %v1619_v45 = vadd.f32 %v1587_v11, %v1519_v38  ;;  %v7786_v46 = vld [vmem:[#allocation3_spill] sm:$0xff]  ;;  %v7787_v42 = vld [vmem:[#allocation4_spill] sm:$0xff]  ;;  %v7788_v10 = vld [vmem:[#allocation46_spill] sm:$0xff] }
 0x157   : > { %4203 = vrcp.f32 %v3583_v26  ;;  %v2317_v12 = vadd.f32 %v2285_v20, %v2217_v27  ;;  %v2385_v8 = vmul.f32 %v7733_v4, %v2349_v44  ;;  %v1011_v63 = vmul.f32 %v7786_v46, %v975_v60  ;;  %v1275_v22 = vld [vmem:[#allocation2 + $0x16b] sm:$0xff] }
 0x158   : > { %v3118_v49 = vadd.f32 %v3086_v51, %v3018_v13  ;;  %v1111_v37 = vmul.f32 %v7787_v42, %v1075_v7  ;;  %v1719_v57 = vadd.f32 %v1687_v54, %v1619_v45  ;;  %v1787_v3 = vmul.f32 %v7753_v15, %v7788_v10  ;;  %v7789_v51 = vld [vmem:[#allocation15_spill] sm:$0xff]  ;;  %v7790_v13 = vld [vmem:[#allocation5_spill] sm:$0xff] }
 0x159   : > { %v3286_v38 = vmul.f32 %v4939_v24, %v5318_v23  ;;  %v2417_v11 = vadd.f32 %v2385_v8, %v2317_v12  ;;  %v2486_v26 = vmul.f32 %v7789_v51, %v7734_v47  ;;  %v1211_v27 = vmul.f32 %v7790_v13, %v1175_v0  ;;  %v1375_v20 = vld [vmem:[#allocation2 + $0x16c] sm:$0xff] }
 0x15a   : > { %v3218_v31 = vadd.f32 %v3186_v59, %v3118_v49  ;;  %v3386_v60 = vmul.f32 %v5178_v30, %v5320_v39  ;;  %v1819_v7 = vadd.f32 %v1787_v3, %v1719_v57  ;;  %v1887_v54 = vmul.f32 %v2349_v44, %v7754_v53 }
 0x15b   : > { %v4202_v45 = vpop.eup %4201  ;;  %v5336_v49 = vmul.f32 %v7770_v48, %v1275_v22  ;;  %v2518_v10 = vadd.f32 %v2486_v26, %v2417_v11  ;;  %v2586_v12 = vmul.f32 %v5171_v1, %v7735_v19  ;;  %v1143_v8 = vadd.f32 %v1111_v37, %v1011_v63 }
 0x15c   : > { %v3318_v59 = vadd.f32 %v3286_v38, %v3218_v31  ;;  %v3584_v23 = vadd.f32 1.0, %v4202_v45  ;;  %v1919_v0 = vadd.f32 %v1887_v54, %v1819_v7  ;;  %v1987_v55 = vmul.f32 %v7789_v51, %v4700_v6 }
 0x15d   : > { %7791 = vst [vmem:[#allocation23_spill] sm:$0xff] %v5336_v49  ;;  %v5343_v3 = vmul.f32 %v7774_v40, %v1375_v20  ;;  %v2618_v57 = vadd.f32 %v2586_v12, %v2518_v10  ;;  %v2686_v22 = vmul.f32 %v5180_v43, %v7736_v28  ;;  %v5348_v31 = vmul.f32 %v7752_v29, %v1677_v62  ;;  %v5357_v20 = vld [vmem:[#allocation2 + $0x80] sm:$0xff] }
 0x15e   : > { %v3418_v44 = vadd.f32 %v3386_v60, %v3318_v59  ;;  %4205 = vrcp.f32 %v3584_v23  ;;  %v2019_v38 = vadd.f32 %v1987_v55, %v1919_v0  ;;  %v2087_v63 = vmul.f32 %v5171_v1, %v4704_v33  ;;  %v5366_v10 = vld [vmem:[#allocation2 + $0x81] sm:$0xff] }
 0x15f   : > { %7792 = vst [vmem:[#allocation24_spill] sm:$0xff] %v5343_v3  ;;  %7793 = vst [vmem:[#allocation25_spill] sm:$0xff] %v5348_v31  ;;  %v2718_v11 = vadd.f32 %v2686_v22, %v2618_v57  ;;  %v2786_v26 = vmul.f32 %v5192_v5, %v7737_v50  ;;  %v1618_v60 = vadd.f32 %v1586_v56, %v1518_v17  ;;  %v5368_v12 = vld [vmem:[#allocation2 + $0x82] sm:$0xff] }
 0x160   : > { %v5353_v37 = vadd.f32 %v5190_v14, %v3418_v44  ;;  %v5359_v7 = vadd.f32 %v1211_v27, %v1143_v8  ;;  %v2886_v62 = vmul.f32 %v5202_v18, %v7738_v21  ;;  %v2119_v23 = vadd.f32 %v2087_v63, %v2019_v38  ;;  %7795 = vst [vmem:[#allocation27_spill] sm:$0xff] %v5368_v12  ;;  %v7796_v44 = vld [vmem:[#allocation52_spill] sm:$0xff] }
 0x161   : > { %v2187_v55 = vmul.f32 %v5180_v43, %v4679_v25  ;;  %v4204_v54 = vpop.eup %4203  ;;  %v2818_v59 = vadd.f32 %v2786_v26, %v2718_v11  ;;  %v1718_v0 = vadd.f32 %v1686_v9, %v1618_v60  ;;  %v1786_v56 = vmul.f32 %v7753_v15, %v7796_v44  ;;  %v5377_v63 = vld [vmem:[#allocation2 + $0x83] sm:$0xff] }
 0x162   : > { %7794 = vst [vmem:[#allocation26_spill] sm:$0xff] %v5359_v7  ;;  %v3489_v45 = vsub.f32 0.0, %v5353_v37  ;;  %v3679_v17 = vmul.f32 %v4204_v54, %v5209_v32  ;;  %v2987_v27 = vmul.f32 %v7739_v41, %v5357_v20  ;;  %v2287_v57 = vmul.f32 %v5192_v5, %v7732_v52  ;;  %7797 = vst [vmem:[#allocation28_spill] sm:$0xff] %v5377_v63  ;;  %v5379_v11 = vld [vmem:[#allocation2 + $0x84] sm:$0xff] }
 0x163   : > { %v2219_v8 = vadd.f32 %v2187_v55, %v2119_v23  ;;  %v2918_v38 = vadd.f32 %v2886_v62, %v2818_v59  ;;  %7798 = vst [vmem:[#allocation29_spill] sm:$0xff] %v5379_v11  ;;  %v1818_v26 = vadd.f32 %v1786_v56, %v1718_v0  ;;  %v1886_v9 = vmul.f32 %v5213_v16, %v7754_v53  ;;  %v966_v16 = vld [vmem:[#allocation2 + $0xf8] sm:$0xff] }
 0x164   : > { %v3523_v22 = vmul.f32 1.442695, %v3489_v45  ;;  %3743 = vrot.lane.b32.xlu0 %v3679_v17, %s4344_s16  ;;  %v3087_v32 = vmul.f32 %v4923_v35, %v5366_v10  ;;  %v3187_v60 = vmul.f32 %v4927_v36, %v5368_v12  ;;  %v2387_v62 = vmul.f32 %v5202_v18, %v7733_v4  ;;  %v1066_v59 = vld [vmem:[#allocation2 + $0xf9] sm:$0xff] }
 0x165   : > { %v2319_v23 = vadd.f32 %v2287_v57, %v2219_v8  ;;  %v3019_v55 = vadd.f32 %v2987_v27, %v2918_v38  ;;  %v1918_v54 = vadd.f32 %v1886_v9, %v1818_v26  ;;  %v1986_v45 = vmul.f32 %v5040_v61, %v4700_v6 }
 0x166   : > { %4207 = vpow2.f32 %v3523_v22  ;;  %v3287_v0 = vmul.f32 %v4939_v24, %v5377_v63  ;;  %v3387_v44 = vmul.f32 %v5178_v30, %v5379_v11  ;;  %v2488_v17 = vmul.f32 %v5357_v20, %v7734_v47  ;;  %v1166_v22 = vld [vmem:[#allocation2 + $0xfa] sm:$0xff] }
 0x167   : > { %v2419_v56 = vadd.f32 %v2387_v62, %v2319_v23  ;;  %v3119_v8 = vadd.f32 %v3087_v32, %v3019_v55  ;;  %v2588_v27 = vmul.f32 %v5366_v10, %v7735_v19  ;;  %v2018_v57 = vadd.f32 %v1986_v45, %v1918_v54  ;;  %v5407_v55 = vld [vmem:[#allocation2 + $0x98] sm:$0xff] }
 0x168   : > { %v2086_v61 = vmul.f32 %v5048_v58, %v4704_v33  ;;  %v4206_v38 = vpop.eup %4205  ;;  %v2688_v9 = vmul.f32 %v5368_v12, %v7736_v28  ;;  %v1002_v31 = vmul.f32 %v7786_v46, %v966_v16  ;;  %v1102_v23 = vmul.f32 %v7787_v42, %v1066_v59  ;;  %7799 = vst [vmem:[#allocation47_spill] sm:$0xff] %v5407_v55  ;;  %v1266_v58 = vld [vmem:[#allocation2 + $0xfb] sm:$0xff] }
 0x169   : > { %v2520_v26 = vadd.f32 %v2488_v17, %v2419_v56  ;;  %v3680_v62 = vmul.f32 %v4206_v38, %v5258_v2  ;;  %v3219_v32 = vadd.f32 %v3187_v60, %v3119_v8  ;;  %v2186_v54 = vmul.f32 %v5067_v34, %v4679_v25  ;;  %v5413_v17 = vld [vmem:[#allocation2 + $0x99] sm:$0xff] }
 0x16a   : > { %v2118_v3 = vadd.f32 %v2086_v61, %v2018_v57  ;;  %v2788_v56 = vmul.f32 %v5377_v63, %v7737_v50  ;;  %7800 = vst [vmem:[#allocation10_spill] sm:$0xff] %v5413_v17  ;;  %v1134_v49 = vadd.f32 %v1102_v23, %v1002_v31  ;;  %v1202_v16 = vmul.f32 %v7790_v13, %v1166_v22  ;;  %v5419_v59 = vld [vmem:[#allocation2 + $0x9a] sm:$0xff]  ;;  %v1065_v63 = vld [vmem:[#allocation2 + $0xf1] sm:$0xff] }
 0x16b   : > { %v2620_v45 = vadd.f32 %v2588_v27, %v2520_v26  ;;  %3745 = vrot.lane.b32.xlu0 %v3680_v62, %s4344_s16  ;;  %v3319_v2 = vadd.f32 %v3287_v0, %v3219_v32  ;;  %v2888_v60 = vmul.f32 %v5379_v11, %v7738_v21  ;;  %7801 = vst [vmem:[#allocation12_spill] sm:$0xff] %v5419_v59  ;;  %v7802_v34 = vld [vmem:[#allocation14_spill] sm:$0xff]  ;;  %v965_v11 = vld [vmem:[#allocation2 + $0xf0] sm:$0xff] }
 0x16c   : > { %v2218_v8 = vadd.f32 %v2186_v54, %v2118_v3  ;;  %v2286_v27 = vmul.f32 %v7802_v34, %v7732_v52  ;;  %v1366_v57 = vld [vmem:[#allocation2 + $0xfc] sm:$0xff]  ;;  %v2989_v38 = vmul.f32 %v7739_v41, %v5407_v55  ;;  %v1234_v22 = vadd.f32 %v1202_v16, %v1134_v49  ;;  %v7804_v3 = vld [vmem:[#allocation17_spill] sm:$0xff] }
 0x16d   : > { %v2720_v61 = vadd.f32 %v2688_v9, %v2620_v45  ;;  %v5425_v31 = vld [vmem:[#allocation2 + $0x9b] sm:$0xff]  ;;  %v1302_v26 = vmul.f32 %v7770_v48, %v1266_v58  ;;  %v3419_v0 = vadd.f32 %v3387_v44, %v3319_v2  ;;  %v3089_v23 = vmul.f32 %v4923_v35, %v5413_v17  ;;  %v5432_v54 = vld [vmem:[#allocation2 + $0x110] sm:$0xff] }
 0x16e   : > { %7803 = vst [vmem:[#allocation13_spill] sm:$0xff] %v5425_v31  ;;  %v2318_v62 = vadd.f32 %v2286_v27, %v2218_v8  ;;  %v2386_v32 = vmul.f32 %v7804_v3, %v7733_v4  ;;  %7805 = vst [vmem:[#allocation11_spill] sm:$0xff] %v5432_v54  ;;  %v3189_v9 = vmul.f32 %v4927_v36, %v5419_v59  ;;  %v5436_v45 = vld [vmem:[#allocation2 + $0x9c] sm:$0xff]  ;;  %v5457_v55 = vld [vmem:[#allocation2 + $0x90] sm:$0xff] }
 0x16f   : > { %v2820_v34 = vadd.f32 %v2788_v56, %v2720_v61  ;;  %7806 = vst [vmem:[#allocation30_spill] sm:$0xff] %v5436_v45  ;;  %v1334_v7 = vadd.f32 %v1302_v26, %v1234_v22  ;;  %v1402_v49 = vmul.f32 %v7774_v40, %v1366_v57  ;;  %v5440_v44 = vadd.f32 %v5190_v14, %v3419_v0  ;;  %v7807_v8 = vld [vmem:[#allocation18_spill] sm:$0xff]  ;;  %v7809_v22 = vld [vmem:[#allocation8_spill] sm:$0xff] }
 0x170   : > { %v4208_v58 = vpop.eup %4207  ;;  %v3289_v16 = vmul.f32 %v4939_v24, %v5425_v31  ;;  %v2418_v2 = vadd.f32 %v2386_v32, %v2318_v62  ;;  %v2487_v27 = vmul.f32 %v7807_v8, %v7734_v47  ;;  %v5446_v56 = vld [vmem:[#allocation2 + $0x111] sm:$0xff]  ;;  %v1503_v26 = vmul.f32 %v7809_v22, %v5432_v54  ;;  %v7810_v31 = vld [vmem:[#allocation16_spill] sm:$0xff]  ;;  %7812 = vst [vmem:[#allocation32_spill] sm:$0xff] %v5457_v55 }
 0x171   : > { %7808 = vst [vmem:[#allocation48_spill] sm:$0xff] %v5446_v56  ;;  %v3585_v61 = vadd.f32 1.0, %v4208_v58  ;;  %v2920_v3 = vadd.f32 %v2888_v60, %v2820_v34  ;;  %v1434_v59 = vadd.f32 %v1402_v49, %v1334_v7  ;;  %v3490_v57 = vsub.f32 0.0, %v5440_v44  ;;  %v5455_v32 = vld [vmem:[#allocation2 + $0x112] sm:$0xff] }
 0x172   : > { %v3389_v0 = vmul.f32 %v5178_v30, %v5436_v45  ;;  %v2519_v17 = vadd.f32 %v2487_v27, %v2418_v2  ;;  %v2587_v62 = vmul.f32 %v7810_v31, %v7735_v19  ;;  %7811 = vst [vmem:[#allocation31_spill] sm:$0xff] %v5455_v32  ;;  %v7813_v7 = vld [vmem:[#allocation9_spill] sm:$0xff]  ;;  %v7815_v45 = vld [vmem:[#allocation20_spill] sm:$0xff] }
 0x173   : > { %4209 = vrcp.f32 %v3585_v61  ;;  %v3021_v8 = vadd.f32 %v2989_v38, %v2920_v3  ;;  %v1535_v60 = vadd.f32 %v1503_v26, %v1434_v59  ;;  %v1603_v34 = vmul.f32 %v7813_v7, %v5446_v56  ;;  %v5461_v49 = vld [vmem:[#allocation2 + $0x113] sm:$0xff] }
 0x174   : > { %7814 = vst [vmem:[#allocation33_spill] sm:$0xff] %v5461_v49  ;;  %v3525_v58 = vmul.f32 1.442695, %v3490_v57  ;;  %v2619_v54 = vadd.f32 %v2587_v62, %v2519_v17  ;;  %v2687_v2 = vmul.f32 %v7815_v45, %v7736_v28  ;;  %v7816_v27 = vld [vmem:[#allocation21_spill] sm:$0xff]  ;;  %v2887_v38 = vmul.f32 %v5320_v39, %v7738_v21 }
 0x175   : > { %v2787_v31 = vmul.f32 %v7816_v27, %v7737_v50  ;;  %v3121_v61 = vadd.f32 %v3089_v23, %v3021_v8  ;;  %v5469_v59 = vld [vmem:[#allocation2 + $0x91] sm:$0xff]  ;;  %v1635_v26 = vadd.f32 %v1603_v34, %v1535_v60  ;;  %v1703_v17 = vmul.f32 %v7752_v29, %v5455_v32  ;;  %v5485_v34 = vld [vmem:[#allocation2 + $0x128] sm:$0xff] }
 0x176   : > { %7817 = vst [vmem:[#allocation36_spill] sm:$0xff] %v5469_v59  ;;  %v5471_v3 = vld [vmem:[#allocation2 + $0x92] sm:$0xff]  ;;  %4211 = vpow2.f32 %v3525_v58  ;;  %v2719_v62 = vadd.f32 %v2687_v2, %v2619_v54  ;;  %v2988_v27 = vmul.f32 %v7739_v41, %v5457_v55  ;;  %v1803_v23 = vmul.f32 %v7753_v15, %v5461_v49  ;;  %7822 = vst [vmem:[#allocation51_spill] sm:$0xff] %v5485_v34 }
 0x177   : > { %7818 = vst [vmem:[#allocation49_spill] sm:$0xff] %v5471_v3  ;;  %v5475_v57 = vld [vmem:[#allocation2 + $0x114] sm:$0xff]  ;;  %v3221_v39 = vadd.f32 %v3189_v9, %v3121_v61  ;;  %v1735_v60 = vadd.f32 %v1703_v17, %v1635_v26  ;;  %v1001_v32 = vmul.f32 %v7786_v46, %v965_v11  ;;  %v1101_v58 = vmul.f32 %v7787_v42, %v1065_v63  ;;  %v5495_v26 = vld [vmem:[#allocation2 + $0x129] sm:$0xff]  ;;  %v5510_v42 = vld [vmem:[#allocation2 + $0x140] sm:$0xff] }
 0x178   : > { %7819 = vst [vmem:[#allocation37_spill] sm:$0xff] %v5475_v57  ;;  %v1165_v8 = vld [vmem:[#allocation2 + $0xf2] sm:$0xff]  ;;  %v2819_v54 = vadd.f32 %v2787_v31, %v2719_v62  ;;  %v3088_v2 = vmul.f32 %v4923_v35, %v5469_v59  ;;  %v3188_v55 = vmul.f32 %v4927_v36, %v5471_v3  ;;  %v1903_v9 = vmul.f32 %v7754_v53, %v5475_v57  ;;  %v5497_v17 = vld [vmem:[#allocation2 + $0x12a] sm:$0xff] }
 0x179   : > { %v5481_v45 = vld [vmem:[#allocation2 + $0x93] sm:$0xff]  ;;  %v3321_v49 = vadd.f32 %v3289_v16, %v3221_v39  ;;  %v1835_v12 = vadd.f32 %v1803_v23, %v1735_v60  ;;  %7823 = vst [vmem:[#allocation40_spill] sm:$0xff] %v5495_v26  ;;  %7824 = vst [vmem:[#allocation35_spill] sm:$0xff] %v5497_v17  ;;  %v5499_v11 = vld [vmem:[#allocation2 + $0x12b] sm:$0xff]  ;;  %v1133_v63 = vadd.f32 %v1101_v58, %v1001_v32 }
 0x17a   : > { %7820 = vst [vmem:[#allocation38_spill] sm:$0xff] %v5481_v45  ;;  %v5483_v56 = vld [vmem:[#allocation2 + $0x94] sm:$0xff]  ;;  %7825 = vst [vmem:[#allocation6_spill] sm:$0xff] %v5499_v11  ;;  %v1201_v31 = vmul.f32 %v7790_v13, %v1165_v8  ;;  %v2919_v62 = vadd.f32 %v2887_v38, %v2819_v54  ;;  %v3288_v59 = vmul.f32 %v4939_v24, %v5481_v45  ;;  %v5508_v57 = vld [vmem:[#allocation2 + $0x12c] sm:$0xff] }
 0x17b   : > { %7821 = vst [vmem:[#allocation34_spill] sm:$0xff] %v5483_v56  ;;  %v1265_v61 = vld [vmem:[#allocation2 + $0xf3] sm:$0xff]  ;;  %v3388_v3 = vmul.f32 %v5178_v30, %v5483_v56  ;;  %v2003_v39 = vmul.f32 %v4700_v6, %v5485_v34  ;;  %v3421_v23 = vadd.f32 %v3389_v0, %v3321_v49  ;;  %v1935_v60 = vadd.f32 %v1903_v9, %v1835_v12  ;;  %v5519_v45 = vld [vmem:[#allocation2 + $0x108] sm:$0xff] }
 0x17c   : > { %v1365_v16 = vld [vmem:[#allocation2 + $0xf4] sm:$0xff]  ;;  %7826 = vst [vmem:[#allocation39_spill] sm:$0xff] %v5508_v57  ;;  %7827 = vst [vmem:[#allocation50_spill] sm:$0xff] %v5510_v42  ;;  %v1233_v32 = vadd.f32 %v1201_v31, %v1133_v63  ;;  %v1301_v8 = vmul.f32 %v7770_v48, %v1265_v61  ;;  %v3020_v38 = vadd.f32 %v2988_v27, %v2919_v62  ;;  %v5524_v9 = vld [vmem:[#allocation2 + $0x141] sm:$0xff] }
 0x17d   : > { %v2103_v58 = vmul.f32 %v4704_v33, %v5495_v26  ;;  %v2203_v54 = vmul.f32 %v4679_v25, %v5497_v17  ;;  %v2303_v56 = vmul.f32 %v7732_v52, %v5499_v11  ;;  %7828 = vst [vmem:[#allocation55_spill] sm:$0xff] %v5519_v45  ;;  %v4210_v12 = vpop.eup %4209  ;;  %v5522_v0 = vadd.f32 %v5190_v14, %v3421_v23  ;;  %v5526_v61 = vld [vmem:[#allocation2 + $0x142] sm:$0xff] }
 0x17e   : > { %v2035_v49 = vadd.f32 %v2003_v39, %v1935_v60  ;;  %7829 = vst [vmem:[#allocation41_spill] sm:$0xff] %v5524_v9  ;;  %7830 = vst [vmem:[#allocation42_spill] sm:$0xff] %v5526_v61  ;;  %v1333_v27 = vadd.f32 %v1301_v8, %v1233_v32  ;;  %v1401_v63 = vmul.f32 %v7774_v40, %v1365_v16  ;;  %v5529_v31 = vld [vmem:[#allocation2 + $0x109] sm:$0xff]  ;;  %v5541_v32 = vld [vmem:[#allocation2 + $0x158] sm:$0xff] }
 0x17f   : > { %v3681_v62 = vmul.f32 %v4210_v12, %v5353_v37  ;;  %v3120_v17 = vadd.f32 %v3088_v2, %v3020_v38  ;;  %v2403_v11 = vmul.f32 %v7733_v4, %v5508_v57  ;;  %v2504_v23 = vmul.f32 %v7734_v47, %v5510_v42  ;;  %v5537_v26 = vld [vmem:[#allocation2 + $0x143] sm:$0xff]  ;;  %7833 = vst [vmem:[#allocation3_spill] sm:$0xff] %v5541_v32  ;;  %v5554_v57 = vld [vmem:[#allocation2 + $0x159] sm:$0xff] }
 0x180   : > { %v3492_v39 = vsub.f32 0.0, %v5522_v0  ;;  %v2135_v60 = vadd.f32 %v2103_v58, %v2035_v49  ;;  %7831 = vst [vmem:[#allocation44_spill] sm:$0xff] %v5537_v26  ;;  %v5539_v34 = vld [vmem:[#allocation2 + $0x144] sm:$0xff]  ;;  %v1433_v16 = vadd.f32 %v1401_v63, %v1333_v27  ;;  %v1502_v37 = vmul.f32 %v7809_v22, %v5519_v45  ;;  %v4212_v2 = vpop.eup %4211  ;;  %7835 = vst [vmem:[#allocation15_spill] sm:$0xff] %v5554_v57 }
 0x181   : > { %7832 = vst [vmem:[#allocation45_spill] sm:$0xff] %v5539_v34  ;;  %3747 = vrot.lane.b32.xlu1 %v3681_v62, %s4344_s16  ;;  %v3220_v8 = vadd.f32 %v3188_v55, %v3120_v17  ;;  %v2604_v38 = vmul.f32 %v7735_v19, %v5524_v9  ;;  %v2704_v58 = vmul.f32 %v7736_v28, %v5526_v61  ;;  %v5552_v49 = vld [vmem:[#allocation2 + $0x10a] sm:$0xff]  ;;  %v3586_v42 = vadd.f32 1.0, %v4212_v2  ;;  %v5588_v9 = vld [vmem:[#allocation2 + $0x121] sm:$0xff] }
 0x182   : > { %v1602_v12 = vmul.f32 %v7813_v7, %v5529_v31  ;;  %7834 = vst [vmem:[#allocation46_spill] sm:$0xff] %v5552_v49  ;;  %v3529_v27 = vmul.f32 1.442695, %v3492_v39  ;;  %v2235_v63 = vadd.f32 %v2203_v54, %v2135_v60  ;;  %v1534_v45 = vadd.f32 %v1502_v37, %v1433_v16  ;;  %v5566_v61 = vld [vmem:[#allocation2 + $0x10b] sm:$0xff]  ;;  %v5568_v54 = vld [vmem:[#allocation2 + $0x15a] sm:$0xff] }
 0x183   : > { %v3320_v40 = vadd.f32 %v3288_v59, %v3220_v8  ;;  %v2804_v55 = vmul.f32 %v7737_v50, %v5537_v26  ;;  %v5560_v17 = vmul.f32 %v7738_v21, %v5539_v34  ;;  %v5564_v62 = vmul.f32 %v7739_v41, %v5541_v32  ;;  %7836 = vst [vmem:[#allocation5_spill] sm:$0xff] %v5566_v61  ;;  %v5570_v60 = vld [vmem:[#allocation2 + $0x15b] sm:$0xff]  ;;  %v5574_v37 = vld [vmem:[#allocation2 + $0x10c] sm:$0xff] }
 0x184   : > { %4213 = vrcp.f32 %v3586_v42  ;;  %v2335_v39 = vadd.f32 %v2303_v56, %v2235_v63  ;;  %7837 = vst [vmem:[#allocation52_spill] sm:$0xff] %v5568_v54  ;;  %7838 = vst [vmem:[#allocation14_spill] sm:$0xff] %v5570_v60  ;;  %v1634_v59 = vadd.f32 %v1602_v12, %v1534_v45  ;;  %v1702_v16 = vmul.f32 %v7752_v29, %v5552_v49  ;;  %v7840_v32 = vld [vmem:[#allocation53_spill] sm:$0xff]  ;;  %v7841_v34 = vld [vmem:[#allocation19_spill] sm:$0xff] }
 0x185   : > { %7839 = vst [vmem:[#allocation17_spill] sm:$0xff] %v5574_v37  ;;  %4215 = vpow2.f32 %v3529_v27  ;;  %v3420_v2 = vadd.f32 %v3388_v3, %v3320_v40  ;;  %v5578_v8 = vmul.f32 %v4923_v35, %v5554_v57  ;;  %v1420_v42 = vadd.f32 %v7841_v34, %v7840_v32  ;;  %v5582_v63 = vld [vmem:[#allocation2 + $0x15c] sm:$0xff]  ;;  %7844 = vst [vmem:[#allocation53_spill] sm:$0xff] %v5588_v9 }
 0x186   : > { %v2435_v56 = vadd.f32 %v2403_v11, %v2335_v39  ;;  %7842 = vst [vmem:[#allocation8_spill] sm:$0xff] %v5582_v63  ;;  %v1734_v26 = vadd.f32 %v1702_v16, %v1634_v59  ;;  %v1802_v45 = vmul.f32 %v7753_v15, %v5566_v61  ;;  %v5586_v12 = vld [vmem:[#allocation2 + $0x120] sm:$0xff]  ;;  %v1489_v40 = vmul.f32 %v7789_v51, %v7809_v22 }
 0x187   : > { %7843 = vst [vmem:[#allocation9_spill] sm:$0xff] %v5586_v12  ;;  %v5593_v3 = vadd.f32 %v5190_v14, %v3420_v2  ;;  %v5597_v34 = vmul.f32 %v4927_v36, %v5568_v54  ;;  %v5601_v11 = vmul.f32 %v4939_v24, %v5570_v60  ;;  %v1902_v32 = vmul.f32 %v7754_v53, %v5574_v37  ;;  %v5605_v59 = vld [vmem:[#allocation2 + $0x122] sm:$0xff]  ;;  %v5622_v37 = vld [vmem:[#allocation2 + $0x138] sm:$0xff] }
 0x188   : > { %v2536_v27 = vadd.f32 %v2504_v23, %v2435_v56  ;;  %v1834_v39 = vadd.f32 %v1802_v45, %v1734_v26  ;;  %v5607_v16 = vld [vmem:[#allocation2 + $0x123] sm:$0xff]  ;;  %v1521_v2 = vadd.f32 %v1489_v40, %v1420_v42  ;;  %v1589_v54 = vmul.f32 %v5171_v1, %v7813_v7  ;;  %7846 = vst [vmem:[#allocation56_spill] sm:$0xff] %v5622_v37  ;;  %v5624_v42 = vld [vmem:[#allocation2 + $0x139] sm:$0xff] }
 0x189   : > { %v5609_v51 = vld [vmem:[#allocation2 + $0x124] sm:$0xff]  ;;  %v3491_v57 = vsub.f32 0.0, %v5593_v3  ;;  %v5616_v60 = vmul.f32 %v5178_v30, %v5582_v63  ;;  %v2002_v23 = vmul.f32 %v4700_v6, %v5586_v12  ;;  %v2102_v26 = vmul.f32 %v4704_v33, %v5588_v9  ;;  %7847 = vst [vmem:[#allocation57_spill] sm:$0xff] %v5624_v42  ;;  %v5626_v40 = vld [vmem:[#allocation2 + $0x13a] sm:$0xff] }
 0x18a   : > { %7845 = vst [vmem:[#allocation19_spill] sm:$0xff] %v5609_v51  ;;  %v2636_v56 = vadd.f32 %v2604_v38, %v2536_v27  ;;  %v1934_v45 = vadd.f32 %v1902_v32, %v1834_v39  ;;  %7848 = vst [vmem:[#allocation58_spill] sm:$0xff] %v5626_v40  ;;  %v1621_v1 = vadd.f32 %v1589_v54, %v1521_v2  ;;  %v5636_v39 = vld [vmem:[#allocation2 + $0x13b] sm:$0xff] }
 0x18b   : > { %v1689_v61 = vmul.f32 %v5180_v43, %v7752_v29  ;;  %v3527_v63 = vmul.f32 1.442695, %v3491_v57  ;;  %v2202_v49 = vmul.f32 %v4679_v25, %v5605_v59  ;;  %v2302_v12 = vmul.f32 %v7732_v52, %v5607_v16  ;;  %v5640_v2 = vld [vmem:[#allocation2 + $0x60] sm:$0xff] }
 0x18c   : > { %v2402_v38 = vmul.f32 %v7733_v4, %v5609_v51  ;;  %v2736_v32 = vadd.f32 %v2704_v58, %v2636_v56  ;;  %v2034_v27 = vadd.f32 %v2002_v23, %v1934_v45  ;;  %v1789_v54 = vmul.f32 %v5192_v5, %v7753_v15  ;;  %7849 = vst [vmem:[#allocation59_spill] sm:$0xff] %v5640_v2 }
 0x18d   : > { %v1721_v9 = vadd.f32 %v1689_v61, %v1621_v1  ;;  %4217 = vpow2.f32 %v3527_v63  ;;  %v2503_v43 = vmul.f32 %v7734_v47, %v5622_v37  ;;  %v2603_v57 = vmul.f32 %v7735_v19, %v5624_v42  ;;  %v5650_v61 = vld [vmem:[#allocation2 + $0x13c] sm:$0xff] }
 0x18e   : > { %v5648_v51 = vmul.f32 %v7736_v28, %v5626_v40  ;;  %v4214_v58 = vpop.eup %4213  ;;  %v2836_v23 = vadd.f32 %v2804_v55, %v2736_v32  ;;  %v2134_v56 = vadd.f32 %v2102_v26, %v2034_v27  ;;  %7850 = vst [vmem:[#allocation60_spill] sm:$0xff] %v5650_v61  ;;  %v1889_v5 = vmul.f32 %v5202_v18, %v7754_v53  ;;  %v5654_v63 = vld [vmem:[#allocation2 + $0x61] sm:$0xff]  ;;  %v5666_v18 = vld [vmem:[#allocation2 + $0x150] sm:$0xff] }
 0x18f   : > { %v1821_v45 = vadd.f32 %v1789_v54, %v1721_v9  ;;  %v4216_v1 = vpop.eup %4215  ;;  %v3682_v37 = vmul.f32 %v4214_v58, %v5440_v44  ;;  %v5659_v42 = vmul.f32 %v7737_v50, %v5636_v39  ;;  %v1989_v40 = vmul.f32 %v5357_v20, %v4700_v6  ;;  %7851 = vst [vmem:[#allocation61_spill] sm:$0xff] %v5666_v18  ;;  %v5668_v27 = vld [vmem:[#allocation2 + $0x151] sm:$0xff]  ;;  %v5670_v44 = vld [vmem:[#allocation2 + $0x62] sm:$0xff] }
 0x190   : > { %v1488_v55 = vmul.f32 %v7809_v22, %v5640_v2  ;;  %v3588_v26 = vadd.f32 1.0, %v4216_v1  ;;  %v2936_v9 = vadd.f32 %v5560_v17, %v2836_v23  ;;  %v2234_v32 = vadd.f32 %v2202_v49, %v2134_v56  ;;  %7852 = vst [vmem:[#allocation62_spill] sm:$0xff] %v5668_v27  ;;  %7853 = vst [vmem:[#allocation63_spill] sm:$0xff] %v5670_v44  ;;  %v7854_v2 = vld [vmem:[#allocation54_spill] sm:$0xff] }
 0x191   : > { %v1921_v54 = vadd.f32 %v1889_v5, %v1821_v45  ;;  %3749 = vrot.lane.b32.xlu1 %v3682_v37, %s4344_s16  ;;  %v2903_v58 = vmul.f32 %v7738_v21, %v5650_v61  ;;  %v2089_v20 = vmul.f32 %v5366_v10, %v4704_v33  ;;  %v1588_v49 = vmul.f32 %v7813_v7, %v5654_v63  ;;  %v5681_v56 = vld [vmem:[#allocation2 + $0x152] sm:$0xff]  ;;  %v5685_v5 = vld [vmem:[#allocation2 + $0x63] sm:$0xff] }
 0x192   : > { %v1520_v1 = vadd.f32 %v1488_v55, %v7854_v2  ;;  %4219 = vrcp.f32 %v3588_v26  ;;  %v3037_v17 = vadd.f32 %v5564_v62, %v2936_v9  ;;  %v2334_v23 = vadd.f32 %v2302_v12, %v2234_v32  ;;  %7855 = vst [vmem:[#allocation54_spill] sm:$0xff] %v5681_v56  ;;  %v5683_v45 = vld [vmem:[#allocation2 + $0x153] sm:$0xff]  ;;  %7857 = vst [vmem:[#allocation65_spill] sm:$0xff] %v5685_v5 }
 0x193   : > { %7856 = vst [vmem:[#allocation64_spill] sm:$0xff] %v5683_v45  ;;  %v2021_v37 = vadd.f32 %v1989_v40, %v1921_v54  ;;  %v3004_v61 = vmul.f32 %v7739_v41, %v5666_v18  ;;  %v5691_v10 = vmul.f32 %v4923_v35, %v5668_v27  ;;  %v1688_v55 = vmul.f32 %v7752_v29, %v5670_v44  ;;  %v5696_v26 = vld [vmem:[#allocation2 + $0x154] sm:$0xff]  ;;  %v7859_v40 = vld [vmem:[#allocation27_spill] sm:$0xff] }
 0x194   : > { %v1620_v2 = vadd.f32 %v1588_v49, %v1520_v1  ;;  %v3137_v62 = vadd.f32 %v5578_v8, %v3037_v17  ;;  %v2434_v12 = vadd.f32 %v2402_v38, %v2334_v23  ;;  %7858 = vst [vmem:[#allocation66_spill] sm:$0xff] %v5696_v26  ;;  %v2189_v32 = vmul.f32 %v7859_v40, %v4679_v25  ;;  %v5700_v54 = vld [vmem:[#allocation2 + $0x64] sm:$0xff]  ;;  %v7861_v27 = vld [vmem:[#allocation29_spill] sm:$0xff] }
 0x195   : > { %v2121_v9 = vadd.f32 %v2089_v20, %v2021_v37  ;;  %v5704_v18 = vmul.f32 %v4927_v36, %v5681_v56  ;;  %v5708_v1 = vmul.f32 %v4939_v24, %v5683_v45  ;;  %v1788_v8 = vmul.f32 %v7753_v15, %v5685_v5  ;;  %v7860_v23 = vld [vmem:[#allocation28_spill] sm:$0xff] }
 0x196   : > { %v1720_v49 = vadd.f32 %v1688_v55, %v1620_v2  ;;  %v3237_v38 = vadd.f32 %v5597_v34, %v3137_v62  ;;  %v2535_v20 = vadd.f32 %v2503_v43, %v2434_v12  ;;  %v2289_v37 = vmul.f32 %v7860_v23, %v7732_v52  ;;  %v7862_v12 = vld [vmem:[#allocation47_spill] sm:$0xff] }
 0x197   : > { %v2221_v17 = vadd.f32 %v2189_v32, %v2121_v9  ;;  %v4218_v40 = vpop.eup %4217  ;;  %v5717_v56 = vmul.f32 %v5178_v30, %v5696_v26  ;;  %v2389_v45 = vmul.f32 %v7861_v27, %v7733_v4  ;;  %v1888_v2 = vmul.f32 %v7754_v53, %v5700_v54  ;;  %v7863_v32 = vld [vmem:[#allocation10_spill] sm:$0xff] }
 0x198   : > { %v1820_v44 = vadd.f32 %v1788_v8, %v1720_v49  ;;  %v3587_v55 = vadd.f32 1.0, %v4218_v40  ;;  %v3337_v34 = vadd.f32 %v5601_v11, %v3237_v38  ;;  %v2635_v43 = vadd.f32 %v2603_v57, %v2535_v20  ;;  %v7864_v26 = vld [vmem:[#allocation18_spill] sm:$0xff]  ;;  %v7865_v11 = vld [vmem:[#allocation12_spill] sm:$0xff] }
 0x199   : > { %v2321_v62 = vadd.f32 %v2289_v37, %v2221_v17  ;;  %v2490_v9 = vmul.f32 %v7862_v12, %v7734_v47  ;;  %v2590_v23 = vmul.f32 %v7863_v32, %v7735_v19  ;;  %v1988_v5 = vmul.f32 %v7864_v26, %v4700_v6  ;;  %v7866_v20 = vld [vmem:[#allocation16_spill] sm:$0xff]  ;;  %v7867_v37 = vld [vmem:[#allocation11_spill] sm:$0xff] }
 0x19a   : > { %v1920_v30 = vadd.f32 %v1888_v2, %v1820_v44  ;;  %4221 = vrcp.f32 %v3587_v55  ;;  %v3437_v27 = vadd.f32 %v5616_v60, %v3337_v34  ;;  %v2735_v49 = vadd.f32 %v5648_v51, %v2635_v43  ;;  %v7868_v55 = vld [vmem:[#allocation4_spill] sm:$0xff]  ;;  %v7871_v12 = vld [vmem:[#allocation31_spill] sm:$0xff] }
 0x19b   : > { %v2421_v8 = vadd.f32 %v2389_v45, %v2321_v62  ;;  %v2690_v57 = vmul.f32 %v7865_v11, %v7736_v28  ;;  %v2088_v17 = vmul.f32 %v7866_v20, %v4704_v33  ;;  %v1004_v40 = vmul.f32 %v7867_v37, %v7786_v46  ;;  %v7869_v51 = vld [vmem:[#allocation48_spill] sm:$0xff] }
 0x19c   : > { %v2020_v38 = vadd.f32 %v1988_v5, %v1920_v30  ;;  %v4220_v44 = vpop.eup %4219  ;;  %v5739_v2 = vadd.f32 %v5190_v14, %v3437_v27  ;;  %v2835_v26 = vadd.f32 %v5659_v42, %v2735_v49  ;;  %v1104_v45 = vmul.f32 %v7869_v51, %v7868_v55  ;;  %v7870_v5 = vld [vmem:[#allocation20_spill] sm:$0xff]  ;;  %v7872_v42 = vld [vmem:[#allocation13_spill] sm:$0xff] }
 0x19d   : > { %v2522_v60 = vadd.f32 %v2490_v9, %v2421_v8  ;;  %v3684_v34 = vmul.f32 %v4220_v44, %v5522_v0  ;;  %v2188_v62 = vmul.f32 %v7870_v5, %v4679_v25  ;;  %v1204_v32 = vmul.f32 %v7871_v12, %v7790_v13  ;;  %v7873_v0 = vld [vmem:[#allocation21_spill] sm:$0xff] }
 0x19e   : > { %v2120_v43 = vadd.f32 %v2088_v17, %v2020_v38  ;;  %v3508_v30 = vsub.f32 0.0, %v5739_v2  ;;  %v2935_v11 = vadd.f32 %v2903_v58, %v2835_v26  ;;  %v1136_v27 = vadd.f32 %v1104_v45, %v1004_v40  ;;  %v7874_v38 = vld [vmem:[#allocation33_spill] sm:$0xff]  ;;  %v7875_v40 = vld [vmem:[#allocation30_spill] sm:$0xff] }
 0x19f   : > { %v2622_v14 = vadd.f32 %v2590_v23, %v2522_v60  ;;  %3753 = vrot.lane.b32.xlu1 %v3684_v34, %s4344_s16  ;;  %v2790_v9 = vmul.f32 %v7872_v42, %v7737_v50  ;;  %v2288_v8 = vmul.f32 %v7873_v0, %v7732_v52  ;;  %v1304_v20 = vmul.f32 %v7874_v38, %v7770_v48  ;;  %v5757_v51 = vld [vmem:[#allocation2 + $0xb0] sm:$0xff]  ;;  %v7876_v45 = vld [vmem:[#allocation22_spill] sm:$0xff] }
 0x1a0   : > { %v2220_v49 = vadd.f32 %v2188_v62, %v2120_v43  ;;  %v3561_v17 = vmul.f32 1.442695, %v3508_v30  ;;  %v3036_v37 = vadd.f32 %v3004_v61, %v2935_v11  ;;  %v5759_v58 = vld [vmem:[#allocation2 + $0xb1] sm:$0xff]  ;;  %v1236_v23 = vadd.f32 %v1204_v32, %v1136_v27  ;;  %v7877_v43 = vld [vmem:[#allocation7_spill] sm:$0xff]  ;;  %v7880_v27 = vld [vmem:[#allocation32_spill] sm:$0xff] }
 0x1a1   : > { %v2722_v44 = vadd.f32 %v2690_v57, %v2622_v14  ;;  %v2890_v26 = vmul.f32 %v7875_v40, %v7738_v21  ;;  %v2388_v34 = vmul.f32 %v7876_v45, %v7733_v4  ;;  %v7878_v5 = vld [vmem:[#allocation37_spill] sm:$0xff]  ;;  %v2991_v32 = vmul.f32 %v7739_v41, %v5757_v51  ;;  %v7884_v40 = vld [vmem:[#allocation36_spill] sm:$0xff] }
 0x1a2   : > { %v2320_v60 = vadd.f32 %v2288_v8, %v2220_v49  ;;  %v1404_v62 = vmul.f32 %v7878_v5, %v7877_v43  ;;  %4223 = vpow2.f32 %v3561_v17  ;;  %v3136_v12 = vadd.f32 %v5691_v10, %v3036_v37  ;;  %v5768_v57 = vld [vmem:[#allocation2 + $0xb2] sm:$0xff]  ;;  %v5789_v45 = vld [vmem:[#allocation2 + $0xa8] sm:$0xff] }
 0x1a3   : > { %v2822_v61 = vadd.f32 %v2790_v9, %v2722_v44  ;;  %7879 = vst [vmem:[#allocation27_spill] sm:$0xff] %v5768_v57  ;;  %v1336_v30 = vadd.f32 %v1304_v20, %v1236_v23  ;;  %v3091_v11 = vmul.f32 %v4923_v35, %v5759_v58  ;;  %v2489_v42 = vmul.f32 %v7880_v27, %v7734_v47  ;;  %v5777_v38 = vld [vmem:[#allocation2 + $0xb3] sm:$0xff]  ;;  %v7883_v20 = vld [vmem:[#allocation51_spill] sm:$0xff]  ;;  %v7886_v5 = vld [vmem:[#allocation40_spill] sm:$0xff] }
 0x1a4   : > { %v2420_v14 = vadd.f32 %v2388_v34, %v2320_v60  ;;  %v4222_v49 = vpop.eup %4221  ;;  %v3236_v0 = vadd.f32 %v5704_v18, %v3136_v12  ;;  %7881 = vst [vmem:[#allocation28_spill] sm:$0xff] %v5777_v38  ;;  %v5779_v10 = vld [vmem:[#allocation2 + $0xb4] sm:$0xff]  ;;  %v1505_v17 = vmul.f32 %v7883_v20, %v7809_v22  ;;  %v3191_v44 = vmul.f32 %v4927_v36, %v5768_v57  ;;  %v1476_v57 = vld [vmem:[#allocation2 + $0x180] sm:$0xff] }
 0x1a5   : > { %v2922_v8 = vadd.f32 %v2890_v26, %v2822_v61  ;;  %7882 = vst [vmem:[#allocation29_spill] sm:$0xff] %v5779_v10  ;;  %v1436_v9 = vadd.f32 %v1404_v62, %v1336_v30  ;;  %v3683_v37 = vmul.f32 %v4222_v49, %v5593_v3  ;;  %v2589_v60 = vmul.f32 %v7884_v40, %v7735_v19  ;;  %v5799_v12 = vld [vmem:[%s7401_s3 + $0x18] ss:$0 sm:$0xff]  ;;  %v7887_v30 = vld [vmem:[#allocation49_spill] sm:$0xff] }
 0x1a6   : > { %v2521_v23 = vadd.f32 %v2489_v42, %v2420_v14  ;;  %v3336_v18 = vadd.f32 %v5708_v1, %v3236_v0  ;;  %7885 = vst [vmem:[#allocation47_spill] sm:$0xff] %v5789_v45  ;;  %v1605_v62 = vmul.f32 %v7886_v5, %v7813_v7  ;;  %v3291_v3 = vmul.f32 %v4939_v24, %v5777_v38  ;;  %v5806_v42 = vld [vmem:[#allocation2 + $0xa9] sm:$0xff]  ;;  %v7889_v0 = vld [vmem:[#allocation35_spill] sm:$0xff]  ;;  %v7890_v20 = vld [vmem:[#allocation38_spill] sm:$0xff] }
 0x1a7   : > { %v3023_v26 = vadd.f32 %v2991_v32, %v2922_v8  ;;  %v1537_v34 = vadd.f32 %v1505_v17, %v1436_v9  ;;  %3751 = vrot.lane.b32.xlu0 %v3683_v37, %s4344_s16  ;;  %v3391_v1 = vmul.f32 %v5799_v12, %v5779_v10  ;;  %v2689_v32 = vmul.f32 %v7887_v30, %v7736_v28  ;;  %v7891_v37 = vld [vmem:[#allocation34_spill] sm:$0xff] }
 0x1a8   : > { %v2621_v61 = vadd.f32 %v2589_v60, %v2521_v23  ;;  %v3436_v14 = vadd.f32 %v5717_v56, %v3336_v18  ;;  %7888 = vst [vmem:[#allocation10_spill] sm:$0xff] %v5806_v42  ;;  %v1705_v8 = vmul.f32 %v7889_v0, %v7752_v29  ;;  %v2789_v17 = vmul.f32 %v7890_v20, %v7737_v50  ;;  %v5819_v56 = vld [vmem:[%s7402_s4] ss:$0 sm:$0xff] }
 0x1a9   : > { %v3123_v27 = vadd.f32 %v3091_v11, %v3023_v26  ;;  %v1637_v49 = vadd.f32 %v1605_v62, %v1537_v34  ;;  %v2889_v40 = vmul.f32 %v7891_v37, %v7738_v21  ;;  %v2990_v23 = vmul.f32 %v7739_v41, %v5789_v45  ;;  %v7892_v26 = vld [vmem:[#allocation6_spill] sm:$0xff] }
 0x1aa   : > { %v2721_v9 = vadd.f32 %v2689_v32, %v2621_v61  ;;  %v5822_v11 = vadd.f32 %v5819_v56, %v3436_v14  ;;  %v1805_v34 = vmul.f32 %v7892_v26, %v7753_v15  ;;  %v3090_v62 = vmul.f32 %v4923_v35, %v5806_v42  ;;  %v7893_v61 = vld [vmem:[#allocation55_spill] sm:$0xff] }
 0x1ab   : > { %v3223_v60 = vadd.f32 %v3191_v44, %v3123_v27  ;;  %v1737_v18 = vadd.f32 %v1705_v8, %v1637_v49  ;;  %v1003_v30 = vmul.f32 %v7893_v61, %v7786_v46  ;;  %v1103_v32 = vmul.f32 %v5529_v31, %v7868_v55  ;;  %v7894_v44 = vld [vmem:[#allocation39_spill] sm:$0xff]  ;;  %v5837_v61 = vld [vmem:[#allocation2 + $0xaa] sm:$0xff]  ;;  %v7896_v31 = vld [vmem:[#allocation50_spill] sm:$0xff] }
 0x1ac   : > { %v2821_v5 = vadd.f32 %v2789_v17, %v2721_v9  ;;  %v4224_v0 = vpop.eup %4223  ;;  %v3507_v20 = vsub.f32 0.0, %v5822_v11  ;;  %v1905_v27 = vmul.f32 %v7894_v44, %v7754_v53  ;;  %v7895_v17 = vld [vmem:[#allocation46_spill] sm:$0xff]  ;;  %v2005_v38 = vmul.f32 %v7896_v31, %v4700_v6 }
 0x1ad   : > { %v3323_v14 = vadd.f32 %v3291_v3, %v3223_v60  ;;  %v1837_v37 = vadd.f32 %v1805_v34, %v1737_v18  ;;  %v3604_v49 = vadd.f32 1.0, %v4224_v0  ;;  %v1135_v9 = vadd.f32 %v1103_v32, %v1003_v30  ;;  %v7897_v18 = vld [vmem:[#allocation5_spill] sm:$0xff]  ;;  %v1477_v0 = vld [vmem:[#allocation2 + $0x188] sm:$0xff] }
 0x1ae   : > { %v2921_v8 = vadd.f32 %v2889_v40, %v2821_v5  ;;  %v1203_v26 = vmul.f32 %v7895_v17, %v7790_v13  ;;  %v3559_v42 = vmul.f32 1.442695, %v3507_v20  ;;  %v1303_v34 = vmul.f32 %v7897_v18, %v7770_v48  ;;  %v5846_v5 = vld [vmem:[#allocation2 + $0xab] sm:$0xff] }
 0x1af   : > { %v3423_v45 = vadd.f32 %v3391_v1, %v3323_v14  ;;  %v1937_v10 = vadd.f32 %v1905_v27, %v1837_v37  ;;  %4225 = vrcp.f32 %v3604_v49  ;;  %v7898_v30 = vld [vmem:[#allocation41_spill] sm:$0xff]  ;;  %v3190_v14 = vmul.f32 %v4927_v36, %v5837_v61 }
 0x1b0   : > { %v3022_v3 = vadd.f32 %v2990_v23, %v2921_v8  ;;  %v1235_v60 = vadd.f32 %v1203_v26, %v1135_v9  ;;  %4227 = vpow2.f32 %v3559_v42  ;;  %v2105_v32 = vmul.f32 %v7898_v30, %v4704_v33  ;;  %v7899_v37 = vld [vmem:[#allocation17_spill] sm:$0xff]  ;;  %v1576_v8 = vld [vmem:[#allocation2 + $0x181] sm:$0xff] }
 0x1b1   : > { %v5844_v40 = vadd.f32 %v5819_v56, %v3423_v45  ;;  %v2037_v1 = vadd.f32 %v2005_v38, %v1937_v10  ;;  %v1403_v44 = vmul.f32 %v7899_v37, %v7877_v43  ;;  %v5855_v42 = vmul.f32 %v7809_v22, %v1476_v57  ;;  %v5858_v27 = vld [vmem:[#allocation2 + $0xac] sm:$0xff]  ;;  %v7901_v10 = vld [vmem:[#allocation42_spill] sm:$0xff] }
 0x1b2   : > { %v3122_v20 = vadd.f32 %v3090_v62, %v3022_v3  ;;  %v1335_v23 = vadd.f32 %v1303_v34, %v1235_v60  ;;  %v2205_v49 = vmul.f32 %v7901_v10, %v4679_v25  ;;  %v3290_v9 = vmul.f32 %v4939_v24, %v5846_v5  ;;  %v7902_v26 = vld [vmem:[#allocation9_spill] sm:$0xff]  ;;  %v7904_v34 = vld [vmem:[#allocation44_spill] sm:$0xff] }
 0x1b3   : > { %7900 = vst [vmem:[#allocation18_spill] sm:$0xff] %v5855_v42  ;;  %v3494_v45 = vsub.f32 0.0, %v5844_v40  ;;  %v2137_v38 = vadd.f32 %v2105_v32, %v2037_v1  ;;  %v1504_v31 = vmul.f32 %v7902_v26, %v7809_v22  ;;  %v5867_v57 = vmul.f32 %v7809_v22, %v1477_v0  ;;  %v1577_v3 = vld [vmem:[#allocation2 + $0x189] sm:$0xff] }
 0x1b4   : > { %v3222_v62 = vadd.f32 %v3190_v14, %v3122_v20  ;;  %v1435_v17 = vadd.f32 %v1403_v44, %v1335_v23  ;;  %v2305_v1 = vmul.f32 %v7904_v34, %v7732_v52  ;;  %v3390_v32 = vmul.f32 %v5799_v12, %v5858_v27  ;;  %v7905_v14 = vld [vmem:[#allocation53_spill] sm:$0xff] }
 0x1b5   : > { %7903 = vst [vmem:[#allocation12_spill] sm:$0xff] %v5867_v57  ;;  %v3533_v60 = vmul.f32 1.442695, %v3494_v45  ;;  %v2237_v18 = vadd.f32 %v2205_v49, %v2137_v38  ;;  %v1604_v23 = vmul.f32 %v7905_v14, %v7813_v7  ;;  %v5876_v37 = vmul.f32 %v7813_v7, %v1576_v8  ;;  %v7907_v44 = vld [vmem:[#allocation45_spill] sm:$0xff]  ;;  %v954_v38 = vld [vmem:[#allocation2 + $0x68] sm:$0xff]  ;;  %v7909_v8 = vld [vmem:[#allocation3_spill] sm:$0xff] }
 0x1b6   : > { %v3322_v30 = vadd.f32 %v3290_v9, %v3222_v62  ;;  %v1536_v20 = vadd.f32 %v1504_v31, %v1435_v17  ;;  %v2405_v45 = vmul.f32 %v7907_v44, %v7733_v4  ;;  %v1054_v10 = vld [vmem:[#allocation2 + $0x69] sm:$0xff]  ;;  %v5881_v49 = vmul.f32 %v7813_v7, %v1577_v3  ;;  %v7914_v57 = vld [vmem:[#allocation26_spill] sm:$0xff] }
 0x1b7   : > { %7906 = vst [vmem:[#allocation16_spill] sm:$0xff] %v5876_v37  ;;  %4229 = vpow2.f32 %v3533_v60  ;;  %v2337_v0 = vadd.f32 %v2305_v1, %v2237_v18  ;;  %v1704_v17 = vmul.f32 %v5605_v59, %v7752_v29  ;;  %v1154_v26 = vld [vmem:[#allocation2 + $0x6a] sm:$0xff]  ;;  %v2506_v34 = vmul.f32 %v7909_v8, %v7734_v47  ;;  %v7910_v60 = vld [vmem:[#allocation15_spill] sm:$0xff] }
 0x1b8   : > { %7908 = vst [vmem:[#allocation11_spill] sm:$0xff] %v5881_v49  ;;  %v3422_v62 = vadd.f32 %v3390_v32, %v3322_v30  ;;  %v1636_v9 = vadd.f32 %v1604_v23, %v1536_v20  ;;  %v2606_v18 = vmul.f32 %v7910_v60, %v7735_v19  ;;  %v1804_v1 = vmul.f32 %v5607_v16, %v7753_v15  ;;  %v1254_v20 = vld [vmem:[#allocation2 + $0x6b] sm:$0xff] }
 0x1b9   : > { %v2437_v31 = vadd.f32 %v2405_v45, %v2337_v0  ;;  %v4226_v14 = vpop.eup %4225  ;;  %v990_v32 = vmul.f32 %v7786_v46, %v954_v38  ;;  %v1090_v59 = vmul.f32 %v7868_v55, %v1054_v10  ;;  %v7911_v45 = vld [vmem:[#allocation19_spill] sm:$0xff]  ;;  %v1190_v60 = vmul.f32 %v7790_v13, %v1154_v26  ;;  %v7912_v10 = vld [vmem:[#allocation52_spill] sm:$0xff] }
 0x1ba   : > { %v5892_v3 = vadd.f32 %v5819_v56, %v3422_v62  ;;  %v1736_v30 = vadd.f32 %v1704_v17, %v1636_v9  ;;  %v4228_v23 = vpop.eup %4227  ;;  %v3700_v0 = vmul.f32 %v4226_v14, %v5739_v2  ;;  %v1904_v8 = vmul.f32 %v7911_v45, %v7754_v53  ;;  %v7913_v17 = vld [vmem:[#allocation56_spill] sm:$0xff] }
 0x1bb   : > { %v2538_v44 = vadd.f32 %v2506_v34, %v2437_v31  ;;  %v3603_v16 = vadd.f32 1.0, %v4228_v23  ;;  %v1122_v37 = vadd.f32 %v1090_v59, %v990_v32  ;;  %v2706_v9 = vmul.f32 %v7912_v10, %v7736_v28  ;;  %v1354_v34 = vld [vmem:[#allocation2 + $0x6c] sm:$0xff]  ;;  %v1676_v14 = vld [vmem:[#allocation2 + $0x182] sm:$0xff] }
 0x1bc   : > { %v3493_v49 = vsub.f32 0.0, %v5892_v3  ;;  %v1836_v62 = vadd.f32 %v1804_v1, %v1736_v30  ;;  %3785 = vrot.lane.b32.xlu1 %v3700_v0, %s4344_s16  ;;  %v2004_v2 = vmul.f32 %v7913_v17, %v4700_v6  ;;  %v1290_v31 = vmul.f32 %v7770_v48, %v1254_v20  ;;  %v7915_v1 = vld [vmem:[#allocation23_spill] sm:$0xff]  ;;  %v7917_v0 = vld [vmem:[#allocation57_spill] sm:$0xff] }
 0x1bd   : > { %v2638_v38 = vadd.f32 %v2606_v18, %v2538_v44  ;;  %4231 = vrcp.f32 %v3603_v16  ;;  %v1222_v45 = vadd.f32 %v1190_v60, %v1122_v37  ;;  %v1343_v30 = vadd.f32 %v7915_v1, %v7914_v57  ;;  %v7916_v18 = vld [vmem:[#allocation14_spill] sm:$0xff]  ;;  %v5913_v10 = vld [vmem:[#allocation2 + $0x80] sm:$0xff]  ;;  %v5915_v20 = vld [vmem:[#allocation2 + $0x170] sm:$0xff] }
 0x1be   : > { %v3531_v26 = vmul.f32 1.442695, %v3493_v49  ;;  %v1936_v23 = vadd.f32 %v1904_v8, %v1836_v62  ;;  %v2806_v59 = vmul.f32 %v7916_v18, %v7737_v50  ;;  %v2104_v44 = vmul.f32 %v7917_v0, %v4704_v33  ;;  %v7919_v60 = vld [vmem:[#allocation8_spill] sm:$0xff]  ;;  %v5927_v18 = vld [vmem:[#allocation2 + $0x171] sm:$0xff] }
 0x1bf   : > { %v2738_v32 = vadd.f32 %v2706_v9, %v2638_v38  ;;  %v1322_v16 = vadd.f32 %v1290_v31, %v1222_v45  ;;  %v1390_v49 = vmul.f32 %v7877_v43, %v1354_v34  ;;  %v5919_v8 = vmul.f32 %v7752_v29, %v1676_v14  ;;  %v7920_v38 = vld [vmem:[#allocation58_spill] sm:$0xff]  ;;  %v5925_v1 = vld [vmem:[#allocation2 + $0x81] sm:$0xff]  ;;  %7922 = vst [vmem:[#allocation20_spill] sm:$0xff] %v5927_v18 }
 0x1c0   : > { %4233 = vpow2.f32 %v3531_v26  ;;  %v2036_v17 = vadd.f32 %v2004_v2, %v1936_v23  ;;  %v2906_v62 = vmul.f32 %v7919_v60, %v7738_v21  ;;  %v2204_v9 = vmul.f32 %v7920_v38, %v4679_v25  ;;  %7921 = vst [vmem:[#allocation48_spill] sm:$0xff] %v5925_v1  ;;  %v5929_v2 = vld [vmem:[#allocation2 + $0x172] sm:$0xff]  ;;  %v7925_v45 = vld [vmem:[#allocation24_spill] sm:$0xff] }
 0x1c1   : > { %v4230_v37 = vpop.eup %4229  ;;  %7918 = vst [vmem:[#allocation4_spill] sm:$0xff] %v5919_v8  ;;  %v2838_v57 = vadd.f32 %v2806_v59, %v2738_v32  ;;  %7923 = vst [vmem:[#allocation31_spill] sm:$0xff] %v5929_v2  ;;  %v5931_v31 = vld [vmem:[#allocation2 + $0x173] sm:$0xff]  ;;  %v1422_v23 = vadd.f32 %v1390_v49, %v1322_v16  ;;  %v1491_v14 = vmul.f32 %v7809_v22, %v5913_v10  ;;  %v5942_v60 = vld [vmem:[#allocation2 + $0x82] sm:$0xff] }
 0x1c2   : > { %v3590_v26 = vadd.f32 1.0, %v4230_v37  ;;  %7924 = vst [vmem:[#allocation13_spill] sm:$0xff] %v5931_v31  ;;  %v2136_v34 = vadd.f32 %v2104_v44, %v2036_v17  ;;  %v5936_v32 = vadd.f32 %v7925_v45, %v1343_v30  ;;  %v3007_v0 = vmul.f32 %v7739_v41, %v5915_v20  ;;  %7927 = vst [vmem:[#allocation33_spill] sm:$0xff] %v5942_v60  ;;  %v5944_v38 = vld [vmem:[#allocation2 + $0x174] sm:$0xff]  ;;  %v7929_v45 = vld [vmem:[#allocation60_spill] sm:$0xff] }
 0x1c3   : > { %v2938_v59 = vadd.f32 %v2906_v62, %v2838_v57  ;;  %v2304_v37 = vmul.f32 %v5636_v39, %v7732_v52  ;;  %7928 = vst [vmem:[#allocation30_spill] sm:$0xff] %v5944_v38  ;;  %v1523_v17 = vadd.f32 %v1491_v14, %v1422_v23  ;;  %v1591_v16 = vmul.f32 %v7813_v7, %v5925_v1  ;;  %v5954_v62 = vld [vmem:[#allocation2 + $0x83] sm:$0xff] }
 0x1c4   : > { %7926 = vst [vmem:[#allocation21_spill] sm:$0xff] %v5936_v32  ;;  %4235 = vrcp.f32 %v3590_v26  ;;  %v2236_v44 = vadd.f32 %v2204_v9, %v2136_v34  ;;  %v3107_v30 = vmul.f32 %v4923_v35, %v5927_v18  ;;  %v3207_v57 = vmul.f32 %v4927_v36, %v5929_v2  ;;  %v7930_v8 = vld [vmem:[#allocation59_spill] sm:$0xff] }
 0x1c5   : > { %v3039_v49 = vadd.f32 %v3007_v0, %v2938_v59  ;;  %v3307_v39 = vmul.f32 %v4939_v24, %v5931_v31  ;;  %v2404_v9 = vmul.f32 %v7929_v45, %v7733_v4  ;;  %v1623_v34 = vadd.f32 %v1591_v16, %v1523_v17  ;;  %v5962_v0 = vld [vmem:[#allocation2 + $0x84] sm:$0xff]  ;;  %v7931_v45 = vld [vmem:[#allocation61_spill] sm:$0xff]  ;;  %v5973_v31 = vld [vmem:[#allocation2 + $0x98] sm:$0xff] }
 0x1c6   : > { %v2336_v26 = vadd.f32 %v2304_v37, %v2236_v44  ;;  %v1691_v23 = vmul.f32 %v7752_v29, %v5942_v60  ;;  %v3407_v59 = vmul.f32 %v5799_v12, %v5944_v38  ;;  %v989_v42 = vmul.f32 %v7930_v8, %v7786_v46  ;;  %v7932_v8 = vld [vmem:[#allocation63_spill] sm:$0xff] }
 0x1c7   : > { %v3139_v14 = vadd.f32 %v3107_v30, %v3039_v49  ;;  %v1089_v32 = vmul.f32 %v5654_v63, %v7868_v55  ;;  %v4232_v37 = vpop.eup %4231  ;;  %v2505_v17 = vmul.f32 %v7931_v45, %v7734_v47  ;;  %v1791_v49 = vmul.f32 %v7753_v15, %v5954_v62 }
 0x1c8   : > { %v2436_v44 = vadd.f32 %v2404_v9, %v2336_v26  ;;  %v1723_v16 = vadd.f32 %v1691_v23, %v1623_v34  ;;  %v3699_v30 = vmul.f32 %v4232_v37, %v5822_v11  ;;  %v1189_v60 = vmul.f32 %v7932_v8, %v7790_v13  ;;  %v7933_v26 = vld [vmem:[#allocation62_spill] sm:$0xff]  ;;  %v7939_v8 = vld [vmem:[#allocation64_spill] sm:$0xff] }
 0x1c9   : > { %v3239_v38 = vadd.f32 %v3207_v57, %v3139_v14  ;;  %v1121_v2 = vadd.f32 %v1089_v32, %v989_v42  ;;  %v2605_v9 = vmul.f32 %v7933_v26, %v7735_v19  ;;  %v1891_v34 = vmul.f32 %v7754_v53, %v5962_v0  ;;  %v5982_v57 = vld [vmem:[#allocation2 + $0x99] sm:$0xff]  ;;  %v7935_v42 = vld [vmem:[#allocation65_spill] sm:$0xff]  ;;  %v5998_v26 = vld [vmem:[#allocation2 + $0x168] sm:$0xff] }
 0x1ca   : > { %v4234_v18 = vpop.eup %4233  ;;  %v2537_v63 = vadd.f32 %v2505_v17, %v2436_v44  ;;  %v1823_v1 = vadd.f32 %v1791_v49, %v1723_v16  ;;  %3783 = vrot.lane.b32.xlu0 %v3699_v30, %s4344_s16  ;;  %7934 = vst [vmem:[#allocation22_spill] sm:$0xff] %v5982_v57  ;;  %v1289_v32 = vmul.f32 %v7935_v42, %v7770_v48  ;;  %v7936_v44 = vld [vmem:[#allocation54_spill] sm:$0xff]  ;;  %7940 = vst [vmem:[#allocation32_spill] sm:$0xff] %v5998_v26 }
 0x1cb   : > { %v3589_v23 = vadd.f32 1.0, %v4234_v18  ;;  %v3339_v11 = vadd.f32 %v3307_v39, %v3239_v38  ;;  %v1221_v14 = vadd.f32 %v1189_v60, %v1121_v2  ;;  %v2705_v45 = vmul.f32 %v7936_v44, %v7736_v28  ;;  %v5990_v49 = vld [vmem:[#allocation2 + $0x78] sm:$0xff] }
 0x1cc   : > { %v2637_v37 = vadd.f32 %v2605_v9, %v2537_v63  ;;  %v1923_v17 = vadd.f32 %v1891_v34, %v1823_v1  ;;  %v1991_v16 = vmul.f32 %v4700_v6, %v5973_v31  ;;  %7937 = vst [vmem:[#allocation7_spill] sm:$0xff] %v5990_v49  ;;  %v5992_v18 = vld [vmem:[#allocation2 + $0x9a] sm:$0xff]  ;;  %v1389_v2 = vmul.f32 %v5700_v54, %v7877_v43 }
 0x1cd   : > { %4237 = vrcp.f32 %v3589_v23  ;;  %v3439_v30 = vadd.f32 %v3407_v59, %v3339_v11  ;;  %7938 = vst [vmem:[#allocation37_spill] sm:$0xff] %v5992_v18  ;;  %v1321_v38 = vadd.f32 %v1289_v32, %v1221_v14  ;;  %v2805_v63 = vmul.f32 %v7939_v8, %v7737_v50  ;;  %v6002_v34 = vld [vmem:[#allocation2 + $0x79] sm:$0xff]  ;;  %v6008_v11 = vld [vmem:[#allocation2 + $0x169] sm:$0xff] }
 0x1ce   : > { %v4236_v60 = vpop.eup %4235  ;;  %v2737_v39 = vadd.f32 %v2705_v45, %v2637_v37  ;;  %v2023_v1 = vadd.f32 %v1991_v16, %v1923_v17  ;;  %v2091_v9 = vmul.f32 %v4704_v33, %v5982_v57  ;;  %7941 = vst [vmem:[#allocation51_spill] sm:$0xff] %v6002_v34  ;;  %7942 = vst [vmem:[#allocation36_spill] sm:$0xff] %v6008_v11  ;;  %v6010_v54 = vld [vmem:[#allocation2 + $0x9b] sm:$0xff]  ;;  %v6016_v45 = vld [vmem:[#allocation2 + $0x16a] sm:$0xff] }
 0x1cf   : > { %v3686_v59 = vmul.f32 %v4236_v60, %v5844_v40  ;;  %v6006_v23 = vadd.f32 %v5819_v56, %v3439_v30  ;;  %7943 = vst [vmem:[#allocation40_spill] sm:$0xff] %v6010_v54  ;;  %v1421_v14 = vadd.f32 %v1389_v2, %v1321_v38  ;;  %v1490_v42 = vmul.f32 %v7809_v22, %v5990_v49  ;;  %v7944_v37 = vld [vmem:[#allocation66_spill] sm:$0xff]  ;;  %v6026_v2 = vld [vmem:[#allocation2 + $0x16b] sm:$0xff] }
 0x1d0   : > { %v2837_v32 = vadd.f32 %v2805_v63, %v2737_v39  ;;  %v2905_v44 = vmul.f32 %v7944_v37, %v7738_v21  ;;  %7945 = vst [vmem:[#allocation49_spill] sm:$0xff] %v6016_v45  ;;  %v2123_v17 = vadd.f32 %v2091_v9, %v2023_v1  ;;  %v2191_v40 = vmul.f32 %v4679_v25, %v5992_v18  ;;  %v6020_v16 = vld [vmem:[#allocation2 + $0x7a] sm:$0xff]  ;;  %v970_v49 = vld [vmem:[#allocation2 + $0x128] sm:$0xff] }
 0x1d1   : > { %7946 = vst [vmem:[#allocation35_spill] sm:$0xff] %v6020_v16  ;;  %3757 = vrot.lane.b32.xlu1 %v3686_v59, %s4344_s16  ;;  %v3510_v30 = vsub.f32 0.0, %v6006_v23  ;;  %v3006_v38 = vmul.f32 %v7739_v41, %v5998_v26  ;;  %7947 = vst [vmem:[#allocation38_spill] sm:$0xff] %v6026_v2  ;;  %v6028_v60 = vld [vmem:[#allocation2 + $0x9c] sm:$0xff]  ;;  %v1522_v39 = vadd.f32 %v1490_v42, %v1421_v14  ;;  %v1070_v42 = vld [vmem:[#allocation2 + $0x129] sm:$0xff] }
 0x1d2   : > { %7948 = vst [vmem:[#allocation34_spill] sm:$0xff] %v6028_v60  ;;  %v1590_v8 = vmul.f32 %v7813_v7, %v6002_v34  ;;  %v2937_v63 = vadd.f32 %v2905_v44, %v2837_v32  ;;  %v3106_v1 = vmul.f32 %v4923_v35, %v6008_v11  ;;  %v2223_v9 = vadd.f32 %v2191_v40, %v2123_v17  ;;  %v6036_v37 = vld [vmem:[#allocation2 + $0x7b] sm:$0xff] }
 0x1d3   : > { %v2291_v59 = vmul.f32 %v7732_v52, %v6010_v54  ;;  %7949 = vst [vmem:[#allocation6_spill] sm:$0xff] %v6036_v37  ;;  %v3565_v18 = vmul.f32 1.442695, %v3510_v30  ;;  %v3206_v26 = vmul.f32 %v4927_v36, %v6016_v45  ;;  %v1690_v14 = vmul.f32 %v7752_v29, %v6020_v16  ;;  %v6046_v11 = vld [vmem:[#allocation2 + $0x7c] sm:$0xff]  ;;  %v1170_v54 = vld [vmem:[#allocation2 + $0x12a] sm:$0xff] }
 0x1d4   : > { %v1622_v57 = vadd.f32 %v1590_v8, %v1522_v39  ;;  %v3038_v32 = vadd.f32 %v3006_v38, %v2937_v63  ;;  %v3306_v44 = vmul.f32 %v4939_v24, %v6026_v2  ;;  %v2391_v40 = vmul.f32 %v7733_v4, %v6028_v60  ;;  %7950 = vst [vmem:[#allocation55_spill] sm:$0xff] %v6046_v11  ;;  %v6051_v16 = vld [vmem:[#allocation2 + $0x16c] sm:$0xff]  ;;  %v7954_v60 = vld [vmem:[#allocation27_spill] sm:$0xff] }
 0x1d5   : > { %v2323_v17 = vadd.f32 %v2291_v59, %v2223_v9  ;;  %4239 = vpow2.f32 %v3565_v18  ;;  %v1790_v39 = vmul.f32 %v7753_v15, %v6036_v37  ;;  %v1006_v8 = vmul.f32 %v7786_v46, %v970_v49  ;;  %7951 = vst [vmem:[#allocation39_spill] sm:$0xff] %v6051_v16  ;;  %v6055_v9 = vld [vmem:[#allocation2 + $0x90] sm:$0xff] }
 0x1d6   : > { %v1722_v30 = vadd.f32 %v1690_v14, %v1622_v57  ;;  %v3138_v45 = vadd.f32 %v3106_v1, %v3038_v32  ;;  %v2492_v63 = vmul.f32 %v5757_v51, %v7734_v47  ;;  %7952 = vst [vmem:[#allocation46_spill] sm:$0xff] %v6055_v9  ;;  %v1106_v59 = vmul.f32 %v7868_v55, %v1070_v42  ;;  %v1270_v1 = vld [vmem:[#allocation2 + $0x12b] sm:$0xff] }
 0x1d7   : > { %v2423_v38 = vadd.f32 %v2391_v40, %v2323_v17  ;;  %v4238_v2 = vpop.eup %4237  ;;  %v2592_v57 = vmul.f32 %v5759_v58, %v7735_v19  ;;  %v1890_v14 = vmul.f32 %v7754_v53, %v6046_v11  ;;  %v1206_v49 = vmul.f32 %v7790_v13, %v1170_v54  ;;  %v6064_v51 = vld [vmem:[#allocation2 + $0x91] sm:$0xff] }
 0x1d8   : > { %v1822_v18 = vadd.f32 %v1790_v39, %v1722_v30  ;;  %v3685_v32 = vmul.f32 %v4238_v2, %v5892_v3  ;;  %v3238_v17 = vadd.f32 %v3206_v26, %v3138_v45  ;;  %7953 = vst [vmem:[#allocation50_spill] sm:$0xff] %v6064_v51  ;;  %v1138_v37 = vadd.f32 %v1106_v59, %v1006_v8  ;;  %v1370_v11 = vld [vmem:[#allocation2 + $0x12c] sm:$0xff] }
 0x1d9   : > { %v2524_v40 = vadd.f32 %v2492_v63, %v2423_v38  ;;  %v3406_v42 = vmul.f32 %v5799_v12, %v6051_v16  ;;  %v2692_v58 = vmul.f32 %v7954_v60, %v7736_v28  ;;  %v1990_v39 = vmul.f32 %v4700_v6, %v6055_v9  ;;  %v6073_v26 = vld [vmem:[#allocation2 + $0xc8] sm:$0xff]  ;;  %v6077_v2 = vld [vmem:[#allocation2 + $0x92] sm:$0xff] }
 0x1da   : > { %v1922_v30 = vadd.f32 %v1890_v14, %v1822_v18  ;;  %3755 = vrot.lane.b32.xlu0 %v3685_v32, %s4344_s16  ;;  %v3338_v54 = vadd.f32 %v3306_v44, %v3238_v17  ;;  %7955 = vst [vmem:[#allocation5_spill] sm:$0xff] %v6073_v26  ;;  %v6075_v45 = vld [vmem:[#allocation2 + $0xc9] sm:$0xff]  ;;  %7957 = vst [vmem:[#allocation17_spill] sm:$0xff] %v6077_v2  ;;  %v1238_v8 = vadd.f32 %v1206_v49, %v1138_v37  ;;  %v6090_v9 = vld [vmem:[#allocation2 + $0x93] sm:$0xff] }
 0x1db   : > { %v2624_v3 = vadd.f32 %v2592_v57, %v2524_v40  ;;  %7956 = vst [vmem:[#allocation41_spill] sm:$0xff] %v6075_v45  ;;  %v1306_v38 = vmul.f32 %v7770_v48, %v1270_v1  ;;  %v7958_v60 = vld [vmem:[#allocation28_spill] sm:$0xff]  ;;  %v7959_v59 = vld [vmem:[#allocation29_spill] sm:$0xff]  ;;  %v2090_v44 = vmul.f32 %v4704_v33, %v6064_v51  ;;  %v6086_v57 = vld [vmem:[#allocation2 + $0x140] sm:$0xff]  ;;  %v1406_v49 = vmul.f32 %v7877_v43, %v1370_v11 }
 0x1dc   : > { %v2792_v63 = vmul.f32 %v7958_v60, %v7737_v50  ;;  %v2892_v18 = vmul.f32 %v7959_v59, %v7738_v21  ;;  %v2022_v14 = vadd.f32 %v1990_v39, %v1922_v30  ;;  %7960 = vst [vmem:[#allocation42_spill] sm:$0xff] %v6086_v57  ;;  %v3438_v32 = vadd.f32 %v3406_v42, %v3338_v54  ;;  %v6088_v40 = vld [vmem:[#allocation2 + $0xca] sm:$0xff]  ;;  %v6093_v1 = vld [vmem:[#allocation2 + $0x141] sm:$0xff] }
 0x1dd   : > { %v2724_v17 = vadd.f32 %v2692_v58, %v2624_v3  ;;  %7961 = vst [vmem:[#allocation9_spill] sm:$0xff] %v6088_v40  ;;  %7962 = vst [vmem:[#allocation44_spill] sm:$0xff] %v6090_v9  ;;  %v1338_v37 = vadd.f32 %v1306_v38, %v1238_v8  ;;  %v2993_v60 = vmul.f32 %v7739_v41, %v6073_v26  ;;  %v6104_v3 = vld [vmem:[#allocation2 + $0xcb] sm:$0xff]  ;;  %v6106_v8 = vld [vmem:[#allocation2 + $0x94] sm:$0xff] }
 0x1de   : > { %7963 = vst [vmem:[#allocation53_spill] sm:$0xff] %v6093_v1  ;;  %v3093_v30 = vmul.f32 %v4923_v35, %v6075_v45  ;;  %v2122_v39 = vadd.f32 %v2090_v44, %v2022_v14  ;;  %v2190_v42 = vmul.f32 %v4679_v25, %v6077_v2  ;;  %v6102_v58 = vadd.f32 %v5819_v56, %v3438_v32  ;;  %v6110_v59 = vld [vmem:[#allocation2 + $0x142] sm:$0xff] }
 0x1df   : > { %v2824_v54 = vadd.f32 %v2792_v63, %v2724_v17  ;;  %7964 = vst [vmem:[#allocation45_spill] sm:$0xff] %v6104_v3  ;;  %7965 = vst [vmem:[#allocation3_spill] sm:$0xff] %v6106_v8  ;;  %v1438_v11 = vadd.f32 %v1406_v49, %v1338_v37  ;;  %v1507_v38 = vmul.f32 %v7809_v22, %v6086_v57  ;;  %v4240_v26 = vpop.eup %4239  ;;  %v969_v2 = vld [vmem:[#allocation2 + $0x120] sm:$0xff] }
 0x1e0   : > { %7966 = vst [vmem:[#allocation15_spill] sm:$0xff] %v6110_v59  ;;  %v3193_v14 = vmul.f32 %v4927_v36, %v6088_v40  ;;  %v2222_v44 = vadd.f32 %v2190_v42, %v2122_v39  ;;  %v2290_v32 = vmul.f32 %v7732_v52, %v6090_v9  ;;  %v1607_v63 = vmul.f32 %v7813_v7, %v6093_v1  ;;  %v1069_v57 = vld [vmem:[#allocation2 + $0x121] sm:$0xff] }
 0x1e1   : > { %v3606_v17 = vadd.f32 1.0, %v4240_v26  ;;  %v3509_v45 = vsub.f32 0.0, %v6102_v58  ;;  %v2924_v37 = vadd.f32 %v2892_v18, %v2824_v54  ;;  %v1539_v49 = vadd.f32 %v1507_v38, %v1438_v11  ;;  %v6125_v40 = vld [vmem:[#allocation2 + $0x143] sm:$0xff]  ;;  %v6127_v54 = vld [vmem:[#allocation2 + $0xcc] sm:$0xff] }
 0x1e2   : > { %v3293_v51 = vmul.f32 %v4939_v24, %v6104_v3  ;;  %v2322_v16 = vadd.f32 %v2290_v32, %v2222_v44  ;;  %v2390_v39 = vmul.f32 %v7733_v4, %v6106_v8  ;;  %v1707_v42 = vmul.f32 %v7752_v29, %v6110_v59  ;;  %v1169_v18 = vld [vmem:[#allocation2 + $0x122] sm:$0xff] }
 0x1e3   : > { %4241 = vrcp.f32 %v3606_v17  ;;  %v3563_v26 = vmul.f32 1.442695, %v3509_v45  ;;  %v3025_v1 = vadd.f32 %v2993_v60, %v2924_v37  ;;  %v1639_v9 = vadd.f32 %v1607_v63, %v1539_v49  ;;  %v7967_v38 = vld [vmem:[#allocation47_spill] sm:$0xff]  ;;  %v7968_v17 = vld [vmem:[#allocation10_spill] sm:$0xff] }
 0x1e4   : > { %v2422_v11 = vadd.f32 %v2390_v39, %v2322_v16  ;;  %v2491_v3 = vmul.f32 %v7967_v38, %v7734_v47  ;;  %v6131_v44 = vld [vmem:[#allocation2 + $0x144] sm:$0xff]  ;;  %v1005_v32 = vmul.f32 %v7786_v46, %v969_v2  ;;  %v1105_v8 = vmul.f32 %v7868_v55, %v1069_v57  ;;  %v6139_v37 = vld [vmem:[#allocation2 + $0x158] sm:$0xff] }
 0x1e5   : > { %4243 = vpow2.f32 %v3563_v26  ;;  %v3125_v59 = vadd.f32 %v3093_v30, %v3025_v1  ;;  %v1739_v34 = vadd.f32 %v1707_v42, %v1639_v9  ;;  %v1807_v45 = vmul.f32 %v7753_v15, %v6125_v40  ;;  %v1269_v60 = vld [vmem:[#allocation2 + $0x123] sm:$0xff]  ;;  %v6150_v26 = vld [vmem:[#allocation2 + $0x159] sm:$0xff] }
 0x1e6   : > { %v2523_v63 = vadd.f32 %v2491_v3, %v2422_v11  ;;  %v2591_v16 = vmul.f32 %v7968_v17, %v7735_v19  ;;  %v1137_v49 = vadd.f32 %v1105_v8, %v1005_v32  ;;  %v1205_v39 = vmul.f32 %v7790_v13, %v1169_v18  ;;  %v1369_v1 = vld [vmem:[#allocation2 + $0x124] sm:$0xff]  ;;  %7970 = vst [vmem:[#allocation52_spill] sm:$0xff] %v6150_v26 }
 0x1e7   : > { %v3225_v38 = vadd.f32 %v3193_v14, %v3125_v59  ;;  %v3393_v2 = vmul.f32 %v5799_v12, %v6127_v54  ;;  %v1839_v57 = vadd.f32 %v1807_v45, %v1739_v34  ;;  %v1907_v9 = vmul.f32 %v7754_v53, %v6131_v44  ;;  %v6148_v42 = vld [vmem:[#allocation2 + $0xc0] sm:$0xff]  ;;  %v6159_v45 = vld [vmem:[#allocation2 + $0x138] sm:$0xff] }
 0x1e8   : > { %v2623_v30 = vadd.f32 %v2591_v16, %v2523_v63  ;;  %v2691_v3 = vmul.f32 %v5837_v61, %v7736_v28  ;;  %7969 = vst [vmem:[#allocation19_spill] sm:$0xff] %v6148_v42  ;;  %v1237_v8 = vadd.f32 %v1205_v39, %v1137_v49  ;;  %v1305_v18 = vmul.f32 %v7770_v48, %v1269_v60  ;;  %v6155_v34 = vld [vmem:[#allocation2 + $0xc1] sm:$0xff] }
 0x1e9   : > { %v3325_v59 = vadd.f32 %v3293_v51, %v3225_v38  ;;  %v2791_v14 = vmul.f32 %v5846_v5, %v7737_v50  ;;  %7971 = vst [vmem:[#allocation56_spill] sm:$0xff] %v6155_v34  ;;  %v1939_v11 = vadd.f32 %v1907_v9, %v1839_v57  ;;  %v2007_v32 = vmul.f32 %v4700_v6, %v6139_v37  ;;  %v6163_v17 = vld [vmem:[#allocation2 + $0xc2] sm:$0xff]  ;;  %v6165_v16 = vld [vmem:[#allocation2 + $0x15a] sm:$0xff] }
 0x1ea   : > { %7972 = vst [vmem:[#allocation26_spill] sm:$0xff] %v6159_v45  ;;  %v2723_v61 = vadd.f32 %v2691_v3, %v2623_v30  ;;  %v2891_v63 = vmul.f32 %v5858_v27, %v7738_v21  ;;  %7973 = vst [vmem:[#allocation23_spill] sm:$0xff] %v6163_v17  ;;  %v1337_v51 = vadd.f32 %v1305_v18, %v1237_v8  ;;  %v6172_v57 = vld [vmem:[#allocation2 + $0x139] sm:$0xff]  ;;  %v6176_v30 = vld [vmem:[#allocation2 + $0xc3] sm:$0xff] }
 0x1eb   : > { %7974 = vst [vmem:[#allocation14_spill] sm:$0xff] %v6165_v16  ;;  %v1405_v60 = vmul.f32 %v7877_v43, %v1369_v1  ;;  %v3425_v5 = vadd.f32 %v3393_v2, %v3325_v59  ;;  %v2992_v49 = vmul.f32 %v7739_v41, %v6148_v42  ;;  %v2039_v39 = vadd.f32 %v2007_v32, %v1939_v11  ;;  %v6178_v3 = vld [vmem:[#allocation2 + $0x15b] sm:$0xff] }
 0x1ec   : > { %v2107_v38 = vmul.f32 %v4704_v33, %v6150_v26  ;;  %7975 = vst [vmem:[#allocation57_spill] sm:$0xff] %v6172_v57  ;;  %v2823_v9 = vadd.f32 %v2791_v14, %v2723_v61  ;;  %v3092_v27 = vmul.f32 %v4923_v35, %v6155_v34  ;;  %7976 = vst [vmem:[#allocation8_spill] sm:$0xff] %v6176_v30  ;;  %v6189_v32 = vld [vmem:[#allocation2 + $0x13a] sm:$0xff] }
 0x1ed   : > { %v1437_v8 = vadd.f32 %v1405_v60, %v1337_v51  ;;  %v1506_v2 = vmul.f32 %v7809_v22, %v6159_v45  ;;  %v4242_v1 = vpop.eup %4241  ;;  %v6183_v18 = vadd.f32 %v5819_v56, %v3425_v5  ;;  %v3192_v59 = vmul.f32 %v4927_v36, %v6163_v17  ;;  %v6192_v51 = vld [vmem:[#allocation2 + $0x15c] sm:$0xff] }
 0x1ee   : > { %v2139_v11 = vadd.f32 %v2107_v38, %v2039_v39  ;;  %v2207_v14 = vmul.f32 %v4679_v25, %v6165_v16  ;;  %v3702_v61 = vmul.f32 %v4242_v1, %v6006_v23  ;;  %v2923_v34 = vadd.f32 %v2891_v63, %v2823_v9  ;;  %v6196_v5 = vld [vmem:[#allocation2 + $0x13b] sm:$0xff]  ;;  %v6206_v1 = vld [vmem:[#allocation2 + $0xc4] sm:$0xff] }
 0x1ef   : > { %v1538_v60 = vadd.f32 %v1506_v2, %v1437_v8  ;;  %v1606_v45 = vmul.f32 %v7813_v7, %v6172_v57  ;;  %v4244_v42 = vpop.eup %4243  ;;  %v3496_v17 = vsub.f32 0.0, %v6183_v18  ;;  %v3292_v39 = vmul.f32 %v4939_v24, %v6176_v30  ;;  %7977 = vst [vmem:[#allocation58_spill] sm:$0xff] %v6206_v1 }
 0x1f0   : > { %v2239_v38 = vadd.f32 %v2207_v14, %v2139_v11  ;;  %v2307_v16 = vmul.f32 %v7732_v52, %v6178_v3  ;;  %3789 = vrot.lane.b32.xlu1 %v3702_v61, %s4344_s16  ;;  %v3605_v23 = vadd.f32 1.0, %v4244_v42  ;;  %v3024_v63 = vadd.f32 %v2992_v49, %v2923_v34  ;;  %v6212_v14 = vld [vmem:[#allocation2 + $0x13c] sm:$0xff]  ;;  %v7980_v49 = vld [vmem:[#allocation48_spill] sm:$0xff] }
 0x1f1   : > { %v1638_v9 = vadd.f32 %v1606_v45, %v1538_v60  ;;  %v1706_v8 = vmul.f32 %v7752_v29, %v6189_v32  ;;  %v3537_v2 = vmul.f32 1.442695, %v3496_v17  ;;  %v2407_v26 = vmul.f32 %v7733_v4, %v6192_v51  ;;  %7978 = vst [vmem:[#allocation24_spill] sm:$0xff] %v6212_v14 }
 0x1f2   : > { %v2339_v57 = vadd.f32 %v2307_v16, %v2239_v38  ;;  %v1806_v11 = vmul.f32 %v7753_v15, %v6196_v5  ;;  %4245 = vrcp.f32 %v3605_v23  ;;  %v3124_v61 = vadd.f32 %v3092_v27, %v3024_v63  ;;  %v6218_v16 = vld [vmem:[#allocation2 + $0x150] sm:$0xff] }
 0x1f3   : > { %v1738_v42 = vadd.f32 %v1706_v8, %v1638_v9  ;;  %v992_v34 = vmul.f32 %v5913_v10, %v7786_v46  ;;  %4247 = vpow2.f32 %v3537_v2  ;;  %v2508_v17 = vmul.f32 %v5915_v20, %v7734_v47  ;;  %7979 = vst [vmem:[#allocation60_spill] sm:$0xff] %v6218_v16  ;;  %v7981_v10 = vld [vmem:[#allocation20_spill] sm:$0xff]  ;;  %v7983_v9 = vld [vmem:[#allocation33_spill] sm:$0xff] }
 0x1f4   : > { %v2439_v45 = vadd.f32 %v2407_v26, %v2339_v57  ;;  %v1092_v60 = vmul.f32 %v7980_v49, %v7868_v55  ;;  %v3224_v38 = vadd.f32 %v3192_v59, %v3124_v61  ;;  %v3392_v30 = vmul.f32 %v5799_v12, %v6206_v1  ;;  %v6228_v57 = vld [vmem:[#allocation2 + $0x151] sm:$0xff]  ;;  %v7984_v59 = vld [vmem:[#allocation31_spill] sm:$0xff]  ;;  %v6234_v49 = vld [vmem:[#allocation2 + $0x188] sm:$0xff] }
 0x1f5   : > { %v1838_v23 = vadd.f32 %v1806_v11, %v1738_v42  ;;  %v1906_v27 = vmul.f32 %v7754_v53, %v6212_v14  ;;  %v2608_v26 = vmul.f32 %v7981_v10, %v7735_v19  ;;  %7982 = vst [vmem:[#allocation59_spill] sm:$0xff] %v6228_v57  ;;  %v1192_v8 = vmul.f32 %v7983_v9, %v7790_v13  ;;  %v6240_v14 = vld [vmem:[#allocation2 + $0x189] sm:$0xff]  ;;  %v7989_v9 = vld [vmem:[#allocation30_spill] sm:$0xff] }
 0x1f6   : > { %v2540_v63 = vadd.f32 %v2508_v17, %v2439_v45  ;;  %v1124_v20 = vadd.f32 %v1092_v60, %v992_v34  ;;  %v3324_v2 = vadd.f32 %v3292_v39, %v3224_v38  ;;  %v2708_v61 = vmul.f32 %v7984_v59, %v7736_v28  ;;  %7985 = vst [vmem:[#allocation61_spill] sm:$0xff] %v6234_v49  ;;  %v7986_v17 = vld [vmem:[#allocation13_spill] sm:$0xff] }
 0x1f7   : > { %v1938_v11 = vadd.f32 %v1906_v27, %v1838_v23  ;;  %v2006_v42 = vmul.f32 %v4700_v6, %v6218_v16  ;;  %v2808_v10 = vmul.f32 %v7986_v17, %v7737_v50  ;;  %7987 = vst [vmem:[#allocation63_spill] sm:$0xff] %v6240_v14  ;;  %v6242_v34 = vld [vmem:[#allocation2 + $0x152] sm:$0xff]  ;;  %v1292_v39 = vmul.f32 %v5954_v62, %v7770_v48  ;;  %v6248_v23 = vld [vmem:[#allocation2 + $0x18a] sm:$0xff] }
 0x1f8   : > { %v2640_v45 = vadd.f32 %v2608_v26, %v2540_v63  ;;  %7988 = vst [vmem:[#allocation62_spill] sm:$0xff] %v6242_v34  ;;  %v1224_v60 = vadd.f32 %v1192_v8, %v1124_v20  ;;  %v3424_v38 = vadd.f32 %v3392_v30, %v3324_v2  ;;  %v2908_v59 = vmul.f32 %v7989_v9, %v7738_v21  ;;  %v6254_v16 = vld [vmem:[#allocation2 + $0x18b] sm:$0xff]  ;;  %v6256_v20 = vld [vmem:[#allocation2 + $0x153] sm:$0xff] }
 0x1f9   : > { %7990 = vst [vmem:[#allocation65_spill] sm:$0xff] %v6248_v23  ;;  %v2038_v27 = vadd.f32 %v2006_v42, %v1938_v11  ;;  %v2106_v63 = vmul.f32 %v4704_v33, %v6228_v57  ;;  %v3009_v17 = vmul.f32 %v7739_v41, %v6234_v49  ;;  %7991 = vst [vmem:[#allocation54_spill] sm:$0xff] %v6254_v16  ;;  %v6269_v9 = vld [vmem:[#allocation2 + $0x154] sm:$0xff] }
 0x1fa   : > { %v2740_v26 = vadd.f32 %v2708_v61, %v2640_v45  ;;  %7992 = vst [vmem:[#allocation64_spill] sm:$0xff] %v6256_v20  ;;  %v1324_v8 = vadd.f32 %v1292_v39, %v1224_v60  ;;  %v1392_v62 = vmul.f32 %v5962_v0, %v7877_v43  ;;  %v6261_v30 = vadd.f32 %v5819_v56, %v3424_v38 }
 0x1fb   : > { %v3109_v2 = vmul.f32 %v4923_v35, %v6240_v14  ;;  %v2138_v11 = vadd.f32 %v2106_v63, %v2038_v27  ;;  %v2206_v61 = vmul.f32 %v4679_v25, %v6242_v34  ;;  %v3209_v45 = vmul.f32 %v4927_v36, %v6248_v23 }
 0x1fc   : > { %v2840_v42 = vadd.f32 %v2808_v10, %v2740_v26  ;;  %v1424_v60 = vadd.f32 %v1392_v62, %v1324_v8  ;;  %v1493_v0 = vmul.f32 %v5973_v31, %v7809_v22  ;;  %v4246_v39 = vpop.eup %4245  ;;  %v3495_v38 = vsub.f32 0.0, %v6261_v30  ;;  %v7993_v8 = vld [vmem:[#allocation22_spill] sm:$0xff] }
 0x1fd   : > { %v3309_v14 = vmul.f32 %v4939_v24, %v6254_v16  ;;  %v2238_v27 = vadd.f32 %v2206_v61, %v2138_v11  ;;  %v2306_v63 = vmul.f32 %v7732_v52, %v6256_v20  ;;  %v4248_v10 = vpop.eup %4247  ;;  %v3701_v26 = vmul.f32 %v4246_v39, %v6102_v58  ;;  %v7994_v61 = vld [vmem:[#allocation32_spill] sm:$0xff]  ;;  %v7995_v58 = vld [vmem:[#allocation37_spill] sm:$0xff] }
 0x1fe   : > { %v2940_v23 = vadd.f32 %v2908_v59, %v2840_v42  ;;  %v1525_v49 = vadd.f32 %v1493_v0, %v1424_v60  ;;  %v1593_v62 = vmul.f32 %v7993_v8, %v7813_v7  ;;  %v3592_v34 = vadd.f32 1.0, %v4248_v10  ;;  %v6288_v42 = vld [vmem:[#allocation2 + $0x18c] sm:$0xff]  ;;  %v7996_v0 = vld [vmem:[#allocation7_spill] sm:$0xff] }
 0x1ff   : > { %v3535_v31 = vmul.f32 1.442695, %v3495_v38  ;;  %v2338_v57 = vadd.f32 %v2306_v63, %v2238_v27  ;;  %v2406_v1 = vmul.f32 %v7733_v4, %v6269_v9  ;;  %3787 = vrot.lane.b32.xlu0 %v3701_v26, %s4344_s16  ;;  %v2507_v16 = vmul.f32 %v7994_v61, %v7734_v47  ;;  %v7997_v38 = vld [vmem:[#allocation51_spill] sm:$0xff]  ;;  %v7999_v26 = vld [vmem:[#allocation36_spill] sm:$0xff] }
 0x200   : > { %v3041_v11 = vadd.f32 %v3009_v17, %v2940_v23  ;;  %v1625_v20 = vadd.f32 %v1593_v62, %v1525_v49  ;;  %v1693_v59 = vmul.f32 %v7995_v58, %v7752_v29  ;;  %4249 = vrcp.f32 %v3592_v34  ;;  %v7998_v17 = vld [vmem:[#allocation40_spill] sm:$0xff]  ;;  %v6298_v34 = vld [vmem:[#allocation2 + $0xb0] sm:$0xff] }
 0x201   : > { %v2438_v60 = vadd.f32 %v2406_v1, %v2338_v57  ;;  %v991_v39 = vmul.f32 %v7996_v0, %v7786_v46  ;;  %v1091_v27 = vmul.f32 %v7997_v38, %v7868_v55  ;;  %4251 = vpow2.f32 %v3535_v31  ;;  %v8000_v1 = vld [vmem:[#allocation35_spill] sm:$0xff]  ;;  %v6310_v0 = vld [vmem:[#allocation2 + $0xb1] sm:$0xff] }
 0x202   : > { %v3141_v63 = vadd.f32 %v3109_v2, %v3041_v11  ;;  %v1725_v23 = vadd.f32 %v1693_v59, %v1625_v20  ;;  %v1793_v10 = vmul.f32 %v7998_v17, %v7753_v15  ;;  %v2607_v8 = vmul.f32 %v7999_v26, %v7735_v19  ;;  %v8001_v20 = vld [vmem:[#allocation34_spill] sm:$0xff]  ;;  %v8007_v26 = vld [vmem:[#allocation39_spill] sm:$0xff] }
 0x203   : > { %v2539_v49 = vadd.f32 %v2507_v16, %v2438_v60  ;;  %v1123_v62 = vadd.f32 %v1091_v27, %v991_v39  ;;  %v1191_v57 = vmul.f32 %v8000_v1, %v7790_v13  ;;  %v3409_v58 = vmul.f32 %v5799_v12, %v6288_v42  ;;  %v8002_v16 = vld [vmem:[#allocation49_spill] sm:$0xff]  ;;  %v6308_v60 = vld [vmem:[#allocation2 + $0x180] sm:$0xff]  ;;  %v8004_v38 = vld [vmem:[#allocation6_spill] sm:$0xff] }
 0x204   : > { %v3241_v61 = vadd.f32 %v3209_v45, %v3141_v63  ;;  %v1825_v31 = vadd.f32 %v1793_v10, %v1725_v23  ;;  %v1893_v2 = vmul.f32 %v8001_v20, %v7754_v53  ;;  %v2707_v59 = vmul.f32 %v8002_v16, %v7736_v28  ;;  %8003 = vst [vmem:[#allocation66_spill] sm:$0xff] %v6308_v60  ;;  %v8005_v63 = vld [vmem:[#allocation38_spill] sm:$0xff]  ;;  %v6316_v23 = vld [vmem:[#allocation2 + $0x181] sm:$0xff] }
 0x205   : > { %v2639_v11 = vadd.f32 %v2607_v8, %v2539_v49  ;;  %v1223_v39 = vadd.f32 %v1191_v57, %v1123_v62  ;;  %v1291_v27 = vmul.f32 %v8004_v38, %v7770_v48  ;;  %v2807_v12 = vmul.f32 %v8005_v63, %v7737_v50  ;;  %8006 = vst [vmem:[#allocation27_spill] sm:$0xff] %v6316_v23  ;;  %v6322_v1 = vld [vmem:[#allocation2 + $0x182] sm:$0xff]  ;;  %v6324_v62 = vld [vmem:[#allocation2 + $0xb2] sm:$0xff] }
 0x206   : > { %v3341_v45 = vadd.f32 %v3309_v14, %v3241_v61  ;;  %v1925_v17 = vadd.f32 %v1893_v2, %v1825_v31  ;;  %v1993_v10 = vmul.f32 %v4700_v6, %v6298_v34  ;;  %v2907_v8 = vmul.f32 %v8007_v26, %v7738_v21  ;;  %8008 = vst [vmem:[#allocation28_spill] sm:$0xff] %v6322_v1  ;;  %v8010_v14 = vld [vmem:[#allocation55_spill] sm:$0xff]  ;;  %v6336_v63 = vld [vmem:[#allocation2 + $0xb3] sm:$0xff] }
 0x207   : > { %v2739_v49 = vadd.f32 %v2707_v59, %v2639_v11  ;;  %8009 = vst [vmem:[#allocation29_spill] sm:$0xff] %v6324_v62  ;;  %v1323_v57 = vadd.f32 %v1291_v27, %v1223_v39  ;;  %v1391_v61 = vmul.f32 %v8010_v14, %v7877_v43  ;;  %v3008_v16 = vmul.f32 %v7739_v41, %v6308_v60  ;;  %v6330_v31 = vld [vmem:[#allocation2 + $0x183] sm:$0xff]  ;;  %v8013_v27 = vld [vmem:[#allocation46_spill] sm:$0xff] }
 0x208   : > { %v3441_v20 = vadd.f32 %v3409_v58, %v3341_v45  ;;  %8011 = vst [vmem:[#allocation47_spill] sm:$0xff] %v6330_v31  ;;  %v2025_v2 = vadd.f32 %v1993_v10, %v1925_v17  ;;  %v2093_v11 = vmul.f32 %v4704_v33, %v6310_v0  ;;  %v3108_v38 = vmul.f32 %v4923_v35, %v6316_v23  ;;  %v6349_v23 = vld [vmem:[#allocation2 + $0xb4] sm:$0xff] }
 0x209   : > { %v2839_v59 = vadd.f32 %v2807_v12, %v2739_v49  ;;  %8012 = vst [vmem:[#allocation10_spill] sm:$0xff] %v6336_v63  ;;  %v1423_v39 = vadd.f32 %v1391_v61, %v1323_v57  ;;  %v1492_v26 = vmul.f32 %v8013_v27, %v7809_v22  ;;  %v3208_v45 = vmul.f32 %v4927_v36, %v6322_v1  ;;  %v8015_v61 = vld [vmem:[#allocation50_spill] sm:$0xff] }
 0x20a   : > { %v6341_v58 = vadd.f32 %v5819_v56, %v3441_v20  ;;  %v2125_v17 = vadd.f32 %v2093_v11, %v2025_v2  ;;  %v2193_v10 = vmul.f32 %v4679_v25, %v6324_v62  ;;  %v4250_v12 = vpop.eup %4249  ;;  %v3308_v14 = vmul.f32 %v4939_v24, %v6330_v31  ;;  %8014 = vst [vmem:[#allocation48_spill] sm:$0xff] %v6349_v23  ;;  %v8016_v31 = vld [vmem:[#allocation17_spill] sm:$0xff] }
 0x20b   : > { %v2939_v49 = vadd.f32 %v2907_v8, %v2839_v59  ;;  %v1524_v57 = vadd.f32 %v1492_v26, %v1423_v39  ;;  %v1592_v27 = vmul.f32 %v8015_v61, %v7813_v7  ;;  %v4252_v56 = vpop.eup %4251  ;;  %v3688_v20 = vmul.f32 %v4250_v12, %v6183_v18  ;;  %v6360_v26 = vld [vmem:[#allocation2 + $0x184] sm:$0xff] }
 0x20c   : > { %v3512_v1 = vsub.f32 0.0, %v6341_v58  ;;  %v2225_v2 = vadd.f32 %v2193_v10, %v2125_v17  ;;  %v2293_v11 = vmul.f32 %v7732_v52, %v6336_v63  ;;  %v3591_v62 = vadd.f32 1.0, %v4252_v56  ;;  %8017 = vst [vmem:[#allocation20_spill] sm:$0xff] %v6360_v26  ;;  %v8018_v17 = vld [vmem:[#allocation44_spill] sm:$0xff]  ;;  %v6391_v63 = vld [vmem:[#allocation2 + $0xe0] sm:$0xff] }
 0x20d   : > { %v3040_v8 = vadd.f32 %v3008_v16, %v2939_v49  ;;  %v1624_v59 = vadd.f32 %v1592_v27, %v1524_v57  ;;  %v1692_v60 = vmul.f32 %v8016_v31, %v7752_v29  ;;  %3761 = vrot.lane.b32.xlu1 %v3688_v20, %s4344_s16  ;;  %v2393_v18 = vmul.f32 %v7733_v4, %v6349_v23  ;;  %v8019_v16 = vld [vmem:[#allocation42_spill] sm:$0xff]  ;;  %v8020_v57 = vld [vmem:[#allocation5_spill] sm:$0xff]  ;;  %v6370_v27 = vld [vmem:[#allocation2 + $0xa8] sm:$0xff] }
 0x20e   : > { %v3569_v39 = vmul.f32 1.442695, %v3512_v1  ;;  %v2325_v61 = vadd.f32 %v2293_v11, %v2225_v2  ;;  %v1792_v10 = vmul.f32 %v8018_v17, %v7753_v15  ;;  %4253 = vrcp.f32 %v3591_v62  ;;  %8021 = vst [vmem:[#allocation33_spill] sm:$0xff] %v6370_v27  ;;  %v8022_v20 = vld [vmem:[#allocation53_spill] sm:$0xff]  ;;  %v6377_v62 = vld [vmem:[%s7401_s3 + $0x18] ss:$0 sm:$0xff] }
 0x20f   : > { %v3140_v12 = vadd.f32 %v3108_v38, %v3040_v8  ;;  %v1724_v56 = vadd.f32 %v1692_v60, %v1624_v59  ;;  %v1008_v49 = vmul.f32 %v8019_v16, %v7786_v46  ;;  %v2494_v1 = vmul.f32 %v8020_v57, %v7734_v47  ;;  %v8023_v8 = vld [vmem:[#allocation3_spill] sm:$0xff]  ;;  %v6385_v17 = vld [vmem:[#allocation2 + $0xa9] sm:$0xff]  ;;  %8028 = vst [vmem:[#allocation13_spill] sm:$0xff] %v6391_v63 }
 0x210   : > { %4255 = vpow2.f32 %v3569_v39  ;;  %v2425_v31 = vadd.f32 %v2393_v18, %v2325_v61  ;;  %v1108_v2 = vmul.f32 %v8022_v20, %v7868_v55  ;;  %v3408_v60 = vmul.f32 %v6377_v62, %v6360_v26  ;;  %v8024_v61 = vld [vmem:[#allocation41_spill] sm:$0xff]  ;;  %8025 = vst [vmem:[#allocation31_spill] sm:$0xff] %v6385_v17 }
 0x211   : > { %v3240_v11 = vadd.f32 %v3208_v45, %v3140_v12  ;;  %v1824_v38 = vadd.f32 %v1792_v10, %v1724_v56  ;;  %v1892_v59 = vmul.f32 %v8023_v8, %v7754_v53  ;;  %v2594_v18 = vmul.f32 %v8024_v61, %v7735_v19  ;;  %v8026_v45 = vld [vmem:[#allocation15_spill] sm:$0xff]  ;;  %v8027_v20 = vld [vmem:[#allocation9_spill] sm:$0xff] }
 0x212   : > { %v2526_v39 = vadd.f32 %v2494_v1, %v2425_v31  ;;  %v1140_v16 = vadd.f32 %v1108_v2, %v1008_v49  ;;  %v1208_v12 = vmul.f32 %v8026_v45, %v7790_v13  ;;  %v2694_v23 = vmul.f32 %v8027_v20, %v7736_v28  ;;  %v8029_v1 = vld [vmem:[#allocation45_spill] sm:$0xff]  ;;  %v6397_v61 = vld [vmem:[#allocation2 + $0xe1] sm:$0xff] }
 0x213   : > { %v3340_v57 = vadd.f32 %v3308_v14, %v3240_v11  ;;  %v1924_v10 = vadd.f32 %v1892_v59, %v1824_v38  ;;  %v1992_v56 = vmul.f32 %v4700_v6, %v6370_v27  ;;  %v2794_v8 = vmul.f32 %v8029_v1, %v7737_v50  ;;  %8030 = vst [vmem:[#allocation30_spill] sm:$0xff] %v6397_v61  ;;  %v6399_v49 = vld [vmem:[#allocation2 + $0xaa] sm:$0xff]  ;;  %v6405_v38 = vld [vmem:[#allocation2 + $0xe2] sm:$0xff] }
 0x214   : > { %v2626_v31 = vadd.f32 %v2594_v18, %v2526_v39  ;;  %8031 = vst [vmem:[#allocation22_spill] sm:$0xff] %v6399_v49  ;;  %v1240_v2 = vadd.f32 %v1208_v12, %v1140_v16  ;;  %v1308_v14 = vmul.f32 %v6125_v40, %v7770_v48  ;;  %v2894_v45 = vmul.f32 %v6127_v54, %v7738_v21  ;;  %v6411_v1 = vld [vmem:[#allocation2 + $0xe3] sm:$0xff]  ;;  %v6413_v16 = vld [vmem:[#allocation2 + $0xab] sm:$0xff]  ;;  %v6420_v54 = vld [vmem:[%s7402_s4] ss:$0 sm:$0xff] }
 0x215   : > { %v3440_v11 = vadd.f32 %v3408_v60, %v3340_v57  ;;  %8032 = vst [vmem:[#allocation32_spill] sm:$0xff] %v6405_v38  ;;  %v2024_v59 = vadd.f32 %v1992_v56, %v1924_v10  ;;  %v2092_v39 = vmul.f32 %v4704_v33, %v6385_v17  ;;  %v2995_v20 = vmul.f32 %v7739_v41, %v6391_v63 }
 0x216   : > { %v2726_v18 = vadd.f32 %v2694_v23, %v2626_v31  ;;  %8033 = vst [vmem:[#allocation37_spill] sm:$0xff] %v6411_v1  ;;  %8034 = vst [vmem:[#allocation7_spill] sm:$0xff] %v6413_v16  ;;  %v1340_v12 = vadd.f32 %v1308_v14, %v1240_v2  ;;  %v1408_v40 = vmul.f32 %v6131_v44, %v7877_v43  ;;  %v6431_v44 = vld [vmem:[#allocation2 + $0xac] sm:$0xff] }
 0x217   : > { %v6423_v60 = vadd.f32 %v6420_v54, %v3440_v11  ;;  %v3095_v23 = vmul.f32 %v4923_v35, %v6397_v61  ;;  %v2124_v57 = vadd.f32 %v2092_v39, %v2024_v59  ;;  %v2192_v10 = vmul.f32 %v4679_v25, %v6399_v49 }
 0x218   : > { %v2826_v56 = vadd.f32 %v2794_v8, %v2726_v18  ;;  %v3195_v31 = vmul.f32 %v4927_v36, %v6405_v38  ;;  %v1440_v2 = vadd.f32 %v1408_v40, %v1340_v12  ;;  %v1509_v14 = vmul.f32 %v6139_v37, %v7809_v22  ;;  %v4254_v63 = vpop.eup %4253  ;;  %v8035_v12 = vld [vmem:[#allocation52_spill] sm:$0xff] }
 0x219   : > { %v3511_v11 = vsub.f32 0.0, %v6423_v60  ;;  %v3295_v61 = vmul.f32 %v4939_v24, %v6411_v1  ;;  %v2224_v59 = vadd.f32 %v2192_v10, %v2124_v57  ;;  %v2292_v39 = vmul.f32 %v7732_v52, %v6413_v16  ;;  %v8036_v10 = vld [vmem:[#allocation19_spill] sm:$0xff] }
 0x21a   : > { %v4256_v8 = vpop.eup %4255  ;;  %v3687_v18 = vmul.f32 %v4254_v63, %v6261_v30  ;;  %v2926_v38 = vadd.f32 %v2894_v45, %v2826_v56  ;;  %v1541_v49 = vadd.f32 %v1509_v14, %v1440_v2  ;;  %v1609_v40 = vmul.f32 %v8035_v12, %v7813_v7  ;;  %v8037_v30 = vld [vmem:[#allocation14_spill] sm:$0xff]  ;;  %v6450_v45 = vld [vmem:[#allocation2 + $0xe4] sm:$0xff] }
 0x21b   : > { %v3608_v17 = vadd.f32 1.0, %v4256_v8  ;;  %v3567_v37 = vmul.f32 1.442695, %v3511_v11  ;;  %v2324_v27 = vadd.f32 %v2292_v39, %v2224_v59  ;;  %v2392_v26 = vmul.f32 %v7733_v4, %v6431_v44  ;;  %v8038_v2 = vld [vmem:[#allocation26_spill] sm:$0xff]  ;;  %v8039_v11 = vld [vmem:[#allocation57_spill] sm:$0xff]  ;;  %v8040_v8 = vld [vmem:[#allocation56_spill] sm:$0xff] }
 0x21c   : > { %3759 = vrot.lane.b32.xlu0 %v3687_v18, %s4344_s16  ;;  %v3027_v57 = vadd.f32 %v2995_v20, %v2926_v38  ;;  %v2493_v1 = vmul.f32 %v8036_v10, %v7734_v47  ;;  %v1641_v16 = vadd.f32 %v1609_v40, %v1541_v49  ;;  %v1709_v63 = vmul.f32 %v8037_v30, %v7752_v29  ;;  %v6472_v10 = vld [vmem:[#allocation2 + $0x171] sm:$0xff] }
 0x21d   : > { %4257 = vrcp.f32 %v3608_v17  ;;  %v2424_v56 = vadd.f32 %v2392_v26, %v2324_v27  ;;  %v1007_v14 = vmul.f32 %v8038_v2, %v7786_v46  ;;  %v1107_v59 = vmul.f32 %v8039_v11, %v7868_v55  ;;  %v6460_v17 = vld [vmem:[#allocation2 + $0x170] sm:$0xff]  ;;  %v6478_v2 = vld [vmem:[#allocation2 + $0xd9] sm:$0xff] }
 0x21e   : > { %4259 = vpow2.f32 %v3567_v37  ;;  %v3127_v39 = vadd.f32 %v3095_v23, %v3027_v57  ;;  %v1741_v38 = vadd.f32 %v1709_v63, %v1641_v16  ;;  %v1809_v20 = vmul.f32 %v6178_v3, %v7753_v15  ;;  %v8041_v3 = vld [vmem:[#allocation23_spill] sm:$0xff]  ;;  %v6470_v57 = vld [vmem:[#allocation2 + $0xd8] sm:$0xff]  ;;  %v8042_v63 = vld [vmem:[#allocation8_spill] sm:$0xff]  ;;  %8043 = vst [vmem:[#allocation51_spill] sm:$0xff] %v6478_v2 }
 0x21f   : > { %v2525_v49 = vadd.f32 %v2493_v1, %v2424_v56  ;;  %v2593_v18 = vmul.f32 %v8040_v8, %v7735_v19  ;;  %v1139_v12 = vadd.f32 %v1107_v59, %v1007_v14  ;;  %v1207_v26 = vmul.f32 %v6189_v32, %v7790_v13  ;;  %v8044_v59 = vld [vmem:[#allocation58_spill] sm:$0xff] }
 0x220   : > { %v3227_v27 = vadd.f32 %v3195_v31, %v3127_v39  ;;  %v3395_v40 = vmul.f32 %v6377_v62, %v6450_v45  ;;  %v1841_v37 = vadd.f32 %v1809_v20, %v1741_v38  ;;  %v1909_v16 = vmul.f32 %v6192_v51, %v7754_v53  ;;  %v6484_v38 = vld [vmem:[#allocation2 + $0xda] sm:$0xff]  ;;  %v6486_v20 = vld [vmem:[#allocation2 + $0x172] sm:$0xff] }
 0x221   : > { %v2625_v23 = vadd.f32 %v2593_v18, %v2525_v49  ;;  %v2693_v1 = vmul.f32 %v8041_v3, %v7736_v28  ;;  %v1239_v30 = vadd.f32 %v1207_v26, %v1139_v12  ;;  %v1307_v32 = vmul.f32 %v6196_v5, %v7770_v48  ;;  %8045 = vst [vmem:[#allocation40_spill] sm:$0xff] %v6484_v38  ;;  %v8047_v5 = vld [vmem:[#allocation24_spill] sm:$0xff]  ;;  %v6492_v12 = vld [vmem:[#allocation2 + $0xdb] sm:$0xff] }
 0x222   : > { %v3327_v31 = vadd.f32 %v3295_v61, %v3227_v27  ;;  %v2793_v56 = vmul.f32 %v8042_v63, %v7737_v50  ;;  %v1941_v14 = vadd.f32 %v1909_v16, %v1841_v37  ;;  %v2009_v51 = vmul.f32 %v4700_v6, %v6460_v17  ;;  %8046 = vst [vmem:[#allocation36_spill] sm:$0xff] %v6486_v20 }
 0x223   : > { %v2725_v11 = vadd.f32 %v2693_v1, %v2625_v23  ;;  %v2893_v39 = vmul.f32 %v8044_v59, %v7738_v21  ;;  %v1339_v49 = vadd.f32 %v1307_v32, %v1239_v30  ;;  %v1407_v61 = vmul.f32 %v8047_v5, %v7877_v43  ;;  %8048 = vst [vmem:[#allocation35_spill] sm:$0xff] %v6492_v12  ;;  %v6498_v23 = vld [vmem:[#allocation2 + $0x173] sm:$0xff]  ;;  %v8049_v1 = vld [vmem:[#allocation60_spill] sm:$0xff] }
 0x224   : > { %v3427_v8 = vadd.f32 %v3395_v40, %v3327_v31  ;;  %v2994_v18 = vmul.f32 %v7739_v41, %v6470_v57  ;;  %v2041_v26 = vadd.f32 %v2009_v51, %v1941_v14  ;;  %v2109_v27 = vmul.f32 %v4704_v33, %v6472_v10 }
 0x225   : > { %v2825_v37 = vadd.f32 %v2793_v56, %v2725_v11  ;;  %v3094_v16 = vmul.f32 %v4923_v35, %v6478_v2  ;;  %v1439_v3 = vadd.f32 %v1407_v61, %v1339_v49  ;;  %v1508_v30 = vmul.f32 %v8049_v1, %v7809_v22  ;;  %v6511_v11 = vld [vmem:[#allocation2 + $0x174] sm:$0xff]  ;;  %v8051_v49 = vld [vmem:[#allocation59_spill] sm:$0xff] }
 0x226   : > { %v6503_v40 = vadd.f32 %v6420_v54, %v3427_v8  ;;  %v3194_v32 = vmul.f32 %v4927_v36, %v6484_v38  ;;  %v2141_v31 = vadd.f32 %v2109_v27, %v2041_v26  ;;  %v2209_v63 = vmul.f32 %v4679_v25, %v6486_v20  ;;  %8050 = vst [vmem:[#allocation34_spill] sm:$0xff] %v6511_v11  ;;  %v958_v38 = vld [vmem:[#allocation2 + $0x98] sm:$0xff] }
 0x227   : > { %v4258_v56 = vpop.eup %4257  ;;  %v2925_v14 = vadd.f32 %v2893_v39, %v2825_v37  ;;  %v3294_v51 = vmul.f32 %v4939_v24, %v6492_v12  ;;  %v1540_v59 = vadd.f32 %v1508_v30, %v1439_v3  ;;  %v1608_v5 = vmul.f32 %v8051_v49, %v7813_v7  ;;  %v8052_v12 = vld [vmem:[#allocation62_spill] sm:$0xff] }
 0x228   : > { %v4260_v61 = vpop.eup %4259  ;;  %v3704_v8 = vmul.f32 %v4258_v56, %v6341_v58  ;;  %v3498_v1 = vsub.f32 0.0, %v6503_v40  ;;  %v2241_v26 = vadd.f32 %v2209_v63, %v2141_v31  ;;  %v2309_v27 = vmul.f32 %v7732_v52, %v6498_v23  ;;  %v1058_v3 = vld [vmem:[#allocation2 + $0x99] sm:$0xff]  ;;  %v8053_v63 = vld [vmem:[#allocation64_spill] sm:$0xff] }
 0x229   : > { %v3607_v39 = vadd.f32 1.0, %v4260_v61  ;;  %v3026_v37 = vadd.f32 %v2994_v18, %v2925_v14  ;;  %v1640_v2 = vadd.f32 %v1608_v5, %v1540_v59  ;;  %v1708_v20 = vmul.f32 %v8052_v12, %v7752_v29  ;;  %v6522_v49 = vld [vmem:[#allocation2 + $0xdc] sm:$0xff]  ;;  %v8054_v5 = vld [vmem:[#allocation61_spill] sm:$0xff] }
 0x22a   : > { %3793 = vrot.lane.b32.xlu1 %v3704_v8, %s4344_s16  ;;  %v3541_v30 = vmul.f32 1.442695, %v3498_v1  ;;  %v2341_v58 = vadd.f32 %v2309_v27, %v2241_v26  ;;  %v2409_v31 = vmul.f32 %v7733_v4, %v6511_v11  ;;  %v1808_v56 = vmul.f32 %v8053_v63, %v7753_v15  ;;  %v1158_v59 = vld [vmem:[#allocation2 + $0x9a] sm:$0xff]  ;;  %v6531_v1 = vld [vmem:[#allocation2 + $0x168] sm:$0xff] }
 0x22b   : > { %4261 = vrcp.f32 %v3607_v39  ;;  %v3126_v61 = vadd.f32 %v3094_v16, %v3026_v37  ;;  %v1740_v18 = vadd.f32 %v1708_v20, %v1640_v2  ;;  %v994_v14 = vmul.f32 %v7786_v46, %v958_v38  ;;  %8055 = vst [vmem:[#allocation49_spill] sm:$0xff] %v6531_v1  ;;  %v1258_v20 = vld [vmem:[#allocation2 + $0x9b] sm:$0xff]  ;;  %v6540_v37 = vld [vmem:[#allocation2 + $0x169] sm:$0xff] }
 0x22c   : > { %4263 = vpow2.f32 %v3541_v30  ;;  %v2441_v12 = vadd.f32 %v2409_v31, %v2341_v58  ;;  %v2510_v8 = vmul.f32 %v8054_v5, %v7734_v47  ;;  %v1094_v26 = vmul.f32 %v7868_v55, %v1058_v3  ;;  %v8056_v16 = vld [vmem:[#allocation63_spill] sm:$0xff]  ;;  %8057 = vst [vmem:[#allocation6_spill] sm:$0xff] %v6540_v37  ;;  %v8060_v5 = vld [vmem:[#allocation54_spill] sm:$0xff] }
 0x22d   : > { %v3226_v27 = vadd.f32 %v3194_v32, %v3126_v61  ;;  %v3394_v11 = vmul.f32 %v6377_v62, %v6522_v49  ;;  %v1840_v63 = vadd.f32 %v1808_v56, %v1740_v18  ;;  %v1908_v2 = vmul.f32 %v6269_v9, %v7754_v53  ;;  %v8058_v32 = vld [vmem:[#allocation65_spill] sm:$0xff]  ;;  %v6545_v61 = vld [vmem:[#allocation2 + $0x1a0] sm:$0xff] }
 0x22e   : > { %v2542_v38 = vadd.f32 %v2510_v8, %v2441_v12  ;;  %v2610_v39 = vmul.f32 %v8056_v16, %v7735_v19  ;;  %v1126_v30 = vadd.f32 %v1094_v26, %v994_v14  ;;  %v1194_v58 = vmul.f32 %v7790_v13, %v1158_v59  ;;  %8059 = vst [vmem:[#allocation38_spill] sm:$0xff] %v6545_v61  ;;  %v1358_v18 = vld [vmem:[#allocation2 + $0x9c] sm:$0xff]  ;;  %v6553_v14 = vld [vmem:[#allocation2 + $0x16a] sm:$0xff] }
 0x22f   : > { %v3326_v31 = vadd.f32 %v3294_v51, %v3226_v27  ;;  %v2710_v3 = vmul.f32 %v8058_v32, %v7736_v28  ;;  %v1940_v56 = vadd.f32 %v1908_v2, %v1840_v63  ;;  %v2008_v9 = vmul.f32 %v4700_v6, %v6531_v1  ;;  %v6551_v16 = vld [vmem:[#allocation2 + $0x1a1] sm:$0xff]  ;;  %8062 = vst [vmem:[#allocation55_spill] sm:$0xff] %v6553_v14  ;;  %v6566_v1 = vld [vmem:[#allocation2 + $0x16b] sm:$0xff] }
 0x230   : > { %v2642_v12 = vadd.f32 %v2610_v39, %v2542_v38  ;;  %v2810_v8 = vmul.f32 %v8060_v5, %v7737_v50  ;;  %8061 = vst [vmem:[#allocation39_spill] sm:$0xff] %v6551_v16  ;;  %v1226_v59 = vadd.f32 %v1194_v58, %v1126_v30  ;;  %v1294_v51 = vmul.f32 %v7770_v48, %v1258_v20  ;;  %v6558_v63 = vld [vmem:[#allocation2 + $0x1a2] sm:$0xff] }
 0x231   : > { %v3426_v26 = vadd.f32 %v3394_v11, %v3326_v31  ;;  %v2910_v27 = vmul.f32 %v6288_v42, %v7738_v21  ;;  %8063 = vst [vmem:[#allocation46_spill] sm:$0xff] %v6558_v63  ;;  %v2040_v2 = vadd.f32 %v2008_v9, %v1940_v56  ;;  %v2108_v38 = vmul.f32 %v4704_v33, %v6540_v37  ;;  %v6564_v5 = vld [vmem:[#allocation2 + $0x1a3] sm:$0xff]  ;;  %v6578_v9 = vld [vmem:[#allocation2 + $0x16c] sm:$0xff] }
 0x232   : > { %v2742_v39 = vadd.f32 %v2710_v3, %v2642_v12  ;;  %v3011_v32 = vmul.f32 %v7739_v41, %v6545_v61  ;;  %8064 = vst [vmem:[#allocation50_spill] sm:$0xff] %v6564_v5  ;;  %8065 = vst [vmem:[#allocation17_spill] sm:$0xff] %v6566_v1  ;;  %v1326_v30 = vadd.f32 %v1294_v51, %v1226_v59 }
 0x233   : > { %v1394_v11 = vmul.f32 %v7877_v43, %v1358_v18  ;;  %v6570_v20 = vadd.f32 %v6420_v54, %v3426_v26  ;;  %v3111_v42 = vmul.f32 %v4923_v35, %v6551_v16  ;;  %v2140_v58 = vadd.f32 %v2108_v38, %v2040_v2 }
 0x234   : > { %v2208_v31 = vmul.f32 %v4679_v25, %v6553_v14  ;;  %v2842_v3 = vadd.f32 %v2810_v8, %v2742_v39  ;;  %v3211_v56 = vmul.f32 %v4927_v36, %v6558_v63  ;;  %v1495_v18 = vmul.f32 %v6298_v34, %v7809_v22  ;;  %v1057_v34 = vld [vmem:[#allocation2 + $0x91] sm:$0xff] }
 0x235   : > { %v1426_v12 = vadd.f32 %v1394_v11, %v1326_v30  ;;  %v4262_v59 = vpop.eup %4261  ;;  %v3497_v51 = vsub.f32 0.0, %v6570_v20  ;;  %v3311_v26 = vmul.f32 %v4939_v24, %v6564_v5  ;;  %v2308_v38 = vmul.f32 %v7732_v52, %v6566_v1  ;;  %v957_v11 = vld [vmem:[#allocation2 + $0x90] sm:$0xff] }
 0x236   : > { %v2240_v2 = vadd.f32 %v2208_v31, %v2140_v58  ;;  %v4264_v8 = vpop.eup %4263  ;;  %v3703_v39 = vmul.f32 %v4262_v59, %v6423_v60  ;;  %v2942_v63 = vadd.f32 %v2910_v27, %v2842_v3  ;;  %v1595_v30 = vmul.f32 %v6310_v0, %v7813_v7  ;;  %v8066_v31 = vld [vmem:[#allocation66_spill] sm:$0xff]  ;;  %v8067_v27 = vld [vmem:[#allocation29_spill] sm:$0xff]  ;;  %v6597_v0 = vld [vmem:[#allocation2 + $0x1a4] sm:$0xff] }
 0x237   : > { %v1527_v16 = vadd.f32 %v1495_v18, %v1426_v12  ;;  %v3594_v61 = vadd.f32 1.0, %v4264_v8  ;;  %v3539_v14 = vmul.f32 1.442695, %v3497_v51  ;;  %v2408_v5 = vmul.f32 %v7733_v4, %v6578_v9  ;;  %v1157_v12 = vld [vmem:[#allocation2 + $0x92] sm:$0xff] }
 0x238   : > { %v2340_v37 = vadd.f32 %v2308_v38, %v2240_v2  ;;  %3791 = vrot.lane.b32.xlu0 %v3703_v39, %s4344_s16  ;;  %v3043_v58 = vadd.f32 %v3011_v32, %v2942_v63  ;;  %v2509_v1 = vmul.f32 %v8066_v31, %v7734_v47  ;;  %v1695_v3 = vmul.f32 %v8067_v27, %v7752_v29  ;;  %v8068_v63 = vld [vmem:[#allocation10_spill] sm:$0xff]  ;;  %v8069_v39 = vld [vmem:[#allocation27_spill] sm:$0xff]  ;;  %v6605_v31 = vld [vmem:[#allocation2 + $0xc8] sm:$0xff] }
 0x239   : > { %v1627_v60 = vadd.f32 %v1595_v30, %v1527_v16  ;;  %4265 = vrcp.f32 %v3594_v61  ;;  %v993_v59 = vmul.f32 %v7786_v46, %v957_v11  ;;  %v1093_v51 = vmul.f32 %v7868_v55, %v1057_v34  ;;  %v1257_v8 = vld [vmem:[#allocation2 + $0x93] sm:$0xff]  ;;  %8070 = vst [vmem:[#allocation44_spill] sm:$0xff] %v6605_v31 }
 0x23a   : > { %v2440_v18 = vadd.f32 %v2408_v5, %v2340_v37  ;;  %4267 = vpow2.f32 %v3539_v14  ;;  %v3143_v2 = vadd.f32 %v3111_v42, %v3043_v58  ;;  %v1795_v32 = vmul.f32 %v8068_v63, %v7753_v15  ;;  %v8071_v42 = vld [vmem:[#allocation48_spill] sm:$0xff]  ;;  %v1357_v58 = vld [vmem:[#allocation2 + $0x94] sm:$0xff] }
 0x23b   : > { %v1727_v38 = vadd.f32 %v1695_v3, %v1627_v60  ;;  %v2609_v30 = vmul.f32 %v8069_v39, %v7735_v19  ;;  %v1125_v61 = vadd.f32 %v1093_v51, %v993_v59  ;;  %v1193_v37 = vmul.f32 %v7790_v13, %v1157_v12  ;;  %v6614_v3 = vld [vmem:[#allocation2 + $0x198] sm:$0xff]  ;;  %v8075_v51 = vld [vmem:[#allocation47_spill] sm:$0xff]  ;;  %v8077_v39 = vld [vmem:[#allocation20_spill] sm:$0xff] }
 0x23c   : > { %v2541_v16 = vadd.f32 %v2509_v1, %v2440_v18  ;;  %v3243_v5 = vadd.f32 %v3211_v56, %v3143_v2  ;;  %v3411_v11 = vmul.f32 %v6377_v62, %v6597_v0  ;;  %v1895_v34 = vmul.f32 %v8071_v42, %v7754_v53  ;;  %v8072_v1 = vld [vmem:[#allocation28_spill] sm:$0xff]  ;;  %8073 = vst [vmem:[#allocation42_spill] sm:$0xff] %v6614_v3  ;;  %v6627_v42 = vld [vmem:[#allocation2 + $0x19a] sm:$0xff] }
 0x23d   : > { %v1827_v14 = vadd.f32 %v1795_v32, %v1727_v38  ;;  %v2709_v27 = vmul.f32 %v8072_v1, %v7736_v28  ;;  %v6616_v18 = vld [vmem:[#allocation2 + $0xc9] sm:$0xff]  ;;  %v1225_v59 = vadd.f32 %v1193_v37, %v1125_v61  ;;  %v1293_v12 = vmul.f32 %v7770_v48, %v1257_v8  ;;  %v6621_v38 = vld [vmem:[#allocation2 + $0x199] sm:$0xff]  ;;  %8078 = vst [vmem:[#allocation3_spill] sm:$0xff] %v6627_v42 }
 0x23e   : > { %v2641_v60 = vadd.f32 %v2609_v30, %v2541_v16  ;;  %8074 = vst [vmem:[#allocation5_spill] sm:$0xff] %v6616_v18  ;;  %v3343_v56 = vadd.f32 %v3311_v26, %v3243_v5  ;;  %v2809_v2 = vmul.f32 %v8075_v51, %v7737_v50  ;;  %8076 = vst [vmem:[#allocation53_spill] sm:$0xff] %v6621_v38  ;;  %v6629_v1 = vld [vmem:[#allocation2 + $0xca] sm:$0xff]  ;;  %v6634_v5 = vld [vmem:[#allocation2 + $0x19b] sm:$0xff] }
 0x23f   : > { %v1927_v63 = vadd.f32 %v1895_v34, %v1827_v14  ;;  %v1995_v32 = vmul.f32 %v4700_v6, %v6605_v31  ;;  %v2909_v30 = vmul.f32 %v8077_v39, %v7738_v21  ;;  %8079 = vst [vmem:[#allocation41_spill] sm:$0xff] %v6629_v1  ;;  %v1325_v61 = vadd.f32 %v1293_v12, %v1225_v59  ;;  %v6640_v51 = vld [vmem:[#allocation2 + $0xcb] sm:$0xff] }
 0x240   : > { %v2741_v16 = vadd.f32 %v2709_v27, %v2641_v60  ;;  %v1393_v26 = vmul.f32 %v7877_v43, %v1357_v58  ;;  %v3443_v8 = vadd.f32 %v3411_v11, %v3343_v56  ;;  %v3010_v37 = vmul.f32 %v7739_v41, %v6614_v3  ;;  %8080 = vst [vmem:[#allocation15_spill] sm:$0xff] %v6634_v5  ;;  %v8081_v59 = vld [vmem:[#allocation33_spill] sm:$0xff] }
 0x241   : > { %v2027_v14 = vadd.f32 %v1995_v32, %v1927_v63  ;;  %v2095_v34 = vmul.f32 %v4704_v33, %v6616_v18  ;;  %v3110_v27 = vmul.f32 %v4923_v35, %v6621_v38  ;;  %v1494_v58 = vmul.f32 %v8081_v59, %v7809_v22  ;;  %v6653_v38 = vld [vmem:[#allocation2 + $0xcc] sm:$0xff] }
 0x242   : > { %v2841_v60 = vadd.f32 %v2809_v2, %v2741_v16  ;;  %v1425_v39 = vadd.f32 %v1393_v26, %v1325_v61  ;;  %v6645_v11 = vadd.f32 %v6420_v54, %v3443_v8  ;;  %v3210_v12 = vmul.f32 %v4927_v36, %v6627_v42  ;;  %8082 = vst [vmem:[#allocation9_spill] sm:$0xff] %v6653_v38  ;;  %v8083_v26 = vld [vmem:[#allocation31_spill] sm:$0xff] }
 0x243   : > { %v2127_v56 = vadd.f32 %v2095_v34, %v2027_v14  ;;  %v2195_v63 = vmul.f32 %v4679_v25, %v6629_v1  ;;  %v4266_v2 = vpop.eup %4265  ;;  %v3310_v16 = vmul.f32 %v4939_v24, %v6634_v5  ;;  %v1594_v59 = vmul.f32 %v8083_v26, %v7813_v7  ;;  %v974_v1 = vld [vmem:[#allocation2 + $0x158] sm:$0xff] }
 0x244   : > { %v2941_v32 = vadd.f32 %v2909_v30, %v2841_v60  ;;  %v1526_v61 = vadd.f32 %v1494_v58, %v1425_v39  ;;  %v4268_v8 = vpop.eup %4267  ;;  %v3690_v3 = vmul.f32 %v4266_v2, %v6503_v40  ;;  %v3514_v42 = vsub.f32 0.0, %v6645_v11  ;;  %v8084_v5 = vld [vmem:[#allocation22_spill] sm:$0xff] }
 0x245   : > { %v2227_v14 = vadd.f32 %v2195_v63, %v2127_v56  ;;  %v2295_v34 = vmul.f32 %v7732_v52, %v6640_v51  ;;  %v3593_v30 = vadd.f32 1.0, %v4268_v8  ;;  %v1694_v31 = vmul.f32 %v8084_v5, %v7752_v29  ;;  %v1074_v39 = vld [vmem:[#allocation2 + $0x159] sm:$0xff] }
 0x246   : > { %v3042_v60 = vadd.f32 %v3010_v37, %v2941_v32  ;;  %v1626_v18 = vadd.f32 %v1594_v59, %v1526_v61  ;;  %3765 = vrot.lane.b32.xlu1 %v3690_v3, %s4344_s16  ;;  %v3573_v58 = vmul.f32 1.442695, %v3514_v42  ;;  %v6664_v26 = vld [vmem:[#allocation2 + $0x19c] sm:$0xff]  ;;  %v2395_v56 = vmul.f32 %v7733_v4, %v6653_v38  ;;  %v8086_v3 = vld [vmem:[#allocation13_spill] sm:$0xff] }
 0x247   : > { %v2327_v40 = vadd.f32 %v2295_v34, %v2227_v14  ;;  %v8085_v63 = vld [vmem:[#allocation7_spill] sm:$0xff]  ;;  %4269 = vrcp.f32 %v3593_v30  ;;  %v1010_v32 = vmul.f32 %v7786_v46, %v974_v1  ;;  %v2496_v42 = vmul.f32 %v8086_v3, %v7734_v47  ;;  %v8092_v3 = vld [vmem:[#allocation37_spill] sm:$0xff] }
 0x248   : > { %v1794_v2 = vmul.f32 %v8085_v63, %v7753_v15  ;;  %v3142_v8 = vadd.f32 %v3110_v27, %v3042_v60  ;;  %v1726_v37 = vadd.f32 %v1694_v31, %v1626_v18  ;;  %v1174_v61 = vld [vmem:[#allocation2 + $0x15a] sm:$0xff]  ;;  %4271 = vpow2.f32 %v3573_v58 }
 0x249   : > { %v2427_v5 = vadd.f32 %v2395_v56, %v2327_v40  ;;  %v6673_v59 = vld [vmem:[#allocation2 + $0xc0] sm:$0xff]  ;;  %v1110_v14 = vmul.f32 %v7868_v55, %v1074_v39  ;;  %v3410_v38 = vmul.f32 %v6377_v62, %v6664_v26  ;;  %v1894_v31 = vmul.f32 %v6431_v44, %v7754_v53  ;;  %v8088_v27 = vld [vmem:[#allocation30_spill] sm:$0xff] }
 0x24a   : > { %8087 = vst [vmem:[#allocation45_spill] sm:$0xff] %v6673_v59  ;;  %v3242_v34 = vadd.f32 %v3210_v12, %v3142_v8  ;;  %v1826_v63 = vadd.f32 %v1794_v2, %v1726_v37  ;;  %v1274_v18 = vld [vmem:[#allocation2 + $0x15b] sm:$0xff]  ;;  %v2596_v30 = vmul.f32 %v8088_v27, %v7735_v19  ;;  %v1210_v40 = vmul.f32 %v7790_v13, %v1174_v61  ;;  %v8090_v12 = vld [vmem:[#allocation32_spill] sm:$0xff] }
 0x24b   : > { %v2528_v1 = vadd.f32 %v2496_v42, %v2427_v5  ;;  %v6682_v60 = vld [vmem:[#allocation2 + $0xc1] sm:$0xff]  ;;  %v1142_v58 = vadd.f32 %v1110_v14, %v1010_v32  ;;  %v2696_v39 = vmul.f32 %v8090_v12, %v7736_v28  ;;  %v6687_v8 = vld [vmem:[#allocation2 + $0xf8] sm:$0xff]  ;;  %v1994_v44 = vmul.f32 %v4700_v6, %v6673_v59 }
 0x24c   : > { %8089 = vst [vmem:[#allocation52_spill] sm:$0xff] %v6682_v60  ;;  %v3342_v56 = vadd.f32 %v3310_v16, %v3242_v34  ;;  %8091 = vst [vmem:[#allocation19_spill] sm:$0xff] %v6687_v8  ;;  %v1926_v2 = vadd.f32 %v1894_v31, %v1826_v63  ;;  %v1374_v37 = vld [vmem:[#allocation2 + $0x15c] sm:$0xff]  ;;  %v2796_v42 = vmul.f32 %v8092_v3, %v7737_v50 }
 0x24d   : > { %v2628_v5 = vadd.f32 %v2596_v30, %v2528_v1  ;;  %v6693_v27 = vld [vmem:[#allocation2 + $0xf9] sm:$0xff]  ;;  %v6695_v32 = vld [vmem:[#allocation2 + $0xc2] sm:$0xff]  ;;  %v1242_v61 = vadd.f32 %v1210_v40, %v1142_v58  ;;  %v1310_v16 = vmul.f32 %v7770_v48, %v1274_v18  ;;  %v2896_v34 = vmul.f32 %v6450_v45, %v7738_v21 }
 0x24e   : > { %8093 = vst [vmem:[#allocation14_spill] sm:$0xff] %v6693_v27  ;;  %8094 = vst [vmem:[#allocation26_spill] sm:$0xff] %v6695_v32  ;;  %v3442_v14 = vadd.f32 %v3410_v38, %v3342_v56  ;;  %v6700_v63 = vld [vmem:[#allocation2 + $0xfa] sm:$0xff]  ;;  %v2026_v31 = vadd.f32 %v1994_v44, %v1926_v2  ;;  %v2094_v1 = vmul.f32 %v4704_v33, %v6682_v60  ;;  %v6708_v59 = vld [vmem:[#allocation2 + $0xc3] sm:$0xff] }
 0x24f   : > { %8095 = vst [vmem:[#allocation57_spill] sm:$0xff] %v6700_v63  ;;  %v2728_v30 = vadd.f32 %v2696_v39, %v2628_v5  ;;  %v2997_v12 = vmul.f32 %v7739_v41, %v6687_v8  ;;  %v6706_v3 = vld [vmem:[#allocation2 + $0xfb] sm:$0xff]  ;;  %v1342_v58 = vadd.f32 %v1310_v16, %v1242_v61  ;;  %v1410_v38 = vmul.f32 %v7877_v43, %v1374_v37  ;;  %v6720_v44 = vld [vmem:[#allocation2 + $0xc4] sm:$0xff] }
 0x250   : > { %8096 = vst [vmem:[#allocation56_spill] sm:$0xff] %v6706_v3  ;;  %v6712_v18 = vadd.f32 %v6420_v54, %v3442_v14  ;;  %v3097_v45 = vmul.f32 %v4923_v35, %v6693_v27  ;;  %v2126_v40 = vadd.f32 %v2094_v1, %v2026_v31  ;;  %v2194_v56 = vmul.f32 %v4679_v25, %v6695_v32 }
 0x251   : > { %v2828_v39 = vadd.f32 %v2796_v42, %v2728_v30  ;;  %v3197_v2 = vmul.f32 %v4927_v36, %v6700_v63  ;;  %v1442_v5 = vadd.f32 %v1410_v38, %v1342_v58  ;;  %v1511_v37 = vmul.f32 %v6460_v17, %v7809_v22  ;;  %v4270_v61 = vpop.eup %4269  ;;  %v973_v38 = vld [vmem:[#allocation2 + $0x150] sm:$0xff] }
 0x252   : > { %v3513_v16 = vsub.f32 0.0, %v6712_v18  ;;  %v3297_v14 = vmul.f32 %v4939_v24, %v6706_v3  ;;  %v2226_v31 = vadd.f32 %v2194_v56, %v2126_v40  ;;  %v2294_v1 = vmul.f32 %v7732_v52, %v6708_v59  ;;  %v4272_v42 = vpop.eup %4271  ;;  %v1073_v17 = vld [vmem:[#allocation2 + $0x151] sm:$0xff] }
 0x253   : > { %v3689_v30 = vmul.f32 %v4270_v61, %v6570_v20  ;;  %v2928_v63 = vadd.f32 %v2896_v34, %v2828_v39  ;;  %v1543_v27 = vadd.f32 %v1511_v37, %v1442_v5  ;;  %v1611_v58 = vmul.f32 %v6472_v10, %v7813_v7  ;;  %v8097_v34 = vld [vmem:[#allocation36_spill] sm:$0xff]  ;;  %v1173_v5 = vld [vmem:[#allocation2 + $0x152] sm:$0xff]  ;;  %v6739_v10 = vld [vmem:[#allocation2 + $0xfc] sm:$0xff] }
 0x254   : > { %v3610_v8 = vadd.f32 1.0, %v4272_v42  ;;  %v3571_v32 = vmul.f32 1.442695, %v3513_v16  ;;  %v2326_v60 = vadd.f32 %v2294_v1, %v2226_v31  ;;  %v2394_v3 = vmul.f32 %v7733_v4, %v6720_v44  ;;  %8098 = vst [vmem:[#allocation23_spill] sm:$0xff] %v6739_v10 }
 0x255   : > { %3763 = vrot.lane.b32.xlu0 %v3689_v30, %s4344_s16  ;;  %v3029_v40 = vadd.f32 %v2997_v12, %v2928_v63  ;;  %v2495_v56 = vmul.f32 %v6470_v57, %v7734_v47  ;;  %v1643_v20 = vadd.f32 %v1611_v58, %v1543_v27  ;;  %v1711_v39 = vmul.f32 %v8097_v34, %v7752_v29  ;;  %v1273_v57 = vld [vmem:[#allocation2 + $0x153] sm:$0xff]  ;;  %v8099_v12 = vld [vmem:[#allocation51_spill] sm:$0xff]  ;;  %v1975_v30 = vld [vmem:[#allocation2 + $0x188] sm:$0xff] }
 0x256   : > { %4273 = vrcp.f32 %v3610_v8  ;;  %v2426_v37 = vadd.f32 %v2394_v3, %v2326_v60  ;;  %v1009_v61 = vmul.f32 %v7786_v46, %v973_v38  ;;  %v1109_v16 = vmul.f32 %v7868_v55, %v1073_v17  ;;  %v1373_v17 = vld [vmem:[#allocation2 + $0x154] sm:$0xff]  ;;  %v2075_v34 = vld [vmem:[#allocation2 + $0x189] sm:$0xff] }
 0x257   : > { %4275 = vpow2.f32 %v3571_v32  ;;  %v3129_v31 = vadd.f32 %v3097_v45, %v3029_v40  ;;  %v1743_v1 = vadd.f32 %v1711_v39, %v1643_v20  ;;  %v1811_v63 = vmul.f32 %v6498_v23, %v7753_v15  ;;  %v8100_v32 = vld [vmem:[#allocation34_spill] sm:$0xff]  ;;  %v8101_v23 = vld [vmem:[#allocation40_spill] sm:$0xff]  ;;  %v6754_v20 = vld [vmem:[#allocation2 + $0xf0] sm:$0xff] }
 0x258   : > { %v2527_v27 = vadd.f32 %v2495_v56, %v2426_v37  ;;  %v2595_v42 = vmul.f32 %v8099_v12, %v7735_v19  ;;  %v1141_v8 = vadd.f32 %v1109_v16, %v1009_v61  ;;  %v1209_v58 = vmul.f32 %v7790_v13, %v1173_v5  ;;  %8102 = vst [vmem:[#allocation8_spill] sm:$0xff] %v6754_v20  ;;  %v6759_v16 = vld [vmem:[#allocation2 + $0xf1] sm:$0xff] }
 0x259   : > { %v3229_v60 = vadd.f32 %v3197_v2, %v3129_v31  ;;  %v3397_v3 = vmul.f32 %v6377_v62, %v6739_v10  ;;  %v1843_v38 = vadd.f32 %v1811_v63, %v1743_v1  ;;  %v1911_v45 = vmul.f32 %v8100_v32, %v7754_v53  ;;  %v8103_v2 = vld [vmem:[#allocation35_spill] sm:$0xff]  ;;  %8104 = vst [vmem:[#allocation58_spill] sm:$0xff] %v6759_v16  ;;  %v6764_v12 = vld [vmem:[#allocation2 + $0xf2] sm:$0xff] }
 0x25a   : > { %v2627_v40 = vadd.f32 %v2595_v42, %v2527_v27  ;;  %v2695_v56 = vmul.f32 %v8101_v23, %v7736_v28  ;;  %v1241_v39 = vadd.f32 %v1209_v58, %v1141_v8  ;;  %v1309_v37 = vmul.f32 %v7770_v48, %v1273_v57  ;;  %8105 = vst [vmem:[#allocation24_spill] sm:$0xff] %v6764_v12  ;;  %v2175_v42 = vld [vmem:[#allocation2 + $0x18a] sm:$0xff]  ;;  %v6769_v58 = vld [vmem:[#allocation2 + $0xf3] sm:$0xff] }
 0x25b   : > { %v3329_v5 = vadd.f32 %v3297_v14, %v3229_v60  ;;  %v2795_v61 = vmul.f32 %v8103_v2, %v7737_v50  ;;  %v1943_v31 = vadd.f32 %v1911_v45, %v1843_v38  ;;  %v2011_v1 = vmul.f32 %v4700_v6, %v1975_v30  ;;  %8106 = vst [vmem:[#allocation60_spill] sm:$0xff] %v6769_v58  ;;  %v8107_v23 = vld [vmem:[#allocation49_spill] sm:$0xff] }
 0x25c   : > { %v2727_v63 = vadd.f32 %v2695_v56, %v2627_v40  ;;  %v2895_v27 = vmul.f32 %v6522_v49, %v7738_v21  ;;  %v1341_v32 = vadd.f32 %v1309_v37, %v1241_v39  ;;  %v1409_v8 = vmul.f32 %v7877_v43, %v1373_v17  ;;  %v2275_v49 = vld [vmem:[#allocation2 + $0x18b] sm:$0xff] }
 0x25d   : > { %v3429_v57 = vadd.f32 %v3397_v3, %v3329_v5  ;;  %v2996_v14 = vmul.f32 %v7739_v41, %v6754_v20  ;;  %v2043_v60 = vadd.f32 %v2011_v1, %v1943_v31  ;;  %v2111_v38 = vmul.f32 %v4704_v33, %v2075_v34  ;;  %v8108_v1 = vld [vmem:[#allocation6_spill] sm:$0xff] }
 0x25e   : > { %v2827_v30 = vadd.f32 %v2795_v61, %v2727_v63  ;;  %v3096_v45 = vmul.f32 %v4923_v35, %v6759_v16  ;;  %v1441_v40 = vadd.f32 %v1409_v8, %v1341_v32  ;;  %v1510_v56 = vmul.f32 %v8107_v23, %v7809_v22  ;;  %v2375_v61 = vld [vmem:[#allocation2 + $0x18c] sm:$0xff] }
 0x25f   : > { %v6777_v17 = vadd.f32 %v6420_v54, %v3429_v57  ;;  %v3196_v3 = vmul.f32 %v4927_v36, %v6764_v12  ;;  %v2143_v39 = vadd.f32 %v2111_v38, %v2043_v60  ;;  %v2211_v37 = vmul.f32 %v4679_v25, %v2175_v42  ;;  %v960_v38 = vld [vmem:[#allocation2 + $0xb0] sm:$0xff] }
 0x260   : > { %v4274_v5 = vpop.eup %4273  ;;  %v2927_v34 = vadd.f32 %v2895_v27, %v2827_v30  ;;  %v3296_v2 = vmul.f32 %v4939_v24, %v6769_v58  ;;  %v1542_v31 = vadd.f32 %v1510_v56, %v1441_v40  ;;  %v1610_v63 = vmul.f32 %v8108_v1, %v7813_v7  ;;  %v8109_v30 = vld [vmem:[#allocation55_spill] sm:$0xff]  ;;  %v1060_v16 = vld [vmem:[#allocation2 + $0xb1] sm:$0xff] }
 0x261   : > { %v4276_v32 = vpop.eup %4275  ;;  %v3706_v8 = vmul.f32 %v4274_v5, %v6645_v11  ;;  %v3500_v57 = vsub.f32 0.0, %v6777_v17  ;;  %v2243_v23 = vadd.f32 %v2211_v37, %v2143_v39  ;;  %v2311_v60 = vmul.f32 %v7732_v52, %v2275_v49  ;;  %v6792_v56 = vld [vmem:[#allocation2 + $0xf4] sm:$0xff] }
 0x262   : > { %v3609_v42 = vadd.f32 1.0, %v4276_v32  ;;  %v3028_v12 = vadd.f32 %v2996_v14, %v2927_v34  ;;  %v1642_v27 = vadd.f32 %v1610_v63, %v1542_v31  ;;  %v1710_v58 = vmul.f32 %v8109_v30, %v7752_v29  ;;  %8110 = vst [vmem:[#allocation59_spill] sm:$0xff] %v6792_v56  ;;  %v8111_v39 = vld [vmem:[#allocation17_spill] sm:$0xff]  ;;  %v8112_v63 = vld [vmem:[#allocation38_spill] sm:$0xff] }
 0x263   : > { %3797 = vrot.lane.b32.xlu1 %v3706_v8, %s4344_s16  ;;  %v3545_v40 = vmul.f32 1.442695, %v3500_v57  ;;  %v2343_v1 = vadd.f32 %v2311_v60, %v2243_v23  ;;  %v2411_v11 = vmul.f32 %v7733_v4, %v2375_v61  ;;  %v1810_v37 = vmul.f32 %v8111_v39, %v7753_v15  ;;  %v1160_v34 = vld [vmem:[#allocation2 + $0xb2] sm:$0xff]  ;;  %v1974_v8 = vld [vmem:[#allocation2 + $0x180] sm:$0xff] }
 0x264   : > { %4277 = vrcp.f32 %v3609_v42  ;;  %v3128_v49 = vadd.f32 %v3096_v45, %v3028_v12  ;;  %v1742_v5 = vadd.f32 %v1710_v58, %v1642_v27  ;;  %v996_v14 = vmul.f32 %v7786_v46, %v960_v38  ;;  %v1260_v58 = vld [vmem:[#allocation2 + $0xb3] sm:$0xff]  ;;  %v8113_v38 = vld [vmem:[#allocation39_spill] sm:$0xff] }
 0x265   : > { %4279 = vpow2.f32 %v3545_v40  ;;  %v2443_v31 = vadd.f32 %v2411_v11, %v2343_v1  ;;  %v2512_v32 = vmul.f32 %v8112_v63, %v7734_v47  ;;  %v1096_v57 = vmul.f32 %v7868_v55, %v1060_v16  ;;  %v2074_v27 = vld [vmem:[#allocation2 + $0x181] sm:$0xff]  ;;  %v8114_v16 = vld [vmem:[#allocation46_spill] sm:$0xff] }
 0x266   : > { %v3228_v23 = vadd.f32 %v3196_v3, %v3128_v49  ;;  %v3396_v61 = vmul.f32 %v6377_v62, %v6792_v56  ;;  %v1842_v60 = vadd.f32 %v1810_v37, %v1742_v5  ;;  %v1910_v12 = vmul.f32 %v6578_v9, %v7754_v53  ;;  %v2977_v11 = vld [vmem:[#allocation2 + $0x1b8] sm:$0xff]  ;;  %v2174_v63 = vld [vmem:[#allocation2 + $0x182] sm:$0xff] }
 0x267   : > { %v2544_v45 = vadd.f32 %v2512_v32, %v2443_v31  ;;  %v2612_v42 = vmul.f32 %v8113_v38, %v7735_v19  ;;  %v1128_v30 = vadd.f32 %v1096_v57, %v996_v14  ;;  %v1196_v40 = vmul.f32 %v7790_v13, %v1160_v34  ;;  %v1360_v37 = vld [vmem:[#allocation2 + $0xb4] sm:$0xff]  ;;  %v2274_v38 = vld [vmem:[#allocation2 + $0x183] sm:$0xff] }
 0x268   : > { %v3328_v1 = vadd.f32 %v3296_v2, %v3228_v23  ;;  %v2712_v3 = vmul.f32 %v8114_v16, %v7736_v28  ;;  %v1942_v39 = vadd.f32 %v1910_v12, %v1842_v60  ;;  %v2010_v62 = vmul.f32 %v4700_v6, %v1974_v8  ;;  %v8115_v9 = vld [vmem:[#allocation50_spill] sm:$0xff] }
 0x269   : > { %v2644_v49 = vadd.f32 %v2612_v42, %v2544_v45  ;;  %v2812_v5 = vmul.f32 %v8115_v9, %v7737_v50  ;;  %v3077_v31 = vld [vmem:[#allocation2 + $0x1b9] sm:$0xff]  ;;  %v1228_v32 = vadd.f32 %v1196_v40, %v1128_v30  ;;  %v1296_v14 = vmul.f32 %v7770_v48, %v1260_v58 }
 0x26a   : > { %v3428_v57 = vadd.f32 %v3396_v61, %v3328_v1  ;;  %v2912_v2 = vmul.f32 %v6597_v0, %v7738_v21  ;;  %v3177_v34 = vld [vmem:[#allocation2 + $0x1ba] sm:$0xff]  ;;  %v2042_v23 = vadd.f32 %v2010_v62, %v1942_v39  ;;  %v2110_v60 = vmul.f32 %v4704_v33, %v2074_v27  ;;  %v2374_v27 = vld [vmem:[#allocation2 + $0x184] sm:$0xff] }
 0x26b   : > { %v2744_v12 = vadd.f32 %v2712_v3, %v2644_v49  ;;  %v3013_v8 = vmul.f32 %v7739_v41, %v2977_v11  ;;  %v3277_v45 = vld [vmem:[#allocation2 + $0x1bb] sm:$0xff]  ;;  %v1328_v42 = vadd.f32 %v1296_v14, %v1228_v32  ;;  %v1396_v16 = vmul.f32 %v7877_v43, %v1360_v37  ;;  %v8116_v11 = vld [vmem:[#allocation44_spill] sm:$0xff]  ;;  %v8117_v14 = vld [vmem:[#allocation5_spill] sm:$0xff] }
 0x26c   : > { %v6820_v30 = vadd.f32 %v6420_v54, %v3428_v57  ;;  %v3113_v61 = vmul.f32 %v4923_v35, %v3077_v31  ;;  %v2142_v58 = vadd.f32 %v2110_v60, %v2042_v23  ;;  %v2210_v0 = vmul.f32 %v4679_v25, %v2174_v63  ;;  %v1059_v23 = vld [vmem:[#allocation2 + $0xa9] sm:$0xff] }
 0x26d   : > { %v2844_v40 = vadd.f32 %v2812_v5, %v2744_v12  ;;  %v3213_v1 = vmul.f32 %v4927_v36, %v3177_v34  ;;  %v1428_v3 = vadd.f32 %v1396_v16, %v1328_v42  ;;  %v1497_v39 = vmul.f32 %v8116_v11, %v7809_v22  ;;  %v959_v34 = vld [vmem:[#allocation2 + $0xa8] sm:$0xff] }
 0x26e   : > { %v4278_v62 = vpop.eup %4277  ;;  %v3499_v49 = vsub.f32 0.0, %v6820_v30  ;;  %v3313_v37 = vmul.f32 %v4939_v24, %v3277_v45  ;;  %v2242_v54 = vadd.f32 %v2210_v0, %v2142_v58  ;;  %v2310_v9 = vmul.f32 %v7732_v52, %v2274_v38  ;;  %v8118_v38 = vld [vmem:[#allocation42_spill] sm:$0xff] }
 0x26f   : > { %v4280_v31 = vpop.eup %4279  ;;  %v3705_v32 = vmul.f32 %v4278_v62, %v6712_v18  ;;  %v2944_v63 = vadd.f32 %v2912_v2, %v2844_v40  ;;  %v1529_v5 = vadd.f32 %v1497_v39, %v1428_v3  ;;  %v1597_v57 = vmul.f32 %v8117_v14, %v7813_v7  ;;  %v8119_v18 = vld [vmem:[#allocation41_spill] sm:$0xff]  ;;  %v3377_v3 = vld [vmem:[#allocation2 + $0x1bc] sm:$0xff] }
 0x270   : > { %v3596_v60 = vadd.f32 1.0, %v4280_v31  ;;  %v3543_v12 = vmul.f32 1.442695, %v3499_v49  ;;  %v2342_v42 = vadd.f32 %v2310_v9, %v2242_v54  ;;  %v2410_v16 = vmul.f32 %v7733_v4, %v2374_v27  ;;  %v1159_v40 = vld [vmem:[#allocation2 + $0xaa] sm:$0xff] }
 0x271   : > { %3795 = vrot.lane.b32.xlu0 %v3705_v32, %s4344_s16  ;;  %v3045_v45 = vadd.f32 %v3013_v8, %v2944_v63  ;;  %v2511_v58 = vmul.f32 %v8118_v38, %v7734_v47  ;;  %v1629_v0 = vadd.f32 %v1597_v57, %v1529_v5  ;;  %v1697_v2 = vmul.f32 %v8119_v18, %v7752_v29  ;;  %v1259_v9 = vld [vmem:[#allocation2 + $0xab] sm:$0xff]  ;;  %v6845_v5 = vld [vmem:[#allocation2 + $0xe0] sm:$0xff] }
 0x272   : > { %4281 = vrcp.f32 %v3596_v60  ;;  %v2442_v39 = vadd.f32 %v2410_v16, %v2342_v42  ;;  %v995_v62 = vmul.f32 %v7786_v46, %v959_v34  ;;  %v1095_v49 = vmul.f32 %v7868_v55, %v1059_v23  ;;  %v8120_v32 = vld [vmem:[#allocation53_spill] sm:$0xff]  ;;  %8121 = vst [vmem:[#allocation62_spill] sm:$0xff] %v6845_v5  ;;  %v6851_v34 = vld [vmem:[%s7401_s3 + $0x18] ss:$0 sm:$0xff] }
 0x273   : > { %4283 = vpow2.f32 %v3543_v12  ;;  %v3145_v27 = vadd.f32 %v3113_v61, %v3045_v45  ;;  %v1729_v54 = vadd.f32 %v1697_v2, %v1629_v0  ;;  %v1797_v8 = vmul.f32 %v6640_v51, %v7753_v15  ;;  %v8122_v12 = vld [vmem:[#allocation9_spill] sm:$0xff] }
 0x274   : > { %v2543_v31 = vadd.f32 %v2511_v58, %v2442_v39  ;;  %v2611_v63 = vmul.f32 %v8120_v32, %v7735_v19  ;;  %v1127_v57 = vadd.f32 %v1095_v49, %v995_v62  ;;  %v1195_v60 = vmul.f32 %v7790_v13, %v1159_v40  ;;  %v1359_v45 = vld [vmem:[#allocation2 + $0xac] sm:$0xff]  ;;  %v8123_v58 = vld [vmem:[#allocation3_spill] sm:$0xff] }
 0x275   : > { %v3245_v42 = vadd.f32 %v3213_v1, %v3145_v27  ;;  %v3413_v61 = vmul.f32 %v6851_v34, %v3377_v3  ;;  %v1829_v23 = vadd.f32 %v1797_v8, %v1729_v54  ;;  %v1897_v16 = vmul.f32 %v8122_v12, %v7754_v53  ;;  %v2976_v2 = vld [vmem:[#allocation2 + $0x1b0] sm:$0xff]  ;;  %v6858_v39 = vld [vmem:[#allocation2 + $0xe1] sm:$0xff] }
 0x276   : > { %v2643_v38 = vadd.f32 %v2611_v63, %v2543_v31  ;;  %v2711_v0 = vmul.f32 %v8123_v58, %v7736_v28  ;;  %v1227_v1 = vadd.f32 %v1195_v60, %v1127_v57  ;;  %v1295_v40 = vmul.f32 %v7770_v48, %v1259_v9  ;;  %v8124_v49 = vld [vmem:[#allocation15_spill] sm:$0xff]  ;;  %v3076_v3 = vld [vmem:[#allocation2 + $0x1b1] sm:$0xff] }
 0x277   : > { %v3345_v62 = vadd.f32 %v3313_v37, %v3245_v42  ;;  %v2811_v27 = vmul.f32 %v8124_v49, %v7737_v50  ;;  %v1929_v54 = vadd.f32 %v1897_v16, %v1829_v23  ;;  %v1997_v8 = vmul.f32 %v4700_v6, %v6845_v5  ;;  %v3176_v63 = vld [vmem:[#allocation2 + $0x1b2] sm:$0xff]  ;;  %v6867_v58 = vld [vmem:[#allocation2 + $0xe2] sm:$0xff] }
 0x278   : > { %v2743_v32 = vadd.f32 %v2711_v0, %v2643_v38  ;;  %v2911_v31 = vmul.f32 %v6664_v26, %v7738_v21  ;;  %8125 = vst [vmem:[#allocation64_spill] sm:$0xff] %v6867_v58  ;;  %v1327_v56 = vadd.f32 %v1295_v40, %v1227_v1  ;;  %v1395_v57 = vmul.f32 %v7877_v43, %v1359_v45  ;;  %v3276_v60 = vld [vmem:[#allocation2 + $0x1b3] sm:$0xff]  ;;  %v6874_v0 = vld [vmem:[#allocation2 + $0xe3] sm:$0xff] }
 0x279   : > { %v3445_v9 = vadd.f32 %v3413_v61, %v3345_v62  ;;  %v3012_v37 = vmul.f32 %v7739_v41, %v2976_v2  ;;  %v2029_v42 = vadd.f32 %v1997_v8, %v1929_v54  ;;  %v2097_v23 = vmul.f32 %v4704_v33, %v6858_v39  ;;  %v8126_v49 = vld [vmem:[#allocation45_spill] sm:$0xff]  ;;  %v6881_v61 = vld [vmem:[%s7402_s4] ss:$0 sm:$0xff]  ;;  %v8128_v8 = vld [vmem:[#allocation52_spill] sm:$0xff] }
 0x27a   : > { %v2843_v16 = vadd.f32 %v2811_v27, %v2743_v32  ;;  %v3112_v38 = vmul.f32 %v4923_v35, %v3076_v3  ;;  %v1427_v26 = vadd.f32 %v1395_v57, %v1327_v56  ;;  %v1496_v20 = vmul.f32 %v8126_v49, %v7809_v22  ;;  %v6890_v3 = vld [vmem:[#allocation2 + $0xe4] sm:$0xff] }
 0x27b   : > { %v6884_v45 = vadd.f32 %v6881_v61, %v3445_v9  ;;  %v3212_v2 = vmul.f32 %v4927_v36, %v3176_v63  ;;  %v2129_v1 = vadd.f32 %v2097_v23, %v2029_v42  ;;  %v2197_v40 = vmul.f32 %v4679_v25, %v6867_v58 }
 0x27c   : > { %v4282_v62 = vpop.eup %4281  ;;  %v2943_v27 = vadd.f32 %v2911_v31, %v2843_v16  ;;  %v3312_v56 = vmul.f32 %v4939_v24, %v3276_v60  ;;  %v1528_v54 = vadd.f32 %v1496_v20, %v1427_v26  ;;  %v1596_v32 = vmul.f32 %v8128_v8, %v7813_v7  ;;  %v8129_v60 = vld [vmem:[#allocation26_spill] sm:$0xff] }
 0x27d   : > { %8127 = vst [vmem:[#allocation61_spill] sm:$0xff] %v6884_v45  ;;  %v4284_v57 = vpop.eup %4283  ;;  %v3692_v9 = vmul.f32 %v4282_v62, %v6777_v17  ;;  %v3516_v49 = vsub.f32 0.0, %v6884_v45  ;;  %v2229_v63 = vadd.f32 %v2197_v40, %v2129_v1  ;;  %v2297_v42 = vmul.f32 %v7732_v52, %v6874_v0  ;;  %v3376_v26 = vld [vmem:[#allocation2 + $0x1b4] sm:$0xff] }
 0x27e   : > { %v3595_v23 = vadd.f32 1.0, %v4284_v57  ;;  %v3044_v58 = vadd.f32 %v3012_v37, %v2943_v27  ;;  %v1628_v31 = vadd.f32 %v1596_v32, %v1528_v54  ;;  %v1696_v16 = vmul.f32 %v8129_v60, %v7752_v29  ;;  %v8130_v54 = vld [vmem:[#allocation19_spill] sm:$0xff] }
 0x27f   : > { %3769 = vrot.lane.b32.xlu1 %v3692_v9, %s4344_s16  ;;  %v3577_v20 = vmul.f32 1.442695, %v3516_v49  ;;  %v2329_v24 = vadd.f32 %v2297_v42, %v2229_v63  ;;  %v2397_v17 = vmul.f32 %v7733_v4, %v6890_v3  ;;  %v1796_v1 = vmul.f32 %v6708_v59, %v7753_v15  ;;  %v6909_v49 = vld [vmem:[#allocation2 + $0xd8] sm:$0xff] }
 0x280   : > { %4285 = vrcp.f32 %v3595_v23  ;;  %v3144_v40 = vadd.f32 %v3112_v38, %v3044_v58  ;;  %v1728_v62 = vadd.f32 %v1696_v16, %v1628_v31  ;;  %v998_v37 = vmul.f32 %v8116_v11, %v7786_v46  ;;  %8131 = vst [vmem:[#allocation63_spill] sm:$0xff] %v6909_v49  ;;  %v8132_v11 = vld [vmem:[#allocation14_spill] sm:$0xff] }
 0x281   : > { %4287 = vpow2.f32 %v3577_v20  ;;  %v2429_v27 = vadd.f32 %v2397_v17, %v2329_v24  ;;  %v2498_v32 = vmul.f32 %v8130_v54, %v7734_v47  ;;  %v1098_v57 = vmul.f32 %v8117_v14, %v7868_v55  ;;  %v6918_v24 = vld [vmem:[#allocation2 + $0xd9] sm:$0xff]  ;;  %v8133_v20 = vld [vmem:[#allocation21_spill] sm:$0xff] }
 0x282   : > { %v3244_v9 = vadd.f32 %v3212_v2, %v3144_v40  ;;  %v3412_v63 = vmul.f32 %v6851_v34, %v3376_v26  ;;  %v1828_v42 = vadd.f32 %v1796_v1, %v1728_v62  ;;  %v1896_v58 = vmul.f32 %v6720_v44, %v7754_v53  ;;  %v8134_v17 = vld [vmem:[#allocation18_spill] sm:$0xff]  ;;  %v8136_v62 = vld [vmem:[#allocation57_spill] sm:$0xff] }
 0x283   : > { %v2530_v38 = vadd.f32 %v2498_v32, %v2429_v27  ;;  %v2598_v23 = vmul.f32 %v8132_v11, %v7735_v19  ;;  %v1130_v31 = vadd.f32 %v1098_v57, %v998_v37  ;;  %v1198_v16 = vmul.f32 %v8119_v18, %v7790_v13  ;;  %v6930_v32 = vld [vmem:[#allocation2 + $0x110] sm:$0xff]  ;;  %v6932_v45 = vld [vmem:[#allocation2 + $0xda] sm:$0xff] }
 0x284   : > { %v6924_v14 = vadd.f32 %v8134_v17, %v8133_v20  ;;  %v3344_v2 = vadd.f32 %v3312_v56, %v3244_v9  ;;  %v1928_v26 = vadd.f32 %v1896_v58, %v1828_v42  ;;  %v1996_v1 = vmul.f32 %v4700_v6, %v6909_v49  ;;  %8137 = vst [vmem:[#allocation54_spill] sm:$0xff] %v6930_v32  ;;  %v8139_v20 = vld [vmem:[#allocation56_spill] sm:$0xff]  ;;  %v6938_v9 = vld [vmem:[#allocation2 + $0x111] sm:$0xff] }
 0x285   : > { %v2630_v40 = vadd.f32 %v2598_v23, %v2530_v38  ;;  %v2698_v27 = vmul.f32 %v8136_v62, %v7736_v28  ;;  %8138 = vst [vmem:[#allocation66_spill] sm:$0xff] %v6932_v45  ;;  %v1230_v37 = vadd.f32 %v1198_v16, %v1130_v31  ;;  %v1298_v18 = vmul.f32 %v6640_v51, %v7770_v48  ;;  %v6944_v17 = vld [vmem:[#allocation2 + $0x112] sm:$0xff]  ;;  %v6946_v31 = vld [vmem:[#allocation2 + $0xdb] sm:$0xff] }
 0x286   : > { %8135 = vst [vmem:[#allocation65_spill] sm:$0xff] %v6924_v14  ;;  %v3444_v57 = vadd.f32 %v3412_v63, %v3344_v2  ;;  %v2798_v56 = vmul.f32 %v8139_v20, %v7737_v50  ;;  %8140 = vst [vmem:[#allocation29_spill] sm:$0xff] %v6938_v9  ;;  %v2028_v42 = vadd.f32 %v1996_v1, %v1928_v26  ;;  %v6959_v14 = vld [vmem:[#allocation2 + $0xdc] sm:$0xff] }
 0x287   : > { %v2096_v58 = vmul.f32 %v4704_v33, %v6918_v24  ;;  %v2730_v38 = vadd.f32 %v2698_v27, %v2630_v40  ;;  %v2898_v23 = vmul.f32 %v6739_v10, %v7738_v21  ;;  %8141 = vst [vmem:[#allocation10_spill] sm:$0xff] %v6944_v17  ;;  %8142 = vst [vmem:[#allocation27_spill] sm:$0xff] %v6946_v31 }
 0x288   : > { %v1330_v16 = vadd.f32 %v1298_v18, %v1230_v37  ;;  %v1398_v51 = vmul.f32 %v8122_v12, %v7877_v43  ;;  %v6951_v63 = vadd.f32 %v6881_v61, %v3444_v57  ;;  %v2999_v2 = vmul.f32 %v7739_v41, %v6930_v32 }
 0x289   : > { %v2128_v26 = vadd.f32 %v2096_v58, %v2028_v42  ;;  %v2196_v1 = vmul.f32 %v4679_v25, %v6932_v45  ;;  %v2830_v40 = vadd.f32 %v2798_v56, %v2730_v38  ;;  %v3099_v27 = vmul.f32 %v4923_v35, %v6938_v9 }
 0x28a   : > { %8143 = vst [vmem:[#allocation48_spill] sm:$0xff] %v6951_v63  ;;  %v1430_v37 = vadd.f32 %v1398_v51, %v1330_v16  ;;  %v1499_v12 = vmul.f32 %v6845_v5, %v7809_v22  ;;  %v4286_v18 = vpop.eup %4285  ;;  %v3515_v57 = vsub.f32 0.0, %v6951_v63  ;;  %v3199_v32 = vmul.f32 %v4927_v36, %v6944_v17 }
 0x28b   : > { %v2228_v42 = vadd.f32 %v2196_v1, %v2128_v26  ;;  %v2296_v58 = vmul.f32 %v7732_v52, %v6946_v31  ;;  %v4288_v56 = vpop.eup %4287  ;;  %v3691_v38 = vmul.f32 %v4286_v18, %v6820_v30  ;;  %v2930_v9 = vadd.f32 %v2898_v23, %v2830_v40  ;;  %v8144_v1 = vld [vmem:[#allocation8_spill] sm:$0xff]  ;;  %v6978_v40 = vld [vmem:[#allocation2 + $0x113] sm:$0xff] }
 0x28c   : > { %v1531_v10 = vadd.f32 %v1499_v12, %v1430_v37  ;;  %v1599_v16 = vmul.f32 %v6858_v39, %v7813_v7  ;;  %v3612_v51 = vadd.f32 1.0, %v4288_v56  ;;  %v3575_v5 = vmul.f32 1.442695, %v3515_v57  ;;  %v8145_v30 = vld [vmem:[#allocation64_spill] sm:$0xff]  ;;  %8146 = vst [vmem:[#allocation28_spill] sm:$0xff] %v6978_v40  ;;  %v8147_v12 = vld [vmem:[#allocation45_spill] sm:$0xff] }
 0x28d   : > { %v2328_v45 = vadd.f32 %v2296_v58, %v2228_v42  ;;  %v2396_v63 = vmul.f32 %v7733_v4, %v6959_v14  ;;  %3767 = vrot.lane.b32.xlu0 %v3691_v38, %s4344_s16  ;;  %v3031_v26 = vadd.f32 %v2999_v2, %v2930_v9  ;;  %v2497_v17 = vmul.f32 %v8144_v1, %v7734_v47  ;;  %v8149_v56 = vld [vmem:[#allocation58_spill] sm:$0xff] }
 0x28e   : > { %v1631_v31 = vadd.f32 %v1599_v16, %v1531_v10  ;;  %v1699_v23 = vmul.f32 %v8145_v30, %v7752_v29  ;;  %4289 = vrcp.f32 %v3612_v51  ;;  %v997_v18 = vmul.f32 %v8147_v12, %v7786_v46  ;;  %v6986_v10 = vld [vmem:[#allocation2 + $0x114] sm:$0xff]  ;;  %v8150_v51 = vld [vmem:[#allocation43_spill] sm:$0xff] }
 0x28f   : > { %v2428_v37 = vadd.f32 %v2396_v63, %v2328_v45  ;;  %v1097_v57 = vmul.f32 %v8128_v8, %v7868_v55  ;;  %4291 = vpow2.f32 %v3575_v5  ;;  %v3131_v42 = vadd.f32 %v3099_v27, %v3031_v26  ;;  %8148 = vst [vmem:[#allocation47_spill] sm:$0xff] %v6986_v10  ;;  %v8151_v26 = vld [vmem:[#allocation24_spill] sm:$0xff] }
 0x290   : > { %v1731_v9 = vadd.f32 %v1699_v23, %v1631_v31  ;;  %v1799_v2 = vmul.f32 %v6874_v0, %v7753_v15  ;;  %v2597_v38 = vmul.f32 %v8149_v56, %v7735_v19  ;;  %v1197_v45 = vmul.f32 %v8129_v60, %v7790_v13 }
 0x291   : > { %v2529_v58 = vadd.f32 %v2497_v17, %v2428_v37  ;;  %v1129_v16 = vadd.f32 %v1097_v57, %v997_v18  ;;  %v3231_v63 = vadd.f32 %v3199_v32, %v3131_v42  ;;  %v3299_v8 = vmul.f32 %v8150_v51, %v6978_v40  ;;  %v7002_v32 = vld [vmem:[#allocation2 + $0x108] sm:$0xff] }
 0x292   : > { %v1831_v5 = vadd.f32 %v1799_v2, %v1731_v9  ;;  %v1899_v31 = vmul.f32 %v6890_v3, %v7754_v53  ;;  %v2697_v23 = vmul.f32 %v8151_v26, %v7736_v28  ;;  %v1297_v37 = vmul.f32 %v6708_v59, %v7770_v48  ;;  %8152 = vst [vmem:[#allocation20_spill] sm:$0xff] %v7002_v32  ;;  %v8153_v9 = vld [vmem:[#allocation60_spill] sm:$0xff] }
 0x293   : > { %v2629_v27 = vadd.f32 %v2597_v38, %v2529_v58  ;;  %v1229_v17 = vadd.f32 %v1197_v45, %v1129_v16  ;;  %v3331_v12 = vadd.f32 %v3299_v8, %v3231_v63  ;;  %v3399_v60 = vmul.f32 %v6851_v34, %v6986_v10  ;;  %v7008_v58 = vld [vmem:[#allocation2 + $0x109] sm:$0xff]  ;;  %v8155_v45 = vld [vmem:[#allocation59_spill] sm:$0xff] }
 0x294   : > { %v1931_v18 = vadd.f32 %v1899_v31, %v1831_v5  ;;  %v1999_v57 = vmul.f32 %v8130_v54, %v4700_v6  ;;  %v2797_v2 = vmul.f32 %v8153_v9, %v7737_v50  ;;  %8154 = vst [vmem:[#allocation33_spill] sm:$0xff] %v7008_v58  ;;  %v1397_v59 = vmul.f32 %v6720_v44, %v7877_v43  ;;  %v7014_v8 = vld [vmem:[#allocation2 + $0x10a] sm:$0xff] }
 0x295   : > { %v2729_v42 = vadd.f32 %v2697_v23, %v2629_v27  ;;  %v1329_v38 = vadd.f32 %v1297_v37, %v1229_v17  ;;  %v3431_v16 = vadd.f32 %v3399_v60, %v3331_v12  ;;  %v2897_v63 = vmul.f32 %v8155_v45, %v7738_v21  ;;  %8156 = vst [vmem:[#allocation31_spill] sm:$0xff] %v7014_v8 }
 0x296   : > { %v2031_v5 = vadd.f32 %v1999_v57, %v1931_v18  ;;  %v2099_v54 = vmul.f32 %v8132_v11, %v4704_v33  ;;  %v2998_v27 = vmul.f32 %v7739_v41, %v7002_v32  ;;  %v1498_v17 = vmul.f32 %v6909_v49, %v7809_v22 }
 0x297   : > { %v2829_v31 = vadd.f32 %v2797_v2, %v2729_v42  ;;  %v1429_v23 = vadd.f32 %v1397_v59, %v1329_v38  ;;  %v7023_v44 = vadd.f32 %v6881_v61, %v3431_v16  ;;  %v3098_v37 = vmul.f32 %v4923_v35, %v7008_v58  ;;  %v8158_v59 = vld [vmem:[#allocation61_spill] sm:$0xff] }
 0x298   : > { %v2131_v12 = vadd.f32 %v2099_v54, %v2031_v5  ;;  %v2199_v60 = vmul.f32 %v8136_v62, %v4679_v25  ;;  %v4290_v18 = vpop.eup %4289  ;;  %v3198_v57 = vmul.f32 %v4927_v36, %v7014_v8  ;;  %v1598_v2 = vmul.f32 %v6918_v24, %v7813_v7 }
 0x299   : > { %8157 = vst [vmem:[#allocation22_spill] sm:$0xff] %v7023_v44  ;;  %v2929_v11 = vadd.f32 %v2897_v63, %v2829_v31  ;;  %v1530_v42 = vadd.f32 %v1498_v17, %v1429_v23  ;;  %v4292_v38 = vpop.eup %4291  ;;  %v3708_v16 = vmul.f32 %v4290_v18, %v8158_v59  ;;  %v3502_v49 = vsub.f32 0.0, %v7023_v44  ;;  %v8159_v63 = vld [vmem:[#allocation66_spill] sm:$0xff]  ;;  %v7040_v17 = vld [vmem:[#allocation2 + $0x10b] sm:$0xff]  ;;  %v8160_v18 = vld [vmem:[#allocation23_spill] sm:$0xff] }
 0x29a   : > { %v2231_v32 = vadd.f32 %v2199_v60, %v2131_v12  ;;  %v2299_v5 = vmul.f32 %v8139_v20, %v7732_v52  ;;  %v3611_v54 = vadd.f32 1.0, %v4292_v38  ;;  %v1698_v31 = vmul.f32 %v8159_v63, %v7752_v29  ;;  %v8161_v12 = vld [vmem:[#allocation27_spill] sm:$0xff] }
 0x29b   : > { %v3030_v62 = vadd.f32 %v2998_v27, %v2929_v11  ;;  %v1630_v58 = vadd.f32 %v1598_v2, %v1530_v42  ;;  %3801 = vrot.lane.b32.xlu1 %v3708_v16, %s4344_s16  ;;  %v3549_v23 = vmul.f32 1.442695, %v3502_v49  ;;  %v2399_v59 = vmul.f32 %v8160_v18, %v7733_v4  ;;  %v8162_v27 = vld [vmem:[#allocation62_spill] sm:$0xff]  ;;  %v7048_v42 = vpop.permute.xlu1 %3747  ;;  %v7050_v2 = vld [vmem:[#allocation2 + $0x10c] sm:$0xff] }
 0x29c   : > { %v2331_v8 = vadd.f32 %v2299_v5, %v2231_v32  ;;  %v1798_v60 = vmul.f32 %v8161_v12, %v7753_v15  ;;  %4293 = vrcp.f32 %v3611_v54  ;;  %v1000_v11 = vmul.f32 %v8162_v27, %v7786_v46  ;;  %8163 = vst [vmem:[#allocation7_spill] sm:$0xff] %v7048_v42  ;;  %v8164_v32 = vld [vmem:[#allocation54_spill] sm:$0xff] }
 0x29d   : > { %v3130_v20 = vadd.f32 %v3098_v37, %v3030_v62  ;;  %v1730_v38 = vadd.f32 %v1698_v31, %v1630_v58  ;;  %4295 = vpow2.f32 %v3549_v23  ;;  %v2500_v16 = vmul.f32 %v8164_v32, %v7734_v47  ;;  %v7060_v62 = vpop.permute.xlu0 %3743  ;;  %v8166_v23 = vld [vmem:[#allocation29_spill] sm:$0xff]  ;;  %v1765_v44 = vld [vmem:[#allocation2 + $0xfb] sm:$0xff] }
 0x29e   : > { %v2431_v49 = vadd.f32 %v2399_v59, %v2331_v8  ;;  %v1100_v5 = vmul.f32 %v6858_v39, %v7868_v55  ;;  %v3298_v37 = vmul.f32 %v8150_v51, %v7040_v17  ;;  %v1898_v54 = vmul.f32 %v6959_v14, %v7754_v53  ;;  %8165 = vst [vmem:[#allocation13_spill] sm:$0xff] %v7060_v62 }
 0x29f   : > { %v3230_v18 = vadd.f32 %v3198_v57, %v3130_v20  ;;  %v1830_v58 = vadd.f32 %v1798_v60, %v1730_v38  ;;  %v2600_v8 = vmul.f32 %v8166_v23, %v7735_v19  ;;  %v1200_v27 = vmul.f32 %v8145_v30, %v7790_v13  ;;  %v8167_v38 = vld [vmem:[#allocation10_spill] sm:$0xff] }
 0x2a0   : > { %v2532_v31 = vadd.f32 %v2500_v16, %v2431_v49  ;;  %v1132_v59 = vadd.f32 %v1100_v5, %v1000_v11  ;;  %v3398_v39 = vmul.f32 %v6851_v34, %v7050_v2  ;;  %v1998_v60 = vmul.f32 %v8144_v1, %v4700_v6  ;;  %v7072_v49 = vld [vmem:[#allocation2 + $0x128] sm:$0xff] }
 0x2a1   : > { %v3330_v42 = vadd.f32 %v3298_v37, %v3230_v18  ;;  %v1930_v57 = vadd.f32 %v1898_v54, %v1830_v58  ;;  %v2700_v62 = vmul.f32 %v8167_v38, %v7736_v28  ;;  %8168 = vst [vmem:[#allocation30_spill] sm:$0xff] %v7072_v49  ;;  %v1300_v11 = vmul.f32 %v6874_v0, %v7770_v48  ;;  %v7078_v18 = vld [vmem:[#allocation2 + $0x129] sm:$0xff]  ;;  %v1465_v58 = vld [vmem:[#allocation2 + $0xf8] sm:$0xff]  ;;  %v7082_v54 = vpop.permute.xlu1 %3749 }
 0x2a2   : > { %v2632_v20 = vadd.f32 %v2600_v8, %v2532_v31  ;;  %v1232_v16 = vadd.f32 %v1200_v27, %v1132_v59  ;;  %v2800_v30 = vmul.f32 %v6978_v40, %v7737_v50  ;;  %8169 = vst [vmem:[#allocation32_spill] sm:$0xff] %v7078_v18  ;;  %v2098_v1 = vmul.f32 %v8149_v56, %v4704_v33  ;;  %v7086_v59 = vld [vmem:[#allocation2 + $0x12a] sm:$0xff] }
 0x2a3   : > { %v3430_v5 = vadd.f32 %v3398_v39, %v3330_v42  ;;  %v2030_v37 = vadd.f32 %v1998_v60, %v1930_v57  ;;  %8170 = vst [vmem:[#allocation37_spill] sm:$0xff] %v7082_v54  ;;  %v2900_v8 = vmul.f32 %v6986_v10, %v7738_v21  ;;  %8171 = vst [vmem:[#allocation36_spill] sm:$0xff] %v7086_v59  ;;  %v7097_v60 = vpop.permute.xlu0 %3745 }
 0x2a4   : > { %v2732_v31 = vadd.f32 %v2700_v62, %v2632_v20  ;;  %v1332_v0 = vadd.f32 %v1300_v11, %v1232_v16  ;;  %v1400_v42 = vmul.f32 %v6890_v3, %v7877_v43  ;;  %v3001_v39 = vmul.f32 %v7739_v41, %v7072_v49  ;;  %v1565_v62 = vld [vmem:[#allocation2 + $0xf9] sm:$0xff]  ;;  %8173 = vst [vmem:[#allocation34_spill] sm:$0xff] %v7097_v60  ;;  %v8174_v60 = vld [vmem:[#allocation48_spill] sm:$0xff] }
 0x2a5   : > { %v7091_v27 = vadd.f32 %v6881_v61, %v3430_v5  ;;  %v2130_v56 = vadd.f32 %v2098_v1, %v2030_v37  ;;  %v2198_v57 = vmul.f32 %v8151_v26, %v4679_v25  ;;  %v3101_v16 = vmul.f32 %v4923_v35, %v7078_v18  ;;  %v1665_v1 = vld [vmem:[#allocation2 + $0xfa] sm:$0xff] }
 0x2a6   : > { %v2832_v20 = vadd.f32 %v2800_v30, %v2732_v31  ;;  %v1432_v11 = vadd.f32 %v1400_v42, %v1332_v0  ;;  %v1501_v3 = vmul.f32 %v7809_v22, %v1465_v58  ;;  %v4294_v54 = vpop.eup %4293  ;;  %v3201_v49 = vmul.f32 %v4927_v36, %v7086_v59  ;;  %v7111_v59 = vpop.permute.xlu1 %3753 }
 0x2a7   : > { %8172 = vst [vmem:[#allocation51_spill] sm:$0xff] %v7091_v27  ;;  %v3501_v5 = vsub.f32 0.0, %v7091_v27  ;;  %v2230_v37 = vadd.f32 %v2198_v57, %v2130_v56  ;;  %v2298_v26 = vmul.f32 %v8153_v9, %v7732_v52  ;;  %v4296_v10 = vpop.eup %4295  ;;  %v3707_v30 = vmul.f32 %v4294_v54, %v8174_v60  ;;  %v7113_v56 = vpop.permute.xlu0 %3751  ;;  %v8175_v54 = vld [vmem:[#allocation20_spill] sm:$0xff]  ;;  %3845 = vst.msk [vmem:[%s4801_s11 + $0x28] sm:$0xff] %vm3839_vm3, %v7111_v59 }
 0x2a8   : > { %v2932_v31 = vadd.f32 %v2900_v8, %v2832_v20  ;;  %v1533_v40 = vadd.f32 %v1501_v3, %v1432_v11  ;;  %v1601_v0 = vmul.f32 %v7813_v7, %v1565_v62  ;;  %v3598_v42 = vadd.f32 1.0, %v4296_v10  ;;  %v7119_v10 = vld [vmem:[#allocation2 + $0x12b] sm:$0xff]  ;;  %v1865_v20 = vld [vmem:[#allocation2 + $0xfc] sm:$0xff]  ;;  %3844 = vst.msk [vmem:[%s4801_s11 + $0x20] sm:$0xff] %vm3839_vm3, %v7113_v56 }
 0x2a9   : > { %v3547_v58 = vmul.f32 1.442695, %v3501_v5  ;;  %v2330_v18 = vadd.f32 %v2298_v26, %v2230_v37  ;;  %v2398_v27 = vmul.f32 %v8155_v45, %v7733_v4  ;;  %3799 = vrot.lane.b32.xlu0 %v3707_v30, %s4344_s16  ;;  %v2499_v8 = vmul.f32 %v8175_v54, %v7734_v47  ;;  %v8176_v45 = vld [vmem:[#allocation63_spill] sm:$0xff]  ;;  %v7126_v26 = vld [vmem:[#allocation2 + $0x12c] sm:$0xff] }
 0x2aa   : > { %v3033_v9 = vadd.f32 %v3001_v39, %v2932_v31  ;;  %v1633_v57 = vadd.f32 %v1601_v0, %v1533_v40  ;;  %v1701_v62 = vmul.f32 %v7752_v29, %v1665_v1  ;;  %4297 = vrcp.f32 %v3598_v42  ;;  %v8177_v1 = vld [vmem:[#allocation33_spill] sm:$0xff] }
 0x2ab   : > { %v2430_v60 = vadd.f32 %v2398_v27, %v2330_v18  ;;  %v999_v11 = vmul.f32 %v8176_v45, %v7786_v46  ;;  %v1099_v3 = vmul.f32 %v6918_v24, %v7868_v55  ;;  %4299 = vpow2.f32 %v3547_v58 }
 0x2ac   : > { %v3133_v5 = vadd.f32 %v3101_v16, %v3033_v9  ;;  %v1733_v39 = vadd.f32 %v1701_v62, %v1633_v57  ;;  %v1801_v37 = vmul.f32 %v7753_v15, %v1765_v44  ;;  %v2599_v30 = vmul.f32 %v8177_v1, %v7735_v19  ;;  %v8178_v44 = vld [vmem:[#allocation31_spill] sm:$0xff]  ;;  %v7139_v57 = vpop.permute.xlu1 %3785  ;;  %v7141_v62 = vpop.permute.xlu0 %3783 }
 0x2ad   : > { %v2531_v40 = vadd.f32 %v2499_v8, %v2430_v60  ;;  %v1131_v31 = vadd.f32 %v1099_v3, %v999_v11  ;;  %v1199_v18 = vmul.f32 %v8159_v63, %v7790_v13  ;;  %v3301_v0 = vmul.f32 %v8150_v51, %v7119_v10  ;;  %8179 = vst [vmem:[#allocation40_spill] sm:$0xff] %v7139_v57  ;;  %v7145_v60 = vld [vmem:[#allocation2 + $0x120] sm:$0xff]  ;;  %v1464_v11 = vld [vmem:[#allocation2 + $0xf0] sm:$0xff] }
 0x2ae   : > { %v3233_v27 = vadd.f32 %v3201_v49, %v3133_v5  ;;  %v1833_v24 = vadd.f32 %v1801_v37, %v1733_v39  ;;  %v1901_v16 = vmul.f32 %v7754_v53, %v1865_v20  ;;  %v2699_v58 = vmul.f32 %v8178_v44, %v7736_v28  ;;  %8180 = vst [vmem:[#allocation35_spill] sm:$0xff] %v7141_v62 }
 0x2af   : > { %v2631_v42 = vadd.f32 %v2599_v30, %v2531_v40  ;;  %v1231_v9 = vadd.f32 %v1199_v18, %v1131_v31  ;;  %v1299_v8 = vmul.f32 %v8161_v12, %v7770_v48  ;;  %v3401_v49 = vmul.f32 %v6851_v34, %v7126_v26  ;;  %v7151_v12 = vld [vmem:[#allocation2 + $0x121] sm:$0xff] }
 0x2b0   : > { %v3333_v63 = vadd.f32 %v3301_v0, %v3233_v27  ;;  %v1933_v45 = vadd.f32 %v1901_v16, %v1833_v24  ;;  %v2001_v20 = vmul.f32 %v8164_v32, %v4700_v6  ;;  %v2799_v5 = vmul.f32 %v7040_v17, %v7737_v50  ;;  %v7157_v31 = vld [vmem:[#allocation2 + $0x122] sm:$0xff]  ;;  %v1564_v27 = vld [vmem:[#allocation2 + $0xf1] sm:$0xff] }
 0x2b1   : > { %v2731_v3 = vadd.f32 %v2699_v58, %v2631_v42  ;;  %v1331_v39 = vadd.f32 %v1299_v8, %v1231_v9  ;;  %v1399_v37 = vmul.f32 %v6959_v14, %v7877_v43  ;;  %v2899_v30 = vmul.f32 %v7050_v2, %v7738_v21 }
 0x2b2   : > { %v3433_v40 = vadd.f32 %v3401_v49, %v3333_v63  ;;  %v2033_v18 = vadd.f32 %v2001_v20, %v1933_v45  ;;  %v2101_v32 = vmul.f32 %v8166_v23, %v4704_v33  ;;  %v3000_v24 = vmul.f32 %v7739_v41, %v7145_v60  ;;  %v1664_v63 = vld [vmem:[#allocation2 + $0xf2] sm:$0xff] }
 0x2b3   : > { %v2831_v0 = vadd.f32 %v2799_v5, %v2731_v3  ;;  %v1431_v16 = vadd.f32 %v1399_v37, %v1331_v39  ;;  %v1500_v42 = vmul.f32 %v7809_v22, %v1464_v11  ;;  %v3100_v58 = vmul.f32 %v4923_v35, %v7151_v12  ;;  %v1764_v22 = vld [vmem:[#allocation2 + $0xf3] sm:$0xff]  ;;  %v7174_v11 = vpop.permute.xlu1 %3757  ;;  %v7176_v5 = vpop.permute.xlu0 %3755 }
 0x2b4   : > { %v7165_v14 = vadd.f32 %v6881_v61, %v3433_v40  ;;  %v2133_v9 = vadd.f32 %v2101_v32, %v2033_v18  ;;  %v2201_v8 = vmul.f32 %v8167_v38, %v4679_v25  ;;  %v4298_v23 = vpop.eup %4297  ;;  %v3200_v45 = vmul.f32 %v4927_v36, %v7157_v31  ;;  %8181 = vst [vmem:[#allocation49_spill] sm:$0xff] %v7174_v11  ;;  %v8183_v37 = vld [vmem:[#allocation22_spill] sm:$0xff]  ;;  %v8184_v32 = vld [vmem:[#allocation28_spill] sm:$0xff] }
 0x2b5   : > { %v2931_v49 = vadd.f32 %v2899_v30, %v2831_v0  ;;  %v1532_v20 = vadd.f32 %v1500_v42, %v1431_v16  ;;  %v1600_v3 = vmul.f32 %v7813_v7, %v1564_v27  ;;  %8182 = vst [vmem:[#allocation6_spill] sm:$0xff] %v7176_v5  ;;  %v4300_v39 = vpop.eup %4299  ;;  %v3694_v40 = vmul.f32 %v4298_v23, %v8183_v37  ;;  %v976_v0 = vld [vmem:[#allocation2 + $0x170] sm:$0xff]  ;;  %v7184_v5 = vld [vmem:[#allocation2 + $0x123] sm:$0xff] }
 0x2b6   : > { %v3504_v18 = vsub.f32 0.0, %v7165_v14  ;;  %v2233_v38 = vadd.f32 %v2201_v8, %v2133_v9  ;;  %v2301_v30 = vmul.f32 %v8184_v32, %v7732_v52  ;;  %v3597_v62 = vadd.f32 1.0, %v4300_v39  ;;  %v1076_v27 = vld [vmem:[#allocation2 + $0x171] sm:$0xff]  ;;  %v8185_v23 = vld [vmem:[#allocation47_spill] sm:$0xff] }
 0x2b7   : > { %v3032_v57 = vadd.f32 %v3000_v24, %v2931_v49  ;;  %v1632_v16 = vadd.f32 %v1600_v3, %v1532_v20  ;;  %v1700_v7 = vmul.f32 %v7752_v29, %v1664_v63  ;;  %3773 = vrot.lane.b32.xlu1 %v3694_v40, %s4344_s16  ;;  %v2401_v37 = vmul.f32 %v8185_v23, %v7733_v4  ;;  %v1864_v8 = vld [vmem:[#allocation2 + $0xf4] sm:$0xff]  ;;  %v7190_v29 = vld [vmem:[#allocation2 + $0x124] sm:$0xff] }
 0x2b8   : > { %v3553_v42 = vmul.f32 1.442695, %v3504_v18  ;;  %v2333_v11 = vadd.f32 %v2301_v30, %v2233_v38  ;;  %v1800_v9 = vmul.f32 %v7753_v15, %v1764_v22  ;;  %4301 = vrcp.f32 %v3597_v62  ;;  %v1176_v49 = vld [vmem:[#allocation2 + $0x172] sm:$0xff] }
 0x2b9   : > { %v3132_v32 = vadd.f32 %v3100_v58, %v3032_v57  ;;  %v1732_v39 = vadd.f32 %v1700_v7, %v1632_v16  ;;  %v1012_v24 = vmul.f32 %v7786_v46, %v976_v0  ;;  %v8186_v20 = vld [vmem:[#allocation30_spill] sm:$0xff]  ;;  %v1112_v40 = vmul.f32 %v7868_v55, %v1076_v27  ;;  %v7198_v58 = vpop.permute.xlu1 %3789  ;;  %v7200_v46 = vpop.permute.xlu0 %3787 }
 0x2ba   : > { %4303 = vpow2.f32 %v3553_v42  ;;  %v2433_v63 = vadd.f32 %v2401_v37, %v2333_v11  ;;  %v2502_v3 = vmul.f32 %v8186_v20, %v7734_v47  ;;  %v3300_v22 = vmul.f32 %v8150_v51, %v7184_v5  ;;  %v1276_v62 = vld [vmem:[#allocation2 + $0x173] sm:$0xff]  ;;  %v8187_v11 = vld [vmem:[#allocation32_spill] sm:$0xff]  ;;  %3863 = vst.msk [vmem:[%s4801_s11 + $0xb8] sm:$0xff] %vm3839_vm3, %v7198_v58  ;;  %3862 = vst.msk [vmem:[%s4801_s11 + $0xb0] sm:$0xff] %vm3839_vm3, %v7200_v46 }
 0x2bb   : > { %v3232_v18 = vadd.f32 %v3200_v45, %v3132_v32  ;;  %v1832_v38 = vadd.f32 %v1800_v9, %v1732_v39  ;;  %v1900_v57 = vmul.f32 %v7754_v53, %v1864_v8  ;;  %v2602_v0 = vmul.f32 %v8187_v11, %v7735_v19  ;;  %v1376_v23 = vld [vmem:[#allocation2 + $0x174] sm:$0xff]  ;;  %v8188_v9 = vld [vmem:[#allocation36_spill] sm:$0xff]  ;;  %v2967_v32 = vld [vmem:[#allocation2 + $0x140] sm:$0xff] }
 0x2bc   : > { %v2534_v30 = vadd.f32 %v2502_v3, %v2433_v63  ;;  %v1144_v16 = vadd.f32 %v1112_v40, %v1012_v24  ;;  %v1212_v7 = vmul.f32 %v7790_v13, %v1176_v49  ;;  %v3400_v45 = vmul.f32 %v6851_v34, %v7190_v29  ;;  %v3067_v49 = vld [vmem:[#allocation2 + $0x141] sm:$0xff] }
 0x2bd   : > { %v3332_v55 = vadd.f32 %v3300_v22, %v3232_v18  ;;  %v1932_v27 = vadd.f32 %v1900_v57, %v1832_v38  ;;  %v2000_v42 = vmul.f32 %v8175_v54, %v4700_v6  ;;  %v2702_v8 = vmul.f32 %v8188_v9, %v7736_v28  ;;  %v3167_v20 = vld [vmem:[#allocation2 + $0x142] sm:$0xff]  ;;  %v7225_v11 = vpop.permute.xlu1 %3761 }
 0x2be   : > { %v2634_v37 = vadd.f32 %v2602_v0, %v2534_v30  ;;  %v1244_v39 = vadd.f32 %v1212_v7, %v1144_v16  ;;  %v1312_v63 = vmul.f32 %v7770_v48, %v1276_v62  ;;  %v2802_v13 = vmul.f32 %v7119_v10, %v7737_v50  ;;  %v3267_v22 = vld [vmem:[#allocation2 + $0x143] sm:$0xff]  ;;  %3849 = vst.msk [vmem:[%s4801_s11 + $0x48] sm:$0xff] %vm3839_vm3, %v7225_v11 }
 0x2bf   : > { %v3432_v24 = vadd.f32 %v3400_v45, %v3332_v55  ;;  %v2032_v3 = vadd.f32 %v2000_v42, %v1932_v27  ;;  %v2100_v40 = vmul.f32 %v8177_v1, %v4704_v33  ;;  %v2902_v18 = vmul.f32 %v7126_v26, %v7738_v21  ;;  %v7227_v1 = vpop.permute.xlu0 %3759  ;;  %v3367_v27 = vld [vmem:[#allocation2 + $0x144] sm:$0xff] }
 0x2c0   : > { %v2734_v54 = vadd.f32 %v2702_v8, %v2634_v37  ;;  %v1344_v38 = vadd.f32 %v1312_v63, %v1244_v39  ;;  %v1412_v57 = vmul.f32 %v7877_v43, %v1376_v23  ;;  %v3003_v62 = vmul.f32 %v7739_v41, %v2967_v32  ;;  %v1776_v37 = vld [vmem:[#allocation2 + $0x183] sm:$0xff]  ;;  %3848 = vst.msk [vmem:[%s4801_s11 + $0x40] sm:$0xff] %vm3839_vm3, %v7227_v1 }
 0x2c1   : > { %v7220_v48 = vadd.f32 %v6881_v61, %v3432_v24  ;;  %v2132_v10 = vadd.f32 %v2100_v40, %v2032_v3  ;;  %v2200_v30 = vmul.f32 %v8178_v44, %v4679_v25  ;;  %v3103_v26 = vmul.f32 %v4923_v35, %v3067_v49  ;;  %v8189_v9 = vld [vmem:[#allocation51_spill] sm:$0xff]  ;;  %v8190_v63 = vld [vmem:[#allocation12_spill] sm:$0xff]  ;;  %v8191_v40 = vld [vmem:[#allocation65_spill] sm:$0xff] }
 0x2c2   : > { %v2834_v0 = vadd.f32 %v2802_v13, %v2734_v54  ;;  %v3203_v16 = vmul.f32 %v4927_v36, %v3167_v20  ;;  %v1444_v7 = vadd.f32 %v1412_v57, %v1344_v38  ;;  %v4302_v43 = vpop.eup %4301  ;;  %v3303_v45 = vmul.f32 %v8150_v51, %v3267_v22  ;;  %v1777_v13 = vld [vmem:[#allocation2 + $0x18b] sm:$0xff]  ;;  %v8193_v57 = vld [vmem:[#allocation11_spill] sm:$0xff] }
 0x2c3   : > { %v3503_v55 = vsub.f32 0.0, %v7220_v48  ;;  %v2232_v42 = vadd.f32 %v2200_v30, %v2132_v10  ;;  %v2300_v44 = vmul.f32 %v7040_v17, %v7732_v52  ;;  %v3693_v8 = vmul.f32 %v4302_v43, %v8189_v9  ;;  %v8192_v54 = vld [vmem:[#allocation16_spill] sm:$0xff] }
 0x2c4   : > { %v4304_v23 = vpop.eup %4303  ;;  %v2934_v32 = vadd.f32 %v2902_v18, %v2834_v0  ;;  %v2400_v39 = vmul.f32 %v7050_v2, %v7733_v4  ;;  %v1545_v24 = vadd.f32 %v8190_v63, %v1444_v7  ;;  %v1644_v22 = vadd.f32 %v8192_v54, %v8191_v40  ;;  %v1876_v2 = vld [vmem:[#allocation2 + $0x184] sm:$0xff]  ;;  %v1877_v0 = vld [vmem:[#allocation2 + $0x18c] sm:$0xff] }
 0x2c5   : > { %v3600_v49 = vadd.f32 1.0, %v4304_v23  ;;  %v3551_v20 = vmul.f32 1.442695, %v3503_v55  ;;  %v2332_v3 = vadd.f32 %v2300_v44, %v2232_v42  ;;  %3771 = vrot.lane.b32.xlu0 %v3693_v8, %s4344_s16  ;;  %v3403_v38 = vmul.f32 %v6851_v34, %v3367_v27  ;;  %v8194_v7 = vld [vmem:[#allocation4_spill] sm:$0xff]  ;;  %v7248_v42 = vpop.permute.xlu1 %3793  ;;  %v7250_v44 = vpop.permute.xlu0 %3791  ;;  %v8195_v34 = vld [vmem:[#allocation25_spill] sm:$0xff]  ;;  %v1976_v23 = vld [vmem:[#allocation2 + $0x198] sm:$0xff] }
 0x2c6   : > { %v3035_v17 = vadd.f32 %v3003_v62, %v2934_v32  ;;  %v2501_v18 = vmul.f32 %v7145_v60, %v7734_v47  ;;  %v1645_v10 = vadd.f32 %v8193_v57, %v1545_v24  ;;  %v1744_v43 = vadd.f32 %v8194_v7, %v1644_v22  ;;  %v1977_v32 = vld [vmem:[#allocation2 + $0x1a0] sm:$0xff]  ;;  %3865 = vst.msk [vmem:[%s4801_s11 + $0xc8] sm:$0xff] %vm3839_vm3, %v7248_v42 }
 0x2c7   : > { %4305 = vrcp.f32 %v3600_v49  ;;  %v2432_v30 = vadd.f32 %v2400_v39, %v2332_v3  ;;  %v1812_v55 = vmul.f32 %v7753_v15, %v1776_v37  ;;  %v1813_v60 = vmul.f32 %v7753_v15, %v1777_v13  ;;  %v2966_v49 = vld [vmem:[#allocation2 + $0x138] sm:$0xff]  ;;  %v2077_v54 = vld [vmem:[#allocation2 + $0x1a1] sm:$0xff]  ;;  %3864 = vst.msk [vmem:[%s4801_s11 + $0xc0] sm:$0xff] %vm3839_vm3, %v7250_v44 }
 0x2c8   : > { %4307 = vpow2.f32 %v3551_v20  ;;  %v3135_v62 = vadd.f32 %v3103_v26, %v3035_v17  ;;  %v1745_v27 = vadd.f32 %v8195_v34, %v1645_v10  ;;  %v2601_v8 = vmul.f32 %v7151_v12, %v7735_v19  ;;  %v2076_v3 = vld [vmem:[#allocation2 + $0x199] sm:$0xff]  ;;  %v2377_v46 = vld [vmem:[#allocation2 + $0x1a4] sm:$0xff] }
 0x2c9   : > { %v2533_v9 = vadd.f32 %v2501_v18, %v2432_v30  ;;  %v1844_v39 = vadd.f32 %v1812_v55, %v1744_v43  ;;  %v1912_v63 = vmul.f32 %v7754_v53, %v1876_v2  ;;  %v2701_v24 = vmul.f32 %v7157_v31, %v7736_v28  ;;  %v3066_v13 = vld [vmem:[#allocation2 + $0x139] sm:$0xff]  ;;  %v2177_v30 = vld [vmem:[#allocation2 + $0x1a2] sm:$0xff]  ;;  %v3766_v7 = vpop.permute.xlu1 %3765  ;;  %v3764_v43 = vpop.permute.xlu0 %3763 }
 0x2ca   : > { %v3235_v37 = vadd.f32 %v3203_v16, %v3135_v62  ;;  %v1845_v20 = vadd.f32 %v1813_v60, %v1745_v27  ;;  %v1913_v26 = vmul.f32 %v7754_v53, %v1877_v0  ;;  %v2801_v15 = vmul.f32 %v7184_v5, %v7737_v50  ;;  %v2176_v57 = vld [vmem:[#allocation2 + $0x19a] sm:$0xff]  ;;  %v2277_v62 = vld [vmem:[#allocation2 + $0x1a3] sm:$0xff]  ;;  %3851 = vst.msk [vmem:[%s4801_s11 + $0x58] sm:$0xff] %vm3839_vm3, %v3766_v7 }
 0x2cb   : > { %v2633_v40 = vadd.f32 %v2601_v8, %v2533_v9  ;;  %v1944_v12 = vadd.f32 %v1912_v63, %v1844_v39  ;;  %v2012_v22 = vmul.f32 %v4700_v6, %v1976_v23  ;;  %v2901_v16 = vmul.f32 %v7190_v29, %v7738_v21  ;;  %v3166_v2 = vld [vmem:[#allocation2 + $0x13a] sm:$0xff]  ;;  %v2477_v39 = vld [vmem:[#allocation2 + $0x1b0] sm:$0xff]  ;;  %3850 = vst.msk [vmem:[%s4801_s11 + $0x50] sm:$0xff] %vm3839_vm3, %v3764_v43 }
 0x2cc   : > { %v3335_v17 = vadd.f32 %v3303_v45, %v3235_v37  ;;  %v1945_v18 = vadd.f32 %v1913_v26, %v1845_v20  ;;  %v2013_v31 = vmul.f32 %v4700_v6, %v1977_v32  ;;  %v3002_v53 = vmul.f32 %v7739_v41, %v2966_v49  ;;  %v2276_v34 = vld [vmem:[#allocation2 + $0x19b] sm:$0xff]  ;;  %v8196_v63 = vld [vmem:[#allocation13_spill] sm:$0xff] }
 0x2cd   : > { %v2733_v10 = vadd.f32 %v2701_v24, %v2633_v40  ;;  %v2044_v0 = vadd.f32 %v2012_v22, %v1944_v12  ;;  %v2112_v5 = vmul.f32 %v4704_v33, %v2076_v3  ;;  %v3102_v45 = vmul.f32 %v4923_v35, %v3066_v13  ;;  %3840 = vst.msk [vmem:[%s4801_s11] sm:$0xff] %vm3839_vm3, %v8196_v63  ;;  %v8197_v37 = vld [vmem:[#allocation34_spill] sm:$0xff]  ;;  %v8199_v24 = vld [vmem:[#allocation37_spill] sm:$0xff]  ;;  %v8201_v49 = vld [vmem:[#allocation35_spill] sm:$0xff] }
 0x2ce   : > { %v3435_v55 = vadd.f32 %v3403_v38, %v3335_v17  ;;  %v2045_v29 = vadd.f32 %v2013_v31, %v1945_v18  ;;  %v2113_v6 = vmul.f32 %v4704_v33, %v2077_v54  ;;  %v2212_v23 = vmul.f32 %v4679_v25, %v2176_v57  ;;  %v2376_v38 = vld [vmem:[#allocation2 + $0x19c] sm:$0xff]  ;;  %3841 = vst.msk [vmem:[%s4801_s11 + $0x8] sm:$0xff] %vm3839_vm3, %v8197_v37  ;;  %v8202_v20 = vld [vmem:[#allocation49_spill] sm:$0xff] }
 0x2cf   : > { %v2833_v27 = vadd.f32 %v2801_v15, %v2733_v10  ;;  %v2144_v60 = vadd.f32 %v2112_v5, %v2044_v0  ;;  %v3202_v33 = vmul.f32 %v4927_v36, %v3166_v2  ;;  %v2213_v32 = vmul.f32 %v4679_v25, %v2177_v30  ;;  %3843 = vst.msk [vmem:[%s4801_s11 + $0x18] sm:$0xff] %vm3839_vm3, %v8199_v24  ;;  %v8200_v25 = vld [vmem:[#allocation40_spill] sm:$0xff]  ;;  %v8203_v26 = vld [vmem:[#allocation6_spill] sm:$0xff] }
 0x2d0   : > { %v7272_v9 = vadd.f32 %v6881_v61, %v3435_v55  ;;  %v2145_v8 = vadd.f32 %v2113_v6, %v2045_v29  ;;  %v8198_v61 = vld [vmem:[#allocation7_spill] sm:$0xff]  ;;  %3861 = vst.msk [vmem:[%s4801_s11 + $0xa8] sm:$0xff] %vm3839_vm3, %v8200_v25  ;;  %3860 = vst.msk [vmem:[%s4801_s11 + $0xa0] sm:$0xff] %vm3839_vm3, %v8201_v49  ;;  %v2313_v58 = vmul.f32 %v7732_v52, %v2277_v62  ;;  %v2478_v3 = vld [vmem:[#allocation2 + $0x1b8] sm:$0xff] }
 0x2d1   : > { %3842 = vst.msk [vmem:[%s4801_s11 + $0x10] sm:$0xff] %vm3839_vm3, %v8198_v61  ;;  %3847 = vst.msk [vmem:[%s4801_s11 + $0x38] sm:$0xff] %vm3839_vm3, %v8202_v20  ;;  %v4306_v59 = vpop.eup %4305  ;;  %v2933_v56 = vadd.f32 %v2901_v16, %v2833_v27  ;;  %v2244_v11 = vadd.f32 %v2212_v23, %v2144_v60  ;;  %v2312_v40 = vmul.f32 %v7732_v52, %v2276_v34  ;;  %v2577_v54 = vld [vmem:[#allocation2 + $0x1b1] sm:$0xff]  ;;  %v2578_v17 = vld [vmem:[#allocation2 + $0x1b9] sm:$0xff] }
 0x2d2   : > { %3846 = vst.msk [vmem:[%s4801_s11 + $0x30] sm:$0xff] %vm3839_vm3, %v8203_v26  ;;  %v4308_v1 = vpop.eup %4307  ;;  %v3696_v15 = vmul.f32 %v4306_v59, %v7165_v14  ;;  %v3506_v42 = vsub.f32 0.0, %v7272_v9  ;;  %v2245_v13 = vadd.f32 %v2213_v32, %v2145_v8  ;;  %v2412_v44 = vmul.f32 %v7733_v4, %v2376_v38  ;;  %v3266_v57 = vld [vmem:[#allocation2 + $0x13b] sm:$0xff]  ;;  %v2677_v2 = vld [vmem:[#allocation2 + $0x1b2] sm:$0xff]  ;;  %v2978_v61 = vld [vmem:[#allocation2 + $0x1c8] sm:$0xff] }
 0x2d3   : > { %v3599_v12 = vadd.f32 1.0, %v4308_v1  ;;  %v3034_v22 = vadd.f32 %v3002_v53, %v2933_v56  ;;  %v2344_v16 = vadd.f32 %v2312_v40, %v2244_v11  ;;  %v2513_v18 = vmul.f32 %v7734_v47, %v2477_v39  ;;  %v2678_v0 = vld [vmem:[#allocation2 + $0x1ba] sm:$0xff]  ;;  %v2979_v25 = vld [vmem:[#allocation2 + $0x1d0] sm:$0xff] }
 0x2d4   : > { %3777 = vrot.lane.b32.xlu1 %v3696_v15, %s4344_s16  ;;  %v3557_v31 = vmul.f32 1.442695, %v3506_v42  ;;  %v2345_v52 = vadd.f32 %v2313_v58, %v2245_v13  ;;  %v2413_v10 = vmul.f32 %v7733_v4, %v2377_v46  ;;  %v2514_v14 = vmul.f32 %v7734_v47, %v2478_v3  ;;  %v3366_v7 = vld [vmem:[#allocation2 + $0x13c] sm:$0xff]  ;;  %v2777_v29 = vld [vmem:[#allocation2 + $0x1b3] sm:$0xff]  ;;  %v3078_v59 = vld [vmem:[#allocation2 + $0x1c9] sm:$0xff] }
 0x2d5   : > { %4309 = vrcp.f32 %v3599_v12  ;;  %v3134_v30 = vadd.f32 %v3102_v45, %v3034_v22  ;;  %v2444_v5 = vadd.f32 %v2412_v44, %v2344_v16  ;;  %v2613_v53 = vmul.f32 %v7735_v19, %v2577_v54  ;;  %v3798_v6 = vpop.permute.xlu1 %3797  ;;  %v2778_v34 = vld [vmem:[#allocation2 + $0x1bb] sm:$0xff]  ;;  %v3079_v46 = vld [vmem:[#allocation2 + $0x1d1] sm:$0xff] }
 0x2d6   : > { %4311 = vpow2.f32 %v3557_v31  ;;  %v2445_v43 = vadd.f32 %v2413_v10, %v2345_v52  ;;  %v2614_v55 = vmul.f32 %v7735_v19, %v2578_v17  ;;  %v3302_v4 = vmul.f32 %v8150_v51, %v3266_v57  ;;  %3867 = vst.msk [vmem:[%s4801_s11 + $0xd8] sm:$0xff] %vm3839_vm3, %v3798_v6  ;;  %v2877_v23 = vld [vmem:[#allocation2 + $0x1b4] sm:$0xff]  ;;  %v2878_v32 = vld [vmem:[#allocation2 + $0x1bc] sm:$0xff]  ;;  %v3178_v1 = vld [vmem:[#allocation2 + $0x1ca] sm:$0xff] }
 0x2d7   : > { %v3234_v62 = vadd.f32 %v3202_v33, %v3134_v30  ;;  %v2545_v47 = vadd.f32 %v2513_v18, %v2444_v5  ;;  %v2713_v27 = vmul.f32 %v7736_v28, %v2677_v2  ;;  %v2714_v60 = vmul.f32 %v7736_v28, %v2678_v0  ;;  %v4333_v19 = vld [vmem:[%s7401_s3 + $0x18] ss:$0 sm:$0xff]  ;;  %v4334_v56 = vld [vmem:[%s7402_s4] ss:$0 sm:$0xff]  ;;  %v3278_v16 = vld [vmem:[#allocation2 + $0x1cb] sm:$0xff] }
 0x2d8   : > { %v2546_v45 = vadd.f32 %v2514_v14, %v2445_v43  ;;  %v3402_v8 = vmul.f32 %v4333_v19, %v3366_v7  ;;  %v2813_v39 = vmul.f32 %v7737_v50, %v2777_v29  ;;  %v2814_v37 = vmul.f32 %v7737_v50, %v2778_v34  ;;  %v3179_v13 = vld [vmem:[#allocation2 + $0x1d2] sm:$0xff] }
 0x2d9   : > { %v3334_v38 = vadd.f32 %v3302_v4, %v3234_v62  ;;  %v2645_v33 = vadd.f32 %v2613_v53, %v2545_v47  ;;  %v2913_v28 = vmul.f32 %v7738_v21, %v2877_v23  ;;  %v2914_v26 = vmul.f32 %v7738_v21, %v2878_v32  ;;  %v3279_v57 = vld [vmem:[#allocation2 + $0x1d3] sm:$0xff] }
 0x2da   : > { %v2646_v63 = vadd.f32 %v2614_v55, %v2546_v45  ;;  %v3014_v11 = vmul.f32 %v7739_v41, %v2978_v61  ;;  %v3015_v40 = vmul.f32 %v7739_v41, %v2979_v25  ;;  %v3114_v21 = vmul.f32 %v4923_v35, %v3078_v59  ;;  %v3378_v2 = vld [vmem:[#allocation2 + $0x1cc] sm:$0xff]  ;;  %v3379_v30 = vld [vmem:[#allocation2 + $0x1d4] sm:$0xff] }
 0x2db   : > { %v3434_v24 = vadd.f32 %v3402_v8, %v3334_v38  ;;  %v2745_v49 = vadd.f32 %v2713_v27, %v2645_v33  ;;  %v3115_v17 = vmul.f32 %v4923_v35, %v3079_v46  ;;  %v3214_v41 = vmul.f32 %v4927_v36, %v3178_v1 }
 0x2dc   : > { %v2746_v20 = vadd.f32 %v2714_v60, %v2646_v63  ;;  %v3215_v14 = vmul.f32 %v4927_v36, %v3179_v13  ;;  %v3314_v0 = vmul.f32 %v8150_v51, %v3278_v16  ;;  %v3315_v5 = vmul.f32 %v8150_v51, %v3279_v57 }
 0x2dd   : > { %v3473_v58 = vadd.f32 %v4334_v56, %v3434_v24  ;;  %v2845_v3 = vadd.f32 %v2813_v39, %v2745_v49  ;;  %v3414_v43 = vmul.f32 %v4333_v19, %v3378_v2  ;;  %v3415_v29 = vmul.f32 %v4333_v19, %v3379_v30 }
 0x2de   : > { %v2846_v50 = vadd.f32 %v2814_v37, %v2746_v20 }
 0x2df   : > { %v4310_v15 = vpop.eup %4309  ;;  %v3505_v42 = vsub.f32 0.0, %v3473_v58  ;;  %v2945_v44 = vadd.f32 %v2913_v28, %v2845_v3 }
 0x2e0   : > { %v4312_v54 = vpop.eup %4311  ;;  %v3695_v12 = vmul.f32 %v4310_v15, %v7220_v48  ;;  %v2946_v22 = vadd.f32 %v2914_v26, %v2846_v50 }
 0x2e1   : > { %v3602_v18 = vadd.f32 1.0, %v4312_v54  ;;  %v3555_v31 = vmul.f32 1.442695, %v3505_v42  ;;  %v3046_v52 = vadd.f32 %v3014_v11, %v2945_v44 }
 0x2e2   : > { %3775 = vrot.lane.b32.xlu0 %v3695_v12, %s4344_s16  ;;  %v3047_v10 = vadd.f32 %v3015_v40, %v2946_v22 }
 0x2e3   : > { %4313 = vrcp.f32 %v3602_v18  ;;  %v3146_v48 = vadd.f32 %v3114_v21, %v3046_v52  ;;  %v3796_v53 = vpop.permute.xlu0 %3795 }
 0x2e4   : > { %4315 = vpow2.f32 %v3555_v31  ;;  %v3147_v35 = vadd.f32 %v3115_v17, %v3047_v10  ;;  %3866 = vst.msk [vmem:[%s4801_s11 + $0xd0] sm:$0xff] %vm3839_vm3, %v3796_v53 }
 0x2e5   : > { %v3246_v7 = vadd.f32 %v3214_v41, %v3146_v48 }
 0x2e6   : > { %v3247_v55 = vadd.f32 %v3215_v14, %v3147_v35 }
 0x2e7   : > { %v3346_v6 = vadd.f32 %v3314_v0, %v3246_v7 }
 0x2e8   : > { %v3347_v62 = vadd.f32 %v3315_v5, %v3247_v55 }
 0x2e9   : > { %v3446_v36 = vadd.f32 %v3414_v43, %v3346_v6 }
 0x2ea   : > { %v3447_v4 = vadd.f32 %v3415_v29, %v3347_v62 }
 0x2eb   : > { %v3485_v34 = vadd.f32 %v4334_v56, %v3446_v36 }
 0x2ec   : > { %v3486_v47 = vadd.f32 %v4334_v56, %v3447_v4 }
 0x2ed   : > { %v4314_v27 = vpop.eup %4313  ;;  %v3517_v45 = vsub.f32 0.0, %v3485_v34 }
 0x2ee   : > { %v4316_v60 = vpop.eup %4315  ;;  %v3698_v23 = vmul.f32 %v4314_v27, %v7272_v9  ;;  %v3518_v51 = vsub.f32 0.0, %v3486_v47 }
 0x2ef   : > { %v3601_v38 = vadd.f32 1.0, %v4316_v60  ;;  %v3579_v8 = vmul.f32 1.442695, %v3517_v45 }
 0x2f0   : > { %3781 = vrot.lane.b32.xlu1 %v3698_v23, %s4344_s16  ;;  %v3581_v32 = vmul.f32 1.442695, %v3518_v51 }
 0x2f1   : > { %4317 = vrcp.f32 %v3601_v38  ;;  %v3770_v19 = vpop.permute.xlu1 %3769 }
 0x2f2   : > { %4319 = vpow2.f32 %v3581_v32  ;;  %3853 = vst.msk [vmem:[%s4801_s11 + $0x68] sm:$0xff] %vm3839_vm3, %v3770_v19 }
 0x2f3   : > { %4321 = vpow2.f32 %v3579_v8 }
 0x2fb   : > { %v4318_v33 = vpop.eup %4317 }
 0x2fc   : > { %v4320_v39 = vpop.eup %4319  ;;  %v3697_v63 = vmul.f32 %v4318_v33, %v3473_v58 }
 0x2fd   : > { %v4322_v37 = vpop.eup %4321  ;;  %v3614_v61 = vadd.f32 1.0, %v4320_v39 }
 0x2fe   : > { %3779 = vrot.lane.b32.xlu0 %v3697_v63, %s4344_s16  ;;  %v3613_v9 = vadd.f32 1.0, %v4322_v37 }
 0x2ff   : > { %4323 = vrcp.f32 %v3614_v61  ;;  %v3768_v24 = vpop.permute.xlu0 %3767 }
 0x300   : > { %4325 = vrcp.f32 %v3613_v9  ;;  %3852 = vst.msk [vmem:[%s4801_s11 + $0x60] sm:$0xff] %vm3839_vm3, %v3768_v24 }
 0x309   : > { %v4324_v25 = vpop.eup %4323 }
 0x30a   : > { %v4326_v49 = vpop.eup %4325  ;;  %v3710_v28 = vmul.f32 %v4324_v25, %v3486_v47 }
 0x30b   : > { %v3709_v20 = vmul.f32 %v4326_v49, %v3485_v34 }
 0x30c   : > { %3805 = vrot.lane.b32.xlu1 %v3710_v28, %s4344_s16 }
 0x30d   : > { %3803 = vrot.lane.b32.xlu0 %v3709_v20, %s4344_s16  ;;  %v3802_v26 = vpop.permute.xlu1 %3801 }
 0x30e   : > { %3869 = vst.msk [vmem:[%s4801_s11 + $0xe8] sm:$0xff] %vm3839_vm3, %v3802_v26 }
 0x31b   : > { %v3800_v59 = vpop.permute.xlu0 %3799 }
 0x31c   : > { %3868 = vst.msk [vmem:[%s4801_s11 + $0xe0] sm:$0xff] %vm3839_vm3, %v3800_v59 }
 0x329   : > { %v3774_v56 = vpop.permute.xlu1 %3773 }
 0x32a   : > { %3855 = vst.msk [vmem:[%s4801_s11 + $0x78] sm:$0xff] %vm3839_vm3, %v3774_v56 }
 0x337   : > { %v3772_v58 = vpop.permute.xlu0 %3771 }
 0x338   : > { %3854 = vst.msk [vmem:[%s4801_s11 + $0x70] sm:$0xff] %vm3839_vm3, %v3772_v58 }
 0x346   : > { %v3778_v46 = vpop.permute.xlu1 %3777 }
 0x347   : > { %3857 = vst.msk [vmem:[%s4801_s11 + $0x88] sm:$0xff] %vm3839_vm3, %v3778_v46 }
 0x354   : > { %v3776_v3 = vpop.permute.xlu0 %3775 }
 0x355   : > { %3856 = vst.msk [vmem:[%s4801_s11 + $0x80] sm:$0xff] %vm3839_vm3, %v3776_v3 }
 0x362   : > { %v3782_v11 = vpop.permute.xlu1 %3781 }
 0x363   : > { %3859 = vst.msk [vmem:[%s4801_s11 + $0x98] sm:$0xff] %vm3839_vm3, %v3782_v11 }
 0x370   : > { %v3780_v50 = vpop.permute.xlu0 %3779 }
 0x371   : > { %3858 = vst.msk [vmem:[%s4801_s11 + $0x90] sm:$0xff] %vm3839_vm3, %v3780_v50 }
 0x37e   : > { %v3806_v40 = vpop.permute.xlu1 %3805 }
 0x37f   : > { %3871 = vst.msk [vmem:[%s4801_s11 + $0xf8] sm:$0xff] %vm3839_vm3, %v3806_v40  ;;  %v3804_v1 = vpop.permute.xlu0 %3803 }
 0x380   : > { %3870 = vst.msk [vmem:[%s4801_s11 + $0xf0] sm:$0xff] %vm3839_vm3, %v3804_v1 }
 0x381 PF: > { %s15_s18 = sadd.s32 1, %s4341_s18  }
 0x382   : > { %p12_p4 = scmp.ge.s32.totalorder %s15_s18, 4  }
 0x384   :  { %14 = sbr.rel (!%p12_p4) target bundleno = 1 (0x1), region = 74 }

</bundles_post_ra>
